<compile_context>
chip_gen: v5e
topology: v5e:2x2
jax: 0.10.0
libtpu: 0.0.40
codegen_flags: <defaults>
</compile_context>

<pallas_src>
import functools

import jax
import jax.numpy as jnp
from jax import lax
from jax.experimental import pallas as pl
from jax.experimental.pallas import tpu as pltpu


# ---------------------------------------------------------------------------
# Fixed architecture constants (the PyTorch model's fc=15360 pins the shapes:
# input (N, 3, 32, 15) -> conv1 -> (N, 64, 16, 15) -> conv2 -> (N, 128, 8, 15))
# ---------------------------------------------------------------------------
H1, W_REAL, C_IN = 32, 15, 3     # input height / width / channels
WP = 16                          # width padded 15 -> 16 (8-aligned, zero pad col)
KH, KW = 5, 3                    # conv kernel
C1, C2 = 64, 128                 # conv1 / conv2 output channels
K1 = KH * KW * C_IN              # 45  block-1 im2col depth
K1P = 64                         # zero-padded block-1 contraction depth
K2 = KH * KW * C1                # 960 block-2 im2col depth
H2 = H1 // 2                     # 16  block-2 input height (after pool 1)
H3 = H2 // 2                     # 8   block-2 output height (after pool 2)
PAD2 = 40                        # zero margin rows around p1 (>= 2*WP+1, mult of 8)
ROWS2 = PAD2 + H2 * WP + PAD2    # 336 staging scratch rows


# ---------------------------------------------------------------------------
# The single fused kernel: one grid step == one block of B_BLK samples.
# ---------------------------------------------------------------------------
def _senet_kernel(x1_ref, w1_ref, a1_ref, se1a_ref, se1b_ref,
                  w2_ref, a2_ref, se2a_ref, se2b_ref,
                  wfc_ref, bfc_ref, o_ref, p1pad_ref, *, bblk):
    f32 = jnp.float32
    neg = f32(0.01)                                   # LeakyReLU slope

    # hoisted weight / affine loads (resident, constant index_maps)
    scale1, shift1 = a1_ref[0:1, :], a1_ref[1:2, :]
    scale2, shift2 = a2_ref[0:1, :], a2_ref[1:2, :]
    w2 = w2_ref[...]
    se1a, se1b = se1a_ref[...], se1b_ref[...]
    se2a, se2b = se2a_ref[...], se2b_ref[...]
    bfc = bfc_ref[...]

    # Row masks excluding the zero/garbage width-pad column (w == WP-1) from the
    # SE global averages.  Built once per grid step (hoisted out of the loop).
    r1 = lax.broadcasted_iota(jnp.int32, (H1 * WP, 1), 0)
    mask1 = (jnp.bitwise_and(r1, WP - 1) != WP - 1).astype(f32)      # (512, 1)
    r2 = lax.broadcasted_iota(jnp.int32, (H2 * WP, 1), 0)
    mask2 = (jnp.bitwise_and(r2, WP - 1) != WP - 1).astype(f32)      # (256, 1)

    # Zero the height-pad margins of the block-2 staging scratch.  Done
    # unconditionally so it is valid on every core under megacore sharding.
    p1pad_ref[0:PAD2, :] = jnp.zeros((PAD2, C1), f32)
    p1pad_ref[PAD2 + H2 * WP:, :] = jnp.zeros((PAD2, C1), f32)

    # -------- block 1 conv for the whole batch block: one dense MXU dot ----
    # x1 is host-im2col'ed (dense K = 64), M = bblk * 512.
    y1 = jnp.dot(x1_ref[...], w1_ref[...], preferred_element_type=f32)
    y1 = y1 * scale1 + shift1                         # conv bias + eval-BN folded
    y1 = jnp.where(y1 > 0, y1, neg * y1)              # LeakyReLU(0.01)

    for b in range(bblk):                             # static, unrolled
        y1b = y1[b * H1 * WP:(b + 1) * H1 * WP, :]    # (512, 64) this sample

        # SE1 squeeze/excite: masked global average -> FC -> ReLU -> FC -> sigmoid
        s1 = jnp.sum(y1b * mask1, axis=0, keepdims=True) * (1.0 / (H1 * W_REAL))
        s1 = jnp.maximum(jnp.dot(s1, se1a, preferred_element_type=f32), 0.0)
        s1 = jax.nn.sigmoid(jnp.dot(s1, se1b, preferred_element_type=f32))

        # MaxPool((2,1)) BEFORE the strictly-positive SE scale (exact); zero the
        # pad column so block-2's shifted-window conv sees true zero padding.
        pooled = [jnp.maximum(y1b[(2 * i) * WP:(2 * i + 1) * WP, :],
                              y1b[(2 * i + 1) * WP:(2 * i + 2) * WP, :])
                  for i in range(H2)]
        p1 = jnp.concatenate(pooled, axis=0) * s1 * mask2            # (256, 64)
        p1pad_ref[PAD2:PAD2 + H2 * WP, :] = p1

        # -------- block 2: tap-concatenated K=960 im2col straight from VMEM -
        # flat shift (dh-2)*WP + (dw-1) realises the (2,1) zero padding exactly
        # because the pad column and the height margins are zero.
        taps = [p1pad_ref[PAD2 + (dh - 2) * WP + (dw - 1):
                          PAD2 + (dh - 2) * WP + (dw - 1) + H2 * WP, :]
                for dh in range(KH) for dw in range(KW)]
        x2 = jnp.concatenate(taps, axis=1)                           # (256, 960)
        y2 = jnp.dot(x2, w2, preferred_element_type=f32)             # (256, 128)
        y2 = y2 * scale2 + shift2
        y2 = jnp.where(y2 > 0, y2, neg * y2)

        # SE2 (masked average over the 15 real columns), pool, SE scale
        s2 = jnp.sum(y2 * mask2, axis=0, keepdims=True) * (1.0 / (H2 * W_REAL))
        s2 = jnp.maximum(jnp.dot(s2, se2a, preferred_element_type=f32), 0.0)
        s2 = jax.nn.sigmoid(jnp.dot(s2, se2b, preferred_element_type=f32))
        pooled2 = [jnp.maximum(y2[(2 * i) * WP:(2 * i + 1) * WP, :],
                               y2[(2 * i + 1) * WP:(2 * i + 2) * WP, :])
                   for i in range(H3)]
        p2 = jnp.concatenate(pooled2, axis=0) * s2                   # (128, 128)

        # -------- fused FC head: 2 classes, VPU multiply + lane/sublane reduce
        # (wfc has zero rows at the pad column, so p2's garbage there is inert)
        l0 = jnp.sum(jnp.sum(p2 * wfc_ref[0], axis=1, keepdims=True),
                     axis=0, keepdims=True)
        l1 = jnp.sum(jnp.sum(p2 * wfc_ref[1], axis=1, keepdims=True),
                     axis=0, keepdims=True)
        o_ref[b:b + 1, :] = jnp.concatenate([l0, l1], axis=1) + bfc


# ---------------------------------------------------------------------------
# Host-side prep (cheap one-shot XLA ops on tiny tensors / weights)
# ---------------------------------------------------------------------------
def _im2col_block1(x_nhwc):
    """Conv1 im2col with pad (2,1): (n,32,15,3) -> (n*512, 64); pad col/K are 0."""
    n = x_nhwc.shape[0]
    xp = jnp.pad(x_nhwc, ((0, 0), (2, 2), (1, 1), (0, 0)))
    cols = [xp[:, dh:dh + H1, dw:dw + W_REAL, :]
            for dh in range(KH) for dw in range(KW)]
    xu = jnp.concatenate(cols, axis=-1)                       # (n, 32, 15, 45)
    xu = jnp.pad(xu, ((0, 0), (0, 0), (0, WP - W_REAL), (0, K1P - K1)))
    return xu.reshape(n * H1 * WP, K1P)


def _fold_conv_bn(p, k_pad):
    """Fold conv bias + eval BatchNorm into (scale, shift); flatten HWIO weight."""
    scale = p["gamma"] / jnp.sqrt(p["var"] + 1e-5)
    shift = p["beta"] + (p["b"] - p["mean"]) * scale
    wk = p["w"].reshape(-1, p["w"].shape[-1])                 # (KH*KW*Cin, Cout)
    if k_pad > wk.shape[0]:
        wk = jnp.pad(wk, ((0, k_pad - wk.shape[0]), (0, 0)))
    return wk, jnp.stack([scale, shift], axis=0)


def _prep_fc(fc_w, fc_b):
    """Re-lay (15360,2) NCHW-flatten weight to (class, h*WP+w, C2); zero pad-col rows."""
    wfc = fc_w.reshape(C2, H3, W_REAL, 2)
    wfc = jnp.pad(wfc, ((0, 0), (0, 0), (0, WP - W_REAL), (0, 0)))
    wfc = jnp.transpose(wfc, (3, 1, 2, 0)).reshape(2, H3 * WP, C2)
    return wfc, fc_b[None, :]


def _pick_block_batch(n, cap):
    """Largest divisor of n (<= cap) that still leaves >= 2 grid steps (v7x: 2 TCs)."""
    best = 1
    for d in range(1, min(cap, n) + 1):
        if n % d == 0 and (n // d >= 2 or n == 1):
            best = d
    return best


def forward(x_nchw, params, *, max_block_batch=8):
    n, cin, h, w = x_nchw.shape
    assert (cin, h, w) == (C_IN, H1, W_REAL), (cin, h, w)
    x = jnp.transpose(x_nchw, (0, 2, 3, 1)).astype(jnp.float32)   # NCHW -> NHWC
    x1 = _im2col_block1(x)                                        # (n*512, 64)

    b_blk = _pick_block_batch(n, max_block_batch)
    grid = (n // b_blk,)

    w1k, a1 = _fold_conv_bn(params["b1"], K1P)
    w2k, a2 = _fold_conv_bn(params["b2"], K2)
    wfc, bfc = _prep_fc(params["fc_w"], params["fc_b"])

    flops = int(n * (2 * H1 * WP * K1P * C1 + 2 * H2 * WP * K2 * C2
                     + 2 * H3 * WP * C2 * 2))
    cost = pl.CostEstimate(
        flops=flops,
        transcendentals=int(n * (C1 + C2)),
        bytes_accessed=int(4 * (x1.size + w1k.size + w2k.size + wfc.size) + 8 * n))

    out = pl.pallas_call(
        functools.partial(_senet_kernel, bblk=b_blk),
        out_shape=jax.ShapeDtypeStruct((n // b_blk, b_blk, 2), jnp.float32),
        grid=grid,
        in_specs=[
            pl.BlockSpec((b_blk * H1 * WP, K1P), lambda i: (i, 0)),   # im2col input
            pl.BlockSpec((K1P, C1), lambda i: (0, 0)),                # conv1 weight
            pl.BlockSpec((2, C1), lambda i: (0, 0)),                  # conv1 affine
            pl.BlockSpec((C1, C1 // 16), lambda i: (0, 0)),           # SE1 fc1
            pl.BlockSpec((C1 // 16, C1), lambda i: (0, 0)),           # SE1 fc2
            pl.BlockSpec((K2, C2), lambda i: (0, 0)),                 # conv2 weight
            pl.BlockSpec((2, C2), lambda i: (0, 0)),                  # conv2 affine
            pl.BlockSpec((C2, C2 // 16), lambda i: (0, 0)),           # SE2 fc1
            pl.BlockSpec((C2 // 16, C2), lambda i: (0, 0)),           # SE2 fc2
            pl.BlockSpec((2, H3 * WP, C2), lambda i: (0, 0, 0)),      # FC weight
            pl.BlockSpec((1, 2), lambda i: (0, 0)),                   # FC bias
        ],
        out_specs=pl.BlockSpec((None, b_blk, 2), lambda i: (i, 0, 0)),
        scratch_shapes=[pltpu.VMEM((ROWS2, C1), jnp.float32)],
        compiler_params=pltpu.CompilerParams(
            dimension_semantics=("parallel",),
            vmem_limit_bytes=40 * 1024 * 1024),
        cost_estimate=cost,
    )(x1, w1k, a1, params["b1"]["se_w1"], params["b1"]["se_w2"],
      w2k, a2, params["b2"]["se_w1"], params["b2"]["se_w2"], wfc, bfc)
    # TODO(synk): nn.Dropout is identity at inference (eval); training RNG mask not implemented.
    return out.reshape(n, 2)


# ---------------------------------------------------------------------------
# Parameters (HWIO conv weights; real PyTorch OIHW weights need .transpose(2,3,1,0))
# ---------------------------------------------------------------------------
def xavier_uniform(key, shape, fan_in, fan_out):
    limit = (6.0 / (fan_in + fan_out)) ** 0.5
    return jax.random.uniform(key, shape, jnp.float32, -limit, limit)


def make_params(key):
    ks = list(jax.random.split(key, 8))
    params = {}
    params["b1"] = dict(
        w=xavier_uniform(ks[0], (KH, KW, C_IN, C1), C_IN * 15, C1 * 15),
        b=jnp.full((C1,), 0.01, jnp.float32),
        gamma=jnp.ones((C1,), jnp.float32), beta=jnp.zeros((C1,), jnp.float32),
        mean=jnp.zeros((C1,), jnp.float32), var=jnp.ones((C1,), jnp.float32),
        se_w1=xavier_uniform(ks[1], (C1, C1 // 16), C1, C1 // 16),
        se_w2=xavier_uniform(ks[2], (C1 // 16, C1), C1 // 16, C1),
    )
    params["b2"] = dict(
        w=xavier_uniform(ks[3], (KH, KW, C1, C2), C1 * 15, C2 * 15),
        b=jnp.full((C2,), 0.01, jnp.float32),
        gamma=jnp.ones((C2,), jnp.float32), beta=jnp.zeros((C2,), jnp.float32),
        mean=jnp.zeros((C2,), jnp.float32), var=jnp.ones((C2,), jnp.float32),
        se_w1=xavier_uniform(ks[4], (C2, C2 // 16), C2, C2 // 16),
        se_w2=xavier_uniform(ks[5], (C2 // 16, C2), C2 // 16, C2),
    )
    params["fc_w"] = xavier_uniform(ks[6], (15360, 2), 15360, 2)
    params["fc_b"] = jax.random.uniform(ks[7], (2,), jnp.float32, -0.01, 0.01)
    return params


# ---------------------------------------------------------------------------
# Pure-JAX reference (lax.conv, PyTorch op order) for the correctness cross-check
# ---------------------------------------------------------------------------
def ref_forward(x_nchw, params):
    n = x_nchw.shape[0]
    x = jnp.transpose(x_nchw, (0, 2, 3, 1)).astype(jnp.float32)
    for blk in ("b1", "b2"):
        p = params[blk]
        y = lax.conv_general_dilated(
            x, p["w"], (1, 1), ((2, 2), (1, 1)),
            dimension_numbers=("NHWC", "HWIO", "NHWC")) + p["b"]
        scale = p["gamma"] / jnp.sqrt(p["var"] + 1e-5)
        shift = p["beta"] - p["mean"] * scale
        y = y * scale + shift
        y = jnp.where(y > 0, y, 0.01 * y)
        s = jnp.mean(y, axis=(1, 2))
        s = jax.nn.sigmoid(jnp.maximum(s @ p["se_w1"], 0.0) @ p["se_w2"])
        y = y * s[:, None, None, :]
        x = jnp.maximum(y[:, 0::2], y[:, 1::2])
    x = jnp.transpose(x, (0, 3, 1, 2)).reshape(n, -1)
    return x @ params["fc_w"] + params["fc_b"]


if __name__ == "__main__":
    key = jax.random.PRNGKey(0)
    k_in, k_par = jax.random.split(key)
    params = make_params(k_par)

    # fc expects 15360 = 128 * (32/4) * 15 -> "5-day" input of (N, 3, 32, 15).
    x = jax.random.normal(k_in, (2, 3, 32, 15), jnp.float32)
    out = jax.block_until_ready(jax.jit(forward)(x, params))
    ref = jax.block_until_ready(jax.jit(ref_forward)(x, params))
    assert out.shape == (2, 2), out.shape
    assert jnp.allclose(out, ref, atol=1e-3, rtol=1e-3), (out, ref)

    # exercise the batch-blocked path (B_BLK = 8, grid = (2,))
    x16 = jax.random.normal(jax.random.PRNGKey(1), (16, 3, 32, 15), jnp.float32)
    out16 = jax.block_until_ready(jax.jit(forward)(x16, params))
    ref16 = jax.block_until_ready(jax.jit(ref_forward)(x16, params))
    assert out16.shape == (16, 2), out16.shape
    assert jnp.allclose(out16, ref16, atol=1e-3, rtol=1e-3), (out16, ref16)

    print("KERNEL_OK")
</pallas_src>

<mosaic_0001>
module attributes {stable_mosaic.version = 11 : i64} {
  func.func @_senet_kernel(%arg0: i32, %arg1: memref<512x64xf32, #tpu.memory_space<vmem>>, %arg2: memref<64x64xf32, #tpu.memory_space<vmem>>, %arg3: memref<2x64xf32, #tpu.memory_space<vmem>>, %arg4: memref<64x4xf32, #tpu.memory_space<vmem>>, %arg5: memref<4x64xf32, #tpu.memory_space<vmem>>, %arg6: memref<960x128xf32, #tpu.memory_space<vmem>>, %arg7: memref<2x128xf32, #tpu.memory_space<vmem>>, %arg8: memref<128x8xf32, #tpu.memory_space<vmem>>, %arg9: memref<8x128xf32, #tpu.memory_space<vmem>>, %arg10: memref<2x128x128xf32, #tpu.memory_space<vmem>>, %arg11: memref<1x2xf32, #tpu.memory_space<vmem>>, %arg12: memref<1x1x2xf32, #tpu.memory_space<vmem>>, %arg13: memref<336x64xf32, #tpu.memory_space<vmem>>) attributes {dimension_semantics = [#tpu.dimension_semantics<parallel>], iteration_bounds = array<i64: 2>, scalar_prefetch = 0 : i64, scratch_operands = 1 : i64, tpu.core_type = #tpu.core_type<tc>, window_params = [{transform_indices = @transform_0, window_bounds = array<i64: 512, 64>}, {pipeline_mode = #tpu.pipeline_mode<synchronous>, transform_indices = @transform_1, window_bounds = array<i64: 64, 64>}, {pipeline_mode = #tpu.pipeline_mode<synchronous>, transform_indices = @transform_2, window_bounds = array<i64: 2, 64>}, {pipeline_mode = #tpu.pipeline_mode<synchronous>, transform_indices = @transform_3, window_bounds = array<i64: 64, 4>}, {pipeline_mode = #tpu.pipeline_mode<synchronous>, transform_indices = @transform_4, window_bounds = array<i64: 4, 64>}, {pipeline_mode = #tpu.pipeline_mode<synchronous>, transform_indices = @transform_5, window_bounds = array<i64: 960, 128>}, {pipeline_mode = #tpu.pipeline_mode<synchronous>, transform_indices = @transform_6, window_bounds = array<i64: 2, 128>}, {pipeline_mode = #tpu.pipeline_mode<synchronous>, transform_indices = @transform_7, window_bounds = array<i64: 128, 8>}, {pipeline_mode = #tpu.pipeline_mode<synchronous>, transform_indices = @transform_8, window_bounds = array<i64: 8, 128>}, {pipeline_mode = #tpu.pipeline_mode<synchronous>, transform_indices = @transform_9, window_bounds = array<i64: 2, 128, 128>}, {pipeline_mode = #tpu.pipeline_mode<synchronous>, transform_indices = @transform_10, window_bounds = array<i64: 1, 2>}, {transform_indices = @transform_11, window_bounds = array<i64: 1, 1, 2>}]} {
    %c0 = arith.constant 0 : index
    %c0_0 = arith.constant 0 : index
    %0 = vector.load %arg3[%c0, %c0_0] : memref<2x64xf32, #tpu.memory_space<vmem>>, vector<1x64xf32>
    %c1 = arith.constant 1 : index
    %c0_1 = arith.constant 0 : index
    %1 = vector.load %arg3[%c1, %c0_1] : memref<2x64xf32, #tpu.memory_space<vmem>>, vector<1x64xf32>
    %c0_2 = arith.constant 0 : index
    %c0_3 = arith.constant 0 : index
    %2 = vector.load %arg7[%c0_2, %c0_3] : memref<2x128xf32, #tpu.memory_space<vmem>>, vector<1x128xf32>
    %c1_4 = arith.constant 1 : index
    %c0_5 = arith.constant 0 : index
    %3 = vector.load %arg7[%c1_4, %c0_5] : memref<2x128xf32, #tpu.memory_space<vmem>>, vector<1x128xf32>
    %c0_6 = arith.constant 0 : index
    %c0_7 = arith.constant 0 : index
    %4 = vector.load %arg6[%c0_6, %c0_7] : memref<960x128xf32, #tpu.memory_space<vmem>>, vector<960x128xf32>
    %c0_8 = arith.constant 0 : index
    %c0_9 = arith.constant 0 : index
    %5 = vector.load %arg4[%c0_8, %c0_9] : memref<64x4xf32, #tpu.memory_space<vmem>>, vector<64x4xf32>
    %c0_10 = arith.constant 0 : index
    %c0_11 = arith.constant 0 : index
    %6 = vector.load %arg5[%c0_10, %c0_11] : memref<4x64xf32, #tpu.memory_space<vmem>>, vector<4x64xf32>
    %c0_12 = arith.constant 0 : index
    %c0_13 = arith.constant 0 : index
    %7 = vector.load %arg8[%c0_12, %c0_13] : memref<128x8xf32, #tpu.memory_space<vmem>>, vector<128x8xf32>
    %c0_14 = arith.constant 0 : index
    %c0_15 = arith.constant 0 : index
    %8 = vector.load %arg9[%c0_14, %c0_15] : memref<8x128xf32, #tpu.memory_space<vmem>>, vector<8x128xf32>
    %c0_16 = arith.constant 0 : index
    %c0_17 = arith.constant 0 : index
    %9 = vector.load %arg11[%c0_16, %c0_17] : memref<1x2xf32, #tpu.memory_space<vmem>>, vector<1x2xf32>
    %10 = tpu.iota {dimensions = array<i32: 0>} : vector<512x1xi32>
    %c15_i32 = arith.constant 15 : i32
    %11 = vector.broadcast %c15_i32 : i32 to vector<512x1xi32>
    %12 = arith.andi %10, %11 : vector<512x1xi32>
    %c15_i32_18 = arith.constant 15 : i32
    %13 = vector.broadcast %c15_i32_18 : i32 to vector<512x1xi32>
    %14 = arith.cmpi ne, %12, %13 : vector<512x1xi32>
    %15 = arith.extui %14 : vector<512x1xi1> to vector<512x1xi32>
    %16 = arith.sitofp %15 : vector<512x1xi32> to vector<512x1xf32>
    %17 = tpu.iota {dimensions = array<i32: 0>} : vector<256x1xi32>
    %c15_i32_19 = arith.constant 15 : i32
    %18 = vector.broadcast %c15_i32_19 : i32 to vector<256x1xi32>
    %19 = arith.andi %17, %18 : vector<256x1xi32>
    %c15_i32_20 = arith.constant 15 : i32
    %20 = vector.broadcast %c15_i32_20 : i32 to vector<256x1xi32>
    %21 = arith.cmpi ne, %19, %20 : vector<256x1xi32>
    %22 = arith.extui %21 : vector<256x1xi1> to vector<256x1xi32>
    %23 = arith.sitofp %22 : vector<256x1xi32> to vector<256x1xf32>
    %cst = arith.constant 0.000000e+00 : f32
    %24 = vector.broadcast %cst : f32 to vector<40x64xf32>
    %c0_21 = arith.constant 0 : index
    %c0_22 = arith.constant 0 : index
    %25 = vector.load %arg13[%c0_21, %c0_22] : memref<336x64xf32, #tpu.memory_space<vmem>>, vector<40x64xf32>
    tpu.vector_store %arg13[%c0_21, %c0_22], %24 {strides = array<i32>} : memref<336x64xf32, #tpu.memory_space<vmem>>, vector<40x64xf32>,
    %cst_23 = arith.constant 0.000000e+00 : f32
    %26 = vector.broadcast %cst_23 : f32 to vector<40x64xf32>
    %c296 = arith.constant 296 : index
    %c0_24 = arith.constant 0 : index
    %27 = vector.load %arg13[%c296, %c0_24] : memref<336x64xf32, #tpu.memory_space<vmem>>, vector<40x64xf32>
    tpu.vector_store %arg13[%c296, %c0_24], %26 {strides = array<i32>} : memref<336x64xf32, #tpu.memory_space<vmem>>, vector<40x64xf32>,
    %c0_25 = arith.constant 0 : index
    %c0_26 = arith.constant 0 : index
    %28 = vector.load %arg1[%c0_25, %c0_26] : memref<512x64xf32, #tpu.memory_space<vmem>>, vector<512x64xf32>
    %c0_27 = arith.constant 0 : index
    %c0_28 = arith.constant 0 : index
    %29 = vector.load %arg2[%c0_27, %c0_28] : memref<64x64xf32, #tpu.memory_space<vmem>>, vector<64x64xf32>
    %cst_29 = arith.constant dense<0.000000e+00> : vector<512x64xf32>
    %30 = tpu.matmul %28, %29, %cst_29 {dimension_numbers = #tpu.dot_dimension_numbers<[1], [0], [0], [1], [0, 0, 1, 1], [], []>} : vector<512x64xf32>, vector<64x64xf32>, vector<512x64xf32> -> vector<512x64xf32>
    %31 = vector.broadcast %0 : vector<1x64xf32> to vector<512x64xf32>
    %32 = arith.mulf %30, %31 : vector<512x64xf32>
    %33 = vector.broadcast %1 : vector<1x64xf32> to vector<512x64xf32>
    %34 = arith.addf %32, %33 : vector<512x64xf32>
    %cst_30 = arith.constant 0.000000e+00 : f32
    %35 = vector.broadcast %cst_30 : f32 to vector<512x64xf32>
    %36 = arith.cmpf ogt, %34, %35 : vector<512x64xf32>
    %cst_31 = arith.constant 0.00999999977 : f32
    %37 = vector.broadcast %cst_31 : f32 to vector<512x64xf32>
    %38 = arith.mulf %37, %34 : vector<512x64xf32>
    %39 = arith.select %36, %34, %38 : vector<512x64xi1>, vector<512x64xf32>
    %40 = vector.broadcast %16 : vector<512x1xf32> to vector<512x64xf32>
    %41 = arith.mulf %39, %40 : vector<512x64xf32>
    %cst_32 = arith.constant dense<0.000000e+00> : vector<64xf32>
    %42 = vector.multi_reduction <add>, %41, %cst_32 [0] : vector<512x64xf32> to vector<64xf32>
    %43 = vector.shape_cast %42 : vector<64xf32> to vector<1x64xf32>
    %cst_33 = arith.constant 0.00208333344 : f32
    %44 = vector.broadcast %cst_33 : f32 to vector<1x64xf32>
    %45 = arith.mulf %43, %44 : vector<1x64xf32>
    %cst_34 = arith.constant dense<0.000000e+00> : vector<1x4xf32>
    %46 = tpu.matmul %45, %5, %cst_34 {dimension_numbers = #tpu.dot_dimension_numbers<[1], [0], [0], [1], [0, 0, 1, 1], [], []>} : vector<1x64xf32>, vector<64x4xf32>, vector<1x4xf32> -> vector<1x4xf32>
    %cst_35 = arith.constant 0.000000e+00 : f32
    %47 = vector.broadcast %cst_35 : f32 to vector<1x4xf32>
    %48 = arith.maximumf %46, %47 : vector<1x4xf32>
    %cst_36 = arith.constant dense<0.000000e+00> : vector<1x64xf32>
    %49 = tpu.matmul %48, %6, %cst_36 {dimension_numbers = #tpu.dot_dimension_numbers<[1], [0], [0], [1], [0, 0, 1, 1], [], []>} : vector<1x4xf32>, vector<4x64xf32>, vector<1x64xf32> -> vector<1x64xf32>
    %50 = arith.negf %49 : vector<1x64xf32>
    %51 = math.exp %50 : vector<1x64xf32>
    %cst_37 = arith.constant 1.000000e+00 : f32
    %52 = vector.broadcast %cst_37 : f32 to vector<1x64xf32>
    %53 = arith.addf %52, %51 : vector<1x64xf32>
    %54 = arith.divf %52, %53 : vector<1x64xf32>
    %55 = vector.extract_strided_slice %39 {offsets = [0, 0], sizes = [16, 64], strides = [1, 1]} : vector<512x64xf32> to vector<16x64xf32>
    %56 = vector.extract_strided_slice %39 {offsets = [16, 0], sizes = [16, 64], strides = [1, 1]} : vector<512x64xf32> to vector<16x64xf32>
    %57 = arith.maximumf %55, %56 : vector<16x64xf32>
    %58 = vector.extract_strided_slice %39 {offsets = [32, 0], sizes = [16, 64], strides = [1, 1]} : vector<512x64xf32> to vector<16x64xf32>
    %59 = vector.extract_strided_slice %39 {offsets = [48, 0], sizes = [16, 64], strides = [1, 1]} : vector<512x64xf32> to vector<16x64xf32>
    %60 = arith.maximumf %58, %59 : vector<16x64xf32>
    %61 = vector.extract_strided_slice %39 {offsets = [64, 0], sizes = [16, 64], strides = [1, 1]} : vector<512x64xf32> to vector<16x64xf32>
    %62 = vector.extract_strided_slice %39 {offsets = [80, 0], sizes = [16, 64], strides = [1, 1]} : vector<512x64xf32> to vector<16x64xf32>
    %63 = arith.maximumf %61, %62 : vector<16x64xf32>
    %64 = vector.extract_strided_slice %39 {offsets = [96, 0], sizes = [16, 64], strides = [1, 1]} : vector<512x64xf32> to vector<16x64xf32>
    %65 = vector.extract_strided_slice %39 {offsets = [112, 0], sizes = [16, 64], strides = [1, 1]} : vector<512x64xf32> to vector<16x64xf32>
    %66 = arith.maximumf %64, %65 : vector<16x64xf32>
    %67 = vector.extract_strided_slice %39 {offsets = [128, 0], sizes = [16, 64], strides = [1, 1]} : vector<512x64xf32> to vector<16x64xf32>
    %68 = vector.extract_strided_slice %39 {offsets = [144, 0], sizes = [16, 64], strides = [1, 1]} : vector<512x64xf32> to vector<16x64xf32>
    %69 = arith.maximumf %67, %68 : vector<16x64xf32>
    %70 = vector.extract_strided_slice %39 {offsets = [160, 0], sizes = [16, 64], strides = [1, 1]} : vector<512x64xf32> to vector<16x64xf32>
    %71 = vector.extract_strided_slice %39 {offsets = [176, 0], sizes = [16, 64], strides = [1, 1]} : vector<512x64xf32> to vector<16x64xf32>
    %72 = arith.maximumf %70, %71 : vector<16x64xf32>
    %73 = vector.extract_strided_slice %39 {offsets = [192, 0], sizes = [16, 64], strides = [1, 1]} : vector<512x64xf32> to vector<16x64xf32>
    %74 = vector.extract_strided_slice %39 {offsets = [208, 0], sizes = [16, 64], strides = [1, 1]} : vector<512x64xf32> to vector<16x64xf32>
    %75 = arith.maximumf %73, %74 : vector<16x64xf32>
    %76 = vector.extract_strided_slice %39 {offsets = [224, 0], sizes = [16, 64], strides = [1, 1]} : vector<512x64xf32> to vector<16x64xf32>
    %77 = vector.extract_strided_slice %39 {offsets = [240, 0], sizes = [16, 64], strides = [1, 1]} : vector<512x64xf32> to vector<16x64xf32>
    %78 = arith.maximumf %76, %77 : vector<16x64xf32>
    %79 = vector.extract_strided_slice %39 {offsets = [256, 0], sizes = [16, 64], strides = [1, 1]} : vector<512x64xf32> to vector<16x64xf32>
    %80 = vector.extract_strided_slice %39 {offsets = [272, 0], sizes = [16, 64], strides = [1, 1]} : vector<512x64xf32> to vector<16x64xf32>
    %81 = arith.maximumf %79, %80 : vector<16x64xf32>
    %82 = vector.extract_strided_slice %39 {offsets = [288, 0], sizes = [16, 64], strides = [1, 1]} : vector<512x64xf32> to vector<16x64xf32>
    %83 = vector.extract_strided_slice %39 {offsets = [304, 0], sizes = [16, 64], strides = [1, 1]} : vector<512x64xf32> to vector<16x64xf32>
    %84 = arith.maximumf %82, %83 : vector<16x64xf32>
    %85 = vector.extract_strided_slice %39 {offsets = [320, 0], sizes = [16, 64], strides = [1, 1]} : vector<512x64xf32> to vector<16x64xf32>
    %86 = vector.extract_strided_slice %39 {offsets = [336, 0], sizes = [16, 64], strides = [1, 1]} : vector<512x64xf32> to vector<16x64xf32>
    %87 = arith.maximumf %85, %86 : vector<16x64xf32>
    %88 = vector.extract_strided_slice %39 {offsets = [352, 0], sizes = [16, 64], strides = [1, 1]} : vector<512x64xf32> to vector<16x64xf32>
    %89 = vector.extract_strided_slice %39 {offsets = [368, 0], sizes = [16, 64], strides = [1, 1]} : vector<512x64xf32> to vector<16x64xf32>
    %90 = arith.maximumf %88, %89 : vector<16x64xf32>
    %91 = vector.extract_strided_slice %39 {offsets = [384, 0], sizes = [16, 64], strides = [1, 1]} : vector<512x64xf32> to vector<16x64xf32>
    %92 = vector.extract_strided_slice %39 {offsets = [400, 0], sizes = [16, 64], strides = [1, 1]} : vector<512x64xf32> to vector<16x64xf32>
    %93 = arith.maximumf %91, %92 : vector<16x64xf32>
    %94 = vector.extract_strided_slice %39 {offsets = [416, 0], sizes = [16, 64], strides = [1, 1]} : vector<512x64xf32> to vector<16x64xf32>
    %95 = vector.extract_strided_slice %39 {offsets = [432, 0], sizes = [16, 64], strides = [1, 1]} : vector<512x64xf32> to vector<16x64xf32>
    %96 = arith.maximumf %94, %95 : vector<16x64xf32>
    %97 = vector.extract_strided_slice %39 {offsets = [448, 0], sizes = [16, 64], strides = [1, 1]} : vector<512x64xf32> to vector<16x64xf32>
    %98 = vector.extract_strided_slice %39 {offsets = [464, 0], sizes = [16, 64], strides = [1, 1]} : vector<512x64xf32> to vector<16x64xf32>
    %99 = arith.maximumf %97, %98 : vector<16x64xf32>
    %100 = vector.extract_strided_slice %39 {offsets = [480, 0], sizes = [16, 64], strides = [1, 1]} : vector<512x64xf32> to vector<16x64xf32>
    %101 = vector.extract_strided_slice %39 {offsets = [496, 0], sizes = [16, 64], strides = [1, 1]} : vector<512x64xf32> to vector<16x64xf32>
    %102 = arith.maximumf %100, %101 : vector<16x64xf32>
    %103 = tpu.concatenate %57, %60, %63, %66, %69, %72, %75, %78, %81, %84, %87, %90, %93, %96, %99, %102 in 0 : vector<16x64xf32>, vector<16x64xf32>, vector<16x64xf32>, vector<16x64xf32>, vector<16x64xf32>, vector<16x64xf32>, vector<16x64xf32>, vector<16x64xf32>, vector<16x64xf32>, vector<16x64xf32>, vector<16x64xf32>, vector<16x64xf32>, vector<16x64xf32>, vector<16x64xf32>, vector<16x64xf32>, vector<16x64xf32> -> vector<256x64xf32>
    %104 = vector.broadcast %54 : vector<1x64xf32> to vector<256x64xf32>
    %105 = arith.mulf %103, %104 : vector<256x64xf32>
    %106 = vector.broadcast %23 : vector<256x1xf32> to vector<256x64xf32>
    %107 = arith.mulf %105, %106 : vector<256x64xf32>
    %c40 = arith.constant 40 : index
    %c0_38 = arith.constant 0 : index
    %108 = vector.load %arg13[%c40, %c0_38] : memref<336x64xf32, #tpu.memory_space<vmem>>, vector<256x64xf32>
    tpu.vector_store %arg13[%c40, %c0_38], %107 {strides = array<i32>} : memref<336x64xf32, #tpu.memory_space<vmem>>, vector<256x64xf32>,
    %c7 = arith.constant 7 : index
    %c0_39 = arith.constant 0 : index
    %109 = vector.load %arg13[%c7, %c0_39] : memref<336x64xf32, #tpu.memory_space<vmem>>, vector<256x64xf32>
    %c8 = arith.constant 8 : index
    %c0_40 = arith.constant 0 : index
    %110 = vector.load %arg13[%c8, %c0_40] : memref<336x64xf32, #tpu.memory_space<vmem>>, vector<256x64xf32>
    %c9 = arith.constant 9 : index
    %c0_41 = arith.constant 0 : index
    %111 = vector.load %arg13[%c9, %c0_41] : memref<336x64xf32, #tpu.memory_space<vmem>>, vector<256x64xf32>
    %c23 = arith.constant 23 : index
    %c0_42 = arith.constant 0 : index
    %112 = vector.load %arg13[%c23, %c0_42] : memref<336x64xf32, #tpu.memory_space<vmem>>, vector<256x64xf32>
    %c24 = arith.constant 24 : index
    %c0_43 = arith.constant 0 : index
    %113 = vector.load %arg13[%c24, %c0_43] : memref<336x64xf32, #tpu.memory_space<vmem>>, vector<256x64xf32>
    %c25 = arith.constant 25 : index
    %c0_44 = arith.constant 0 : index
    %114 = vector.load %arg13[%c25, %c0_44] : memref<336x64xf32, #tpu.memory_space<vmem>>, vector<256x64xf32>
    %c39 = arith.constant 39 : index
    %c0_45 = arith.constant 0 : index
    %115 = vector.load %arg13[%c39, %c0_45] : memref<336x64xf32, #tpu.memory_space<vmem>>, vector<256x64xf32>
    %c40_46 = arith.constant 40 : index
    %c0_47 = arith.constant 0 : index
    %116 = vector.load %arg13[%c40_46, %c0_47] : memref<336x64xf32, #tpu.memory_space<vmem>>, vector<256x64xf32>
    %c41 = arith.constant 41 : index
    %c0_48 = arith.constant 0 : index
    %117 = vector.load %arg13[%c41, %c0_48] : memref<336x64xf32, #tpu.memory_space<vmem>>, vector<256x64xf32>
    %c55 = arith.constant 55 : index
    %c0_49 = arith.constant 0 : index
    %118 = vector.load %arg13[%c55, %c0_49] : memref<336x64xf32, #tpu.memory_space<vmem>>, vector<256x64xf32>
    %c56 = arith.constant 56 : index
    %c0_50 = arith.constant 0 : index
    %119 = vector.load %arg13[%c56, %c0_50] : memref<336x64xf32, #tpu.memory_space<vmem>>, vector<256x64xf32>
    %c57 = arith.constant 57 : index
    %c0_51 = arith.constant 0 : index
    %120 = vector.load %arg13[%c57, %c0_51] : memref<336x64xf32, #tpu.memory_space<vmem>>, vector<256x64xf32>
    %c71 = arith.constant 71 : index
    %c0_52 = arith.constant 0 : index
    %121 = vector.load %arg13[%c71, %c0_52] : memref<336x64xf32, #tpu.memory_space<vmem>>, vector<256x64xf32>
    %c72 = arith.constant 72 : index
    %c0_53 = arith.constant 0 : index
    %122 = vector.load %arg13[%c72, %c0_53] : memref<336x64xf32, #tpu.memory_space<vmem>>, vector<256x64xf32>
    %c73 = arith.constant 73 : index
    %c0_54 = arith.constant 0 : index
    %123 = vector.load %arg13[%c73, %c0_54] : memref<336x64xf32, #tpu.memory_space<vmem>>, vector<256x64xf32>
    %124 = tpu.concatenate %109, %110, %111, %112, %113, %114, %115, %116, %117, %118, %119, %120, %121, %122, %123 in 1 : vector<256x64xf32>, vector<256x64xf32>, vector<256x64xf32>, vector<256x64xf32>, vector<256x64xf32>, vector<256x64xf32>, vector<256x64xf32>, vector<256x64xf32>, vector<256x64xf32>, vector<256x64xf32>, vector<256x64xf32>, vector<256x64xf32>, vector<256x64xf32>, vector<256x64xf32>, vector<256x64xf32> -> vector<256x960xf32>
    %cst_55 = arith.constant dense<0.000000e+00> : vector<256x128xf32>
    %125 = tpu.matmul %124, %4, %cst_55 {dimension_numbers = #tpu.dot_dimension_numbers<[1], [0], [0], [1], [0, 0, 1, 1], [], []>} : vector<256x960xf32>, vector<960x128xf32>, vector<256x128xf32> -> vector<256x128xf32>
    %126 = vector.broadcast %2 : vector<1x128xf32> to vector<256x128xf32>
    %127 = arith.mulf %125, %126 : vector<256x128xf32>
    %128 = vector.broadcast %3 : vector<1x128xf32> to vector<256x128xf32>
    %129 = arith.addf %127, %128 : vector<256x128xf32>
    %cst_56 = arith.constant 0.000000e+00 : f32
    %130 = vector.broadcast %cst_56 : f32 to vector<256x128xf32>
    %131 = arith.cmpf ogt, %129, %130 : vector<256x128xf32>
    %cst_57 = arith.constant 0.00999999977 : f32
    %132 = vector.broadcast %cst_57 : f32 to vector<256x128xf32>
    %133 = arith.mulf %132, %129 : vector<256x128xf32>
    %134 = arith.select %131, %129, %133 : vector<256x128xi1>, vector<256x128xf32>
    %135 = vector.broadcast %23 : vector<256x1xf32> to vector<256x128xf32>
    %136 = arith.mulf %134, %135 : vector<256x128xf32>
    %cst_58 = arith.constant dense<0.000000e+00> : vector<128xf32>
    %137 = vector.multi_reduction <add>, %136, %cst_58 [0] : vector<256x128xf32> to vector<128xf32>
    %138 = vector.shape_cast %137 : vector<128xf32> to vector<1x128xf32>
    %cst_59 = arith.constant 0.00416666688 : f32
    %139 = vector.broadcast %cst_59 : f32 to vector<1x128xf32>
    %140 = arith.mulf %138, %139 : vector<1x128xf32>
    %cst_60 = arith.constant dense<0.000000e+00> : vector<1x8xf32>
    %141 = tpu.matmul %140, %7, %cst_60 {dimension_numbers = #tpu.dot_dimension_numbers<[1], [0], [0], [1], [0, 0, 1, 1], [], []>} : vector<1x128xf32>, vector<128x8xf32>, vector<1x8xf32> -> vector<1x8xf32>
    %cst_61 = arith.constant 0.000000e+00 : f32
    %142 = vector.broadcast %cst_61 : f32 to vector<1x8xf32>
    %143 = arith.maximumf %141, %142 : vector<1x8xf32>
    %cst_62 = arith.constant dense<0.000000e+00> : vector<1x128xf32>
    %144 = tpu.matmul %143, %8, %cst_62 {dimension_numbers = #tpu.dot_dimension_numbers<[1], [0], [0], [1], [0, 0, 1, 1], [], []>} : vector<1x8xf32>, vector<8x128xf32>, vector<1x128xf32> -> vector<1x128xf32>
    %145 = arith.negf %144 : vector<1x128xf32>
    %146 = math.exp %145 : vector<1x128xf32>
    %cst_63 = arith.constant 1.000000e+00 : f32
    %147 = vector.broadcast %cst_63 : f32 to vector<1x128xf32>
    %148 = arith.addf %147, %146 : vector<1x128xf32>
    %149 = arith.divf %147, %148 : vector<1x128xf32>
    %150 = vector.extract_strided_slice %134 {offsets = [0, 0], sizes = [16, 128], strides = [1, 1]} : vector<256x128xf32> to vector<16x128xf32>
    %151 = vector.extract_strided_slice %134 {offsets = [16, 0], sizes = [16, 128], strides = [1, 1]} : vector<256x128xf32> to vector<16x128xf32>
    %152 = arith.maximumf %150, %151 : vector<16x128xf32>
    %153 = vector.extract_strided_slice %134 {offsets = [32, 0], sizes = [16, 128], strides = [1, 1]} : vector<256x128xf32> to vector<16x128xf32>
    %154 = vector.extract_strided_slice %134 {offsets = [48, 0], sizes = [16, 128], strides = [1, 1]} : vector<256x128xf32> to vector<16x128xf32>
    %155 = arith.maximumf %153, %154 : vector<16x128xf32>
    %156 = vector.extract_strided_slice %134 {offsets = [64, 0], sizes = [16, 128], strides = [1, 1]} : vector<256x128xf32> to vector<16x128xf32>
    %157 = vector.extract_strided_slice %134 {offsets = [80, 0], sizes = [16, 128], strides = [1, 1]} : vector<256x128xf32> to vector<16x128xf32>
    %158 = arith.maximumf %156, %157 : vector<16x128xf32>
    %159 = vector.extract_strided_slice %134 {offsets = [96, 0], sizes = [16, 128], strides = [1, 1]} : vector<256x128xf32> to vector<16x128xf32>
    %160 = vector.extract_strided_slice %134 {offsets = [112, 0], sizes = [16, 128], strides = [1, 1]} : vector<256x128xf32> to vector<16x128xf32>
    %161 = arith.maximumf %159, %160 : vector<16x128xf32>
    %162 = vector.extract_strided_slice %134 {offsets = [128, 0], sizes = [16, 128], strides = [1, 1]} : vector<256x128xf32> to vector<16x128xf32>
    %163 = vector.extract_strided_slice %134 {offsets = [144, 0], sizes = [16, 128], strides = [1, 1]} : vector<256x128xf32> to vector<16x128xf32>
    %164 = arith.maximumf %162, %163 : vector<16x128xf32>
    %165 = vector.extract_strided_slice %134 {offsets = [160, 0], sizes = [16, 128], strides = [1, 1]} : vector<256x128xf32> to vector<16x128xf32>
    %166 = vector.extract_strided_slice %134 {offsets = [176, 0], sizes = [16, 128], strides = [1, 1]} : vector<256x128xf32> to vector<16x128xf32>
    %167 = arith.maximumf %165, %166 : vector<16x128xf32>
    %168 = vector.extract_strided_slice %134 {offsets = [192, 0], sizes = [16, 128], strides = [1, 1]} : vector<256x128xf32> to vector<16x128xf32>
    %169 = vector.extract_strided_slice %134 {offsets = [208, 0], sizes = [16, 128], strides = [1, 1]} : vector<256x128xf32> to vector<16x128xf32>
    %170 = arith.maximumf %168, %169 : vector<16x128xf32>
    %171 = vector.extract_strided_slice %134 {offsets = [224, 0], sizes = [16, 128], strides = [1, 1]} : vector<256x128xf32> to vector<16x128xf32>
    %172 = vector.extract_strided_slice %134 {offsets = [240, 0], sizes = [16, 128], strides = [1, 1]} : vector<256x128xf32> to vector<16x128xf32>
    %173 = arith.maximumf %171, %172 : vector<16x128xf32>
    %174 = tpu.concatenate %152, %155, %158, %161, %164, %167, %170, %173 in 0 : vector<16x128xf32>, vector<16x128xf32>, vector<16x128xf32>, vector<16x128xf32>, vector<16x128xf32>, vector<16x128xf32>, vector<16x128xf32>, vector<16x128xf32> -> vector<128x128xf32>
    %175 = vector.broadcast %149 : vector<1x128xf32> to vector<128x128xf32>
    %176 = arith.mulf %174, %175 : vector<128x128xf32>
    %c0_64 = arith.constant 0 : index
    %c0_65 = arith.constant 0 : index
    %c0_66 = arith.constant 0 : index
    %177 = vector.load %arg10[%c0_64, %c0_65, %c0_66] : memref<2x128x128xf32, #tpu.memory_space<vmem>>, vector<1x128x128xf32>
    %178 = vector.shape_cast %177 : vector<1x128x128xf32> to vector<128x128xf32>
    %179 = arith.mulf %176, %178 : vector<128x128xf32>
    %cst_67 = arith.constant dense<0.000000e+00> : vector<128xf32>
    %180 = vector.multi_reduction <add>, %179, %cst_67 [1] : vector<128x128xf32> to vector<128xf32>
    %181 = vector.shape_cast %180 : vector<128xf32> to vector<128x1xf32>
    %cst_68 = arith.constant dense<0.000000e+00> : vector<1xf32>
    %182 = vector.multi_reduction <add>, %181, %cst_68 [0] : vector<128x1xf32> to vector<1xf32>
    %183 = vector.shape_cast %182 : vector<1xf32> to vector<1x1xf32>
    %c1_69 = arith.constant 1 : index
    %c0_70 = arith.constant 0 : index
    %c0_71 = arith.constant 0 : index
    %184 = vector.load %arg10[%c1_69, %c0_70, %c0_71] : memref<2x128x128xf32, #tpu.memory_space<vmem>>, vector<1x128x128xf32>
    %185 = vector.shape_cast %184 : vector<1x128x128xf32> to vector<128x128xf32>
    %186 = arith.mulf %176, %185 : vector<128x128xf32>
    %cst_72 = arith.constant dense<0.000000e+00> : vector<128xf32>
    %187 = vector.multi_reduction <add>, %186, %cst_72 [1] : vector<128x128xf32> to vector<128xf32>
    %188 = vector.shape_cast %187 : vector<128xf32> to vector<128x1xf32>
    %cst_73 = arith.constant dense<0.000000e+00> : vector<1xf32>
    %189 = vector.multi_reduction <add>, %188, %cst_73 [0] : vector<128x1xf32> to vector<1xf32>
    %190 = vector.shape_cast %189 : vector<1xf32> to vector<1x1xf32>
    %191 = tpu.concatenate %183, %190 in 1 : vector<1x1xf32>, vector<1x1xf32> -> vector<1x2xf32>
    %192 = arith.addf %191, %9 : vector<1x2xf32>
    %c0_74 = arith.constant 0 : index
    %c0_75 = arith.constant 0 : index
    %c0_76 = arith.constant 0 : index
    %193 = vector.load %arg12[%c0_74, %c0_75, %c0_76] : memref<1x1x2xf32, #tpu.memory_space<vmem>>, vector<1x1x2xf32>
    %194 = vector.shape_cast %193 : vector<1x1x2xf32> to vector<1x2xf32>
    %195 = vector.shape_cast %192 : vector<1x2xf32> to vector<1x1x2xf32>
    tpu.vector_store %arg12[%c0_74, %c0_75, %c0_76], %195 {strides = array<i32>} : memref<1x1x2xf32, #tpu.memory_space<vmem>>, vector<1x1x2xf32>,
    return
  }
  func.func @transform_0(%arg0: i32) -> (i32, i32) {
    %c0_i32 = arith.constant 0 : i32
    %c0_i32_0 = arith.constant 0 : i32
    return %arg0, %c0_i32 : i32, i32
  }
  func.func @transform_1(%arg0: i32) -> (i32, i32) {
    %c0_i32 = arith.constant 0 : i32
    %c0_i32_0 = arith.constant 0 : i32
    %c0_i32_1 = arith.constant 0 : i32
    return %c0_i32, %c0_i32_0 : i32, i32
  }
  func.func @transform_2(%arg0: i32) -> (i32, i32) {
    %c0_i32 = arith.constant 0 : i32
    %c0_i32_0 = arith.constant 0 : i32
    %c0_i32_1 = arith.constant 0 : i32
    return %c0_i32, %c0_i32_0 : i32, i32
  }
  func.func @transform_3(%arg0: i32) -> (i32, i32) {
    %c0_i32 = arith.constant 0 : i32
    %c0_i32_0 = arith.constant 0 : i32
    %c0_i32_1 = arith.constant 0 : i32
    return %c0_i32, %c0_i32_0 : i32, i32
  }
  func.func @transform_4(%arg0: i32) -> (i32, i32) {
    %c0_i32 = arith.constant 0 : i32
    %c0_i32_0 = arith.constant 0 : i32
    %c0_i32_1 = arith.constant 0 : i32
    return %c0_i32, %c0_i32_0 : i32, i32
  }
  func.func @transform_5(%arg0: i32) -> (i32, i32) {
    %c0_i32 = arith.constant 0 : i32
    %c0_i32_0 = arith.constant 0 : i32
    %c0_i32_1 = arith.constant 0 : i32
    return %c0_i32, %c0_i32_0 : i32, i32
  }
  func.func @transform_6(%arg0: i32) -> (i32, i32) {
    %c0_i32 = arith.constant 0 : i32
    %c0_i32_0 = arith.constant 0 : i32
    %c0_i32_1 = arith.constant 0 : i32
    return %c0_i32, %c0_i32_0 : i32, i32
  }
  func.func @transform_7(%arg0: i32) -> (i32, i32) {
    %c0_i32 = arith.constant 0 : i32
    %c0_i32_0 = arith.constant 0 : i32
    %c0_i32_1 = arith.constant 0 : i32
    return %c0_i32, %c0_i32_0 : i32, i32
  }
  func.func @transform_8(%arg0: i32) -> (i32, i32) {
    %c0_i32 = arith.constant 0 : i32
    %c0_i32_0 = arith.constant 0 : i32
    %c0_i32_1 = arith.constant 0 : i32
    return %c0_i32, %c0_i32_0 : i32, i32
  }
  func.func @transform_9(%arg0: i32) -> (i32, i32, i32) {
    %c0_i32 = arith.constant 0 : i32
    %c0_i32_0 = arith.constant 0 : i32
    %c0_i32_1 = arith.constant 0 : i32
    %c0_i32_2 = arith.constant 0 : i32
    return %c0_i32, %c0_i32_0, %c0_i32_1 : i32, i32, i32
  }
  func.func @transform_10(%arg0: i32) -> (i32, i32) {
    %c0_i32 = arith.constant 0 : i32
    %c0_i32_0 = arith.constant 0 : i32
    %c0_i32_1 = arith.constant 0 : i32
    return %c0_i32, %c0_i32_0 : i32, i32
  }
  func.func @transform_11(%arg0: i32) -> (i32, i32, i32) {
    %c0_i32 = arith.constant 0 : i32
    %c0_i32_0 = arith.constant 0 : i32
    %c0_i32_1 = arith.constant 0 : i32
    return %arg0, %c0_i32, %c0_i32_0 : i32, i32, i32
  }
}

</mosaic_0001>

<bundles_post_ra>
// kernel: forward.1
= control target key start
LH: loop header
LB: loop body
LE: loop exit
PB: predicated region body
PF: predicated region fallthrough
CT: control target
= control target key end

     0   :  { %16 = vsyncpa [#allocation4], 0  ;;  %s8339_s0 = inlined_call_operand.vmem [shape: f32[1024,64], index: 0, kind: input, shape index: {}]   ;;  %s8340_s1 = inlined_call_operand.vmem [shape: f32[64,64], index: 1, kind: input, shape index: {}]   ;;  %s8341_s2 = inlined_call_operand.vmem [shape: f32[2,64], index: 2, kind: input, shape index: {}]   ;;  %s8342_s3 = inlined_call_operand.vmem [shape: f32[64,4], index: 3, kind: input, shape index: {}]   ;;  %s8343_s4 = inlined_call_operand.vmem [shape: f32[4,64], index: 4, kind: input, shape index: {}]   ;;  %s8344_s5 = inlined_call_operand.vmem [shape: f32[960,128], index: 5, kind: input, shape index: {}]   ;;  %s8345_s6 = inlined_call_operand.vmem [shape: f32[2,128], index: 6, kind: input, shape index: {}]   ;;  %s8346_s7 = inlined_call_operand.vmem [shape: f32[128,8], index: 7, kind: input, shape index: {}]   ;;  %s8347_s8 = inlined_call_operand.vmem [shape: f32[8,128], index: 8, kind: input, shape index: {}]   ;;  %s8348_s9 = inlined_call_operand.vmem [shape: f32[2,128,128], index: 9, kind: input, shape index: {}]   ;;  %s8349_s10 = inlined_call_operand.vmem [shape: f32[1,2], index: 10, kind: input, shape index: {}]   ;;  %s8350_s11 = inlined_call_operand.hbm [shape: f32[2,1,2], index: 11, kind: output, shape index: {}]  }
   0x1   :  { %18 = vsyncpa [#allocation4 + $0x1], 0  ;;  %s4985_s17 = smov 0   ;;  %s4987_s18 = smov 0  }
   0x2   :  { %s4989_s19 = smov 0   ;;  %s4991_s20 = smov 0  }
   0x3 LB: > { %s5006_s21 = sadd.s32 4294967295, %s4921_s20   ;;  %s4285_s22 = sadd.s32 4294967294, %s4921_s20   ;;  %s4921_s20 = sphi %s4991_s20, %s8784_s20   ;;  %s4917_s19 = sphi %s4989_s19, %s8783_s19   ;;  %s4913_s18 = sphi %s4987_s18, %s8782_s18   ;;  %s4909_s17 = sphi %s4985_s17, %s8781_s17  }
   0x4   : > { %s5010_s23 = sadd.s32 1, %s4921_s20   ;;  %s267_s24 = sadd.s32 1, %s4917_s19 }
   0x5   : > { %s264_s25 = ssub.s32 %s4921_s20, %s5010_s23  ;;  %p277_p0 = scmp.ne.s32.totalorder %s4917_s19, %s4913_s18 }
   0x6   : > { %p265_p1 = scmp.eq.s32.totalorder %s264_s25, 0  ;;  %p278_p2 = scmp.eq.s32.totalorder %s5006_s21, 1 }
   0x7   : > { %p283_p3 = scmp.ne.s32.totalorder %s4913_s18, %s4909_s17  ;;  %p284_p4 = scmp.eq.s32.totalorder %s4285_s22, 1 }
   0x8   : > { %s5021_s26 = scalar_select %p265_p1, %s4917_s19, %s267_s24  }
   0x9   : > { %p5023_p5 = por %p278_p2, %p277_p0  ;;  %p5027_p6 = por %p284_p4, %p283_p3 }
   0xa   : > { %8466 = sst [smem:[#allocation6_spill]] %s5021_s26  ;;  %p4288_p7 = scmp.ge.s32.totalorder %s4921_s20, 1 }
   0xb   : > { %p341_p8 = scmp.lt.s32.totalorder %s4921_s20, 3 }
   0xd   : > { %p342_p9 = pnand %p4288_p7, %p341_p8 }
   0xf   : > { %345 = sbr.rel (%p342_p9) target bundleno = 2357 (0x935), region = 64 }
  0x14   : > { %v940_v0 = vld [vmem:[%s8340_s1 + $0x38] sm:$0xff]  ;;  %v939_v1 = vld [vmem:[%s8340_s1 + $0x30] sm:$0xff]  ;;  %s4289_s14 = sshll.u32 %s5006_s21, 6  ;;  %v938_v2 = vld [vmem:[%s8340_s1 + $0x28] sm:$0xff]  ;;  %vm858_vm0 = vcmask 523264   ;;  %v8353_v22 = vmov 0.0   ;;  %s4226_s13 = scalar_lea.hbm %s8350_s11, %s5006_s21 }
  0x15   : > { %1141 = vmatpush.msra.mxu0 %v940_v0  ;;  %p381_p10 = scmp.lt.s32.totalorder %s4289_s14, 127  ;;  %4443 = vmatpush.msra.mxu2 %v940_v0  ;;  %v937_v3 = vld [vmem:[%s8340_s1 + $0x20] sm:$0xff]  ;;  %v936_v4 = vld [vmem:[%s8340_s1 + $0x18] sm:$0xff]  ;;  %v935_v5 = vld [vmem:[%s8340_s1 + $0x10] sm:$0xff]  ;;  %859 = vst.msk [vmem:[#allocation2] sm:$0xff] %vm858_vm0, %v8353_v22  ;;  %s378_s29 = sand.u32 1, %s4913_s18  }
  0x16   : > { %v934_v6 = vld [vmem:[%s8340_s1 + $0x8] sm:$0xff]  ;;  %v933_v7 = vld [vmem:[%s8340_s1] sm:$0xff]  ;;  %860 = vst.msk [vmem:[#allocation2 + $0x8] sm:$0xff] %vm858_vm0, %v8353_v22  ;;  %s379_s16 = scalar_lea.vmem [#allocation3], %s378_s29  ;;  %s4230_s24 = sshll.u32 %s4226_s13, 4  ;;  %s4231_s24 = int_to_ptr.hbm [resolvable:$true] %s4230_s24 }
  0x17   : > { %1142 = vmatpush.msra.mxu0 %v939_v1  ;;  %s8786_s14 = smov (!%p381_p10, %s4289_s14), 127  ;;  %4444 = vmatpush.msra.mxu2 %v939_v1  ;;  %861 = vst.msk [vmem:[#allocation2 + $0x10] sm:$0xff] %vm858_vm0, %v8353_v22  ;;  %v5120_v27 = vld [vmem:[%s8341_s2] ss:$0 sm:$0xff]  ;;  %v5127_v31 = vld [vmem:[%s8341_s2 + $0x1] ss:$0 sm:$0xff] }
  0x18   : > { %s4290_s30 = sshll.u32 %s8786_s14, 3  ;;  %862 = vst.msk [vmem:[#allocation2 + $0x18] sm:$0xff] %vm858_vm0, %v8353_v22  ;;  %s4228_s22 = sshll.u32 %s379_s16, 4  ;;  %s4229_s22 = int_to_ptr.vmem [resolvable:$true] %s4228_s22 }
  0x19   : > { %1143 = vmatpush.msra.mxu0 %v938_v2  ;;  %4445 = vmatpush.msra.mxu2 %v938_v2  ;;  %s5058_s26 = scalar_lea.vmem %s8339_s0, %s4290_s30  ;;  %863 = vst.msk [vmem:[#allocation2 + $0x20] sm:$0xff] %vm858_vm0, %v8353_v22  ;;  %s4218_s14 = scalar_lea.sflag [#allocation4], %s378_s29 }
  0x1a   : > { %v869_v8 = vld [vmem:[%s5058_s26] sm:$0xff]  ;;  %v870_v9 = vld [vmem:[%s5058_s26 + $0x8] sm:$0xff]  ;;  %v871_v10 = vld [vmem:[%s5058_s26 + $0x10] sm:$0xff]  ;;  %864 = vst.msk [vmem:[#allocation2 + $0x128] sm:$0xff] %vm858_vm0, %v8353_v22  ;;  %s4873_s21 = sshra.s32 %s4231_s24, 4  ;;  %s4874_s21 = int_to_ptr.hbm [resolvable:$true] %s4873_s21 }
  0x1b   : > { %1144 = vmatpush.msra.mxu0 %v937_v3  ;;  %4446 = vmatpush.msra.mxu2 %v937_v3  ;;  %v872_v11 = vld [vmem:[%s5058_s26 + $0x18] sm:$0xff]  ;;  %v873_v12 = vld [vmem:[%s5058_s26 + $0x20] sm:$0xff]  ;;  %v874_v13 = vld [vmem:[%s5058_s26 + $0x28] sm:$0xff]  ;;  %865 = vst.msk [vmem:[#allocation2 + $0x130] sm:$0xff] %vm858_vm0, %v8353_v22  ;;  %s4875_s25 = scalar_lea.hbm %s4874_s21, 1  ;;  %p4880_p0 = scmp.lt.s32.totalorder %s4874_s21, %s8350_s11 }
  0x1c   : > { %v875_v14 = vld [vmem:[%s5058_s26 + $0x30] sm:$0xff]  ;;  %v876_v15 = vld [vmem:[%s5058_s26 + $0x38] sm:$0xff]  ;;  %v877_v16 = vld [vmem:[%s5058_s26 + $0x40] sm:$0xff]  ;;  %866 = vst.msk [vmem:[#allocation2 + $0x138] sm:$0xff] %vm858_vm0, %v8353_v22  ;;  %p4876_p11 = scmp.ne.s32.totalorder %s4874_s21, %s4875_s25 }
  0x1d   : > { %1145 = vmatpush.msra.mxu0 %v936_v4  ;;  %4447 = vmatpush.msra.mxu2 %v936_v4  ;;  %v878_v17 = vld [vmem:[%s5058_s26 + $0x48] sm:$0xff]  ;;  %v879_v18 = vld [vmem:[%s5058_s26 + $0x50] sm:$0xff]  ;;  %v880_v19 = vld [vmem:[%s5058_s26 + $0x58] sm:$0xff]  ;;  %867 = vst.msk [vmem:[#allocation2 + $0x140] sm:$0xff] %vm858_vm0, %v8353_v22 }
  0x1e   : > { %v881_v20 = vld [vmem:[%s5058_s26 + $0x60] sm:$0xff]  ;;  %v882_v21 = vld [vmem:[%s5058_s26 + $0x68] sm:$0xff]  ;;  %v883_v23 = vld [vmem:[%s5058_s26 + $0x70] sm:$0xff]  ;;  %868 = vst.msk [vmem:[#allocation2 + $0x148] sm:$0xff] %vm858_vm0, %v8353_v22  ;;  %p4877_p12 = pnand %p4876_p11, %p5023_p5 }
  0x1f   : > { %1146 = vmatpush.msra.mxu0 %v935_v5  ;;  %4448 = vmatpush.msra.mxu2 %v935_v5  ;;  %v884_v24 = vld [vmem:[%s5058_s26 + $0x78] sm:$0xff]  ;;  %v885_v26 = vld [vmem:[%s5058_s26 + $0x80] sm:$0xff]  ;;  %v886_v29 = vld [vmem:[%s5058_s26 + $0x88] sm:$0xff] }
  0x20   : > { %v887_v34 = vld [vmem:[%s5058_s26 + $0x90] sm:$0xff]  ;;  %v888_v45 = vld [vmem:[%s5058_s26 + $0x98] sm:$0xff]  ;;  %v889_v54 = vld [vmem:[%s5058_s26 + $0xa0] sm:$0xff]  ;;  %p4878_p13 = pneg %p4877_p12 }
  0x21   : > { %1147 = vmatpush.msra.mxu0 %v934_v6  ;;  %4449 = vmatpush.msra.mxu2 %v934_v6  ;;  %v890_v56 = vld [vmem:[%s5058_s26 + $0xa8] sm:$0xff]  ;;  %v891_v60 = vld [vmem:[%s5058_s26 + $0xb0] sm:$0xff] }
  0x23   : > { %1148 = vmatpush.msra.mxu0 %v933_v7  ;;  %4450 = vmatpush.msra.mxu2 %v933_v7  ;;  %v892_v7 = vld [vmem:[%s5058_s26 + $0xb8] sm:$0xff] }
  0x24   : > { %4323 = vmatmul.msk.f32.vlgmr.msra.gmra.mxu0 %vm858_vm0, %v869_v8 }
  0x2c   : > { %4324 = vmatmul.msk.f32.gmra.mxu0 %vm858_vm0, %v870_v9 }
  0x34   : > { %4325 = vmatmul.msk.f32.gmra.mxu0 %vm858_vm0, %v871_v10 }
  0x3c   : > { %4326 = vmatmul.msk.f32.gmra.mxu0 %vm858_vm0, %v872_v11 }
  0x44   : > { %4327 = vmatmul.msk.f32.gmra.mxu0 %vm858_vm0, %v873_v12 }
  0x4c   : > { %4328 = vmatmul.msk.f32.gmra.mxu0 %vm858_vm0, %v874_v13 }
  0x54   : > { %4329 = vmatmul.msk.f32.gmra.mxu0 %vm858_vm0, %v875_v14 }
  0x5c   : > { %4330 = vmatmul.msk.f32.gmra.mxu0 %vm858_vm0, %v876_v15 }
  0x64   : > { %4331 = vmatmul.msk.f32.gmra.mxu0 %vm858_vm0, %v877_v16  ;;  %v893_v16 = vld [vmem:[%s5058_s26 + $0xc0] sm:$0xff] }
  0x6c   : > { %4332 = vmatmul.msk.f32.gmra.mxu0 %vm858_vm0, %v878_v17 }
  0x74   : > { %4333 = vmatmul.msk.f32.gmra.mxu0 %vm858_vm0, %v879_v18  ;;  %v894_v18 = vld [vmem:[%s5058_s26 + $0xc8] sm:$0xff] }
  0x7c   : > { %4334 = vmatmul.msk.f32.gmra.mxu0 %vm858_vm0, %v880_v19 }
  0x84   : > { %4335 = vmatmul.msk.f32.gmra.mxu0 %vm858_vm0, %v881_v20 }
  0x8c   : > { %4336 = vmatmul.msk.f32.gmra.mxu0 %vm858_vm0, %v882_v21 }
  0x94   : > { %4337 = vmatmul.msk.f32.gmra.mxu0 %vm858_vm0, %v883_v23  ;;  %v895_v23 = vld [vmem:[%s5058_s26 + $0xd0] sm:$0xff] }
  0x9c   : > { %4338 = vmatmul.msk.f32.gmra.mxu0 %vm858_vm0, %v884_v24 }
  0xa1   : > { %v1150_v25 = vpop.f32.mrf.mxu0 }
  0xa2   : > { %v1343_v30 = vmul.f32 %v5120_v27, %v1150_v25 }
  0xa4   : > { %4339 = vmatmul.msk.f32.gmra.mxu0 %vm858_vm0, %v885_v26  ;;  %v1408_v32 = vadd.f32 %v5127_v31, %v1343_v30 }
  0xa6   : > { %v1536_v36 = vmul.f32 0.01, %v1408_v32  ;;  %vm1472_vm1 = vcmp.gt.f32.partialorder %v1408_v32, 0.0 }
  0xa8   : > { %v5136_v40 = vsel %vm1472_vm1, %v1408_v32, %v1536_v36  ;;  %v896_v36 = vld [vmem:[%s5058_s26 + $0xd8] sm:$0xff] }
  0xa9   : > { %v1153_v28 = vpop.f32.mrf.mxu0 }
  0xaa   : > { %v1344_v37 = vmul.f32 %v5120_v27, %v1153_v28 }
  0xac   : > { %4340 = vmatmul.msk.f32.gmra.mxu0 %vm858_vm0, %v886_v29  ;;  %v1409_v41 = vadd.f32 %v5127_v31, %v1344_v37 }
  0xae   : > { %v1537_v47 = vmul.f32 0.01, %v1409_v41  ;;  %vm1473_vm3 = vcmp.gt.f32.partialorder %v1409_v41, 0.0 }
  0xb0   : > { %v5147_v50 = vsel %vm1473_vm3, %v1409_v41, %v1537_v47 }
  0xb1   : > { %v1156_v33 = vpop.f32.mrf.mxu0  ;;  %8469 = vst [vmem:[#allocation7_spill] sm:$0xff] %v5147_v50 }
  0xb2   : > { %v1345_v35 = vmul.f32 %v5120_v27, %v1156_v33 }
  0xb4   : > { %v1410_v38 = vadd.f32 %v5127_v31, %v1345_v35  ;;  %4341 = vmatmul.msk.f32.gmra.mxu0 %vm858_vm0, %v887_v34 }
  0xb6   : > { %vm1474_vm2 = vcmp.gt.f32.partialorder %v1410_v38, 0.0  ;;  %v1538_v39 = vmul.f32 0.01, %v1410_v38 }
  0xb8   : > { %v5139_v42 = vsel %vm1474_vm2, %v1410_v38, %v1538_v39 }
  0xb9   : > { %v1159_v44 = vpop.f32.mrf.mxu0 }
  0xba   : > { %v1346_v46 = vmul.f32 %v5120_v27, %v1159_v44 }
  0xbc   : > { %v1411_v48 = vadd.f32 %v5127_v31, %v1346_v46  ;;  %4342 = vmatmul.msk.f32.gmra.mxu0 %vm858_vm0, %v888_v45 }
  0xbe   : > { %vm1475_vm4 = vcmp.gt.f32.partialorder %v1411_v48, 0.0  ;;  %v1539_v49 = vmul.f32 0.01, %v1411_v48 }
  0xc0   : > { %v5149_v51 = vsel %vm1475_vm4, %v1411_v48, %v1539_v49  ;;  %v897_v48 = vld [vmem:[%s5058_s26 + $0xe0] sm:$0xff] }
  0xc1   : > { %8470 = vst [vmem:[#allocation8_spill] sm:$0xff] %v5149_v51  ;;  %v1162_v53 = vpop.f32.mrf.mxu0 }
  0xc2   : > { %v1347_v57 = vmul.f32 %v5120_v27, %v1162_v53  ;;  %v898_v53 = vld [vmem:[%s5058_s26 + $0xe8] sm:$0xff] }
  0xc4   : > { %4343 = vmatmul.msk.f32.gmra.mxu0 %vm858_vm0, %v889_v54  ;;  %v1412_v58 = vadd.f32 %v5127_v31, %v1347_v57  ;;  %v899_v57 = vld [vmem:[%s5058_s26 + $0xf0] sm:$0xff] }
  0xc6   : > { %v1540_v62 = vmul.f32 0.01, %v1412_v58  ;;  %vm1476_vm5 = vcmp.gt.f32.partialorder %v1412_v58, 0.0 }
  0xc8   : > { %v5164_v2 = vsel %vm1476_vm5, %v1412_v58, %v1540_v62 }
  0xc9   : > { %v1165_v55 = vpop.f32.mrf.mxu0 }
  0xca   : > { %v1348_v63 = vmul.f32 %v5120_v27, %v1165_v55 }
  0xcc   : > { %4344 = vmatmul.msk.f32.gmra.mxu0 %vm858_vm0, %v890_v56  ;;  %v1413_v3 = vadd.f32 %v5127_v31, %v1348_v63 }
  0xce   : > { %v1541_v9 = vmul.f32 0.01, %v1413_v3  ;;  %vm1477_vm7 = vcmp.gt.f32.partialorder %v1413_v3, 0.0 }
  0xd0   : > { %v5175_v12 = vsel %vm1477_vm7, %v1413_v3, %v1541_v9 }
  0xd1   : > { %v1168_v59 = vpop.f32.mrf.mxu0  ;;  %8471 = vst [vmem:[#allocation9_spill] sm:$0xff] %v5175_v12 }
  0xd2   : > { %v1349_v61 = vmul.f32 %v5120_v27, %v1168_v59 }
  0xd4   : > { %v1414_v0 = vadd.f32 %v5127_v31, %v1349_v61  ;;  %4345 = vmatmul.msk.f32.gmra.mxu0 %vm858_vm0, %v891_v60 }
  0xd6   : > { %vm1478_vm6 = vcmp.gt.f32.partialorder %v1414_v0, 0.0  ;;  %v1542_v1 = vmul.f32 0.01, %v1414_v0 }
  0xd8   : > { %v5167_v4 = vsel %vm1478_vm6, %v1414_v0, %v1542_v1 }
  0xd9   : > { %v1171_v6 = vpop.f32.mrf.mxu0  ;;  %v1739_v43 = vsel %vm858_vm0, %v5167_v4, 0.0 }
  0xda   : > { %v1350_v8 = vmul.f32 %v5120_v27, %v1171_v6 }
  0xdc   : > { %v1415_v10 = vadd.f32 %v5127_v31, %v1350_v8  ;;  %4346 = vmatmul.msk.f32.gmra.mxu0 %vm858_vm0, %v892_v7  ;;  %v900_v7 = vld [vmem:[%s5058_s26 + $0xf8] sm:$0xff] }
  0xde   : > { %vm1479_vm8 = vcmp.gt.f32.partialorder %v1415_v10, 0.0  ;;  %v1543_v11 = vmul.f32 0.01, %v1415_v10 }
  0xe0   : > { %v5177_v13 = vsel %vm1479_vm8, %v1415_v10, %v1543_v11 }
  0xe1   : > { %8472 = vst [vmem:[#allocation10_spill] sm:$0xff] %v5177_v13  ;;  %v1174_v15 = vpop.f32.mrf.mxu0 }
  0xe2   : > { %v1351_v19 = vmul.f32 %v5120_v27, %v1174_v15 }
  0xe4   : > { %4347 = vmatmul.msk.f32.gmra.mxu0 %vm858_vm0, %v893_v16  ;;  %v1416_v20 = vadd.f32 %v5127_v31, %v1351_v19  ;;  %v901_v19 = vld [vmem:[%s5058_s26 + $0x100] sm:$0xff] }
  0xe6   : > { %v1544_v25 = vmul.f32 0.01, %v1416_v20  ;;  %vm1480_vm9 = vcmp.gt.f32.partialorder %v1416_v20, 0.0 }
  0xe8   : > { %v5192_v30 = vsel %vm1480_vm9, %v1416_v20, %v1544_v25 }
  0xe9   : > { %v1177_v17 = vpop.f32.mrf.mxu0 }
  0xea   : > { %v1352_v26 = vmul.f32 %v5120_v27, %v1177_v17 }
  0xec   : > { %4348 = vmatmul.msk.f32.gmra.mxu0 %vm858_vm0, %v894_v18  ;;  %v1417_v32 = vadd.f32 %v5127_v31, %v1352_v26  ;;  %v903_v26 = vld [vmem:[%s5058_s26 + $0x110] sm:$0xff] }
  0xee   : > { %v1545_v38 = vmul.f32 0.01, %v1417_v32  ;;  %vm1481_vm11 = vcmp.gt.f32.partialorder %v1417_v32, 0.0 }
  0xf0   : > { %v5203_v44 = vsel %vm1481_vm11, %v1417_v32, %v1545_v38 }
  0xf1   : > { %v1180_v21 = vpop.f32.mrf.mxu0  ;;  %8473 = vst [vmem:[#allocation11_spill] sm:$0xff] %v5203_v44 }
  0xf2   : > { %v1353_v24 = vmul.f32 %v5120_v27, %v1180_v21  ;;  %v902_v21 = vld [vmem:[%s5058_s26 + $0x108] sm:$0xff] }
  0xf4   : > { %v1418_v28 = vadd.f32 %v5127_v31, %v1353_v24  ;;  %4349 = vmatmul.msk.f32.gmra.mxu0 %vm858_vm0, %v895_v23 }
  0xf6   : > { %vm1482_vm10 = vcmp.gt.f32.partialorder %v1418_v28, 0.0  ;;  %v1546_v29 = vmul.f32 0.01, %v1418_v28 }
  0xf8   : > { %v5195_v33 = vsel %vm1482_vm10, %v1418_v28, %v1546_v29  ;;  %v920_v29 = vld [vmem:[%s5058_s26 + $0x198] sm:$0xff] }
  0xf9   : > { %v1183_v35 = vpop.f32.mrf.mxu0  ;;  %4374 = vmatmul.msk.f32.vlgmr.msra.gmra.mxu2 %vm858_vm0, %v920_v29 }
  0xfa   : > { %v1354_v37 = vmul.f32 %v5120_v27, %v1183_v35 }
  0xfc   : > { %v1419_v39 = vadd.f32 %v5127_v31, %v1354_v37  ;;  %4350 = vmatmul.msk.f32.gmra.mxu0 %vm858_vm0, %v896_v36 }
  0xfe   : > { %vm1483_vm12 = vcmp.gt.f32.partialorder %v1419_v39, 0.0  ;;  %v1547_v41 = vmul.f32 0.01, %v1419_v39 }
 0x100   : > { %v5205_v45 = vsel %vm1483_vm12, %v1419_v39, %v1547_v41 }
 0x101   : > { %8474 = vst [vmem:[#allocation12_spill] sm:$0xff] %v5205_v45  ;;  %v1186_v47 = vpop.f32.mrf.mxu0 }
 0x102   : > { %v1355_v54 = vmul.f32 %v5120_v27, %v1186_v47  ;;  %v1735_v47 = vsel %vm858_vm0, %v5164_v2, 0.0 }
 0x104   : > { %4351 = vmatmul.msk.f32.gmra.mxu0 %vm858_vm0, %v897_v48  ;;  %v1420_v55 = vadd.f32 %v5127_v31, %v1355_v54  ;;  %v921_v54 = vld [vmem:[%s5058_s26 + $0x1a0] sm:$0xff] }
 0x105   : > { %4375 = vmatmul.msk.f32.gmra.mxu2 %vm858_vm0, %v921_v54 }
 0x106   : > { %v1548_v59 = vmul.f32 0.01, %v1420_v55  ;;  %vm1484_vm13 = vcmp.gt.f32.partialorder %v1420_v55, 0.0 }
 0x108   : > { %v5220_v63 = vsel %vm1484_vm13, %v1420_v55, %v1548_v59 }
 0x109   : > { %v1189_v49 = vpop.f32.mrf.mxu0 }
 0x10a   : > { %v1356_v60 = vmul.f32 %v5120_v27, %v1189_v49  ;;  %v904_v49 = vld [vmem:[%s5058_s26 + $0x118] sm:$0xff] }
 0x10c   : > { %4352 = vmatmul.msk.f32.gmra.mxu0 %vm858_vm0, %v898_v53  ;;  %v1421_v0 = vadd.f32 %v5127_v31, %v1356_v60 }
 0x10e   : > { %v1549_v9 = vmul.f32 0.01, %v1421_v0  ;;  %vm1485_vm15 = vcmp.gt.f32.partialorder %v1421_v0, 0.0 }
 0x110   : > { %v5231_v15 = vsel %vm1485_vm15, %v1421_v0, %v1549_v9  ;;  %v922_v0 = vld [vmem:[%s5058_s26 + $0x1a8] sm:$0xff] }
 0x111   : > { %v1192_v56 = vpop.f32.mrf.mxu0  ;;  %8475 = vst [vmem:[#allocation13_spill] sm:$0xff] %v5231_v15  ;;  %4376 = vmatmul.msk.f32.gmra.mxu2 %vm858_vm0, %v922_v0 }
 0x112   : > { %v1357_v58 = vmul.f32 %v5120_v27, %v1192_v56 }
 0x114   : > { %v1422_v61 = vadd.f32 %v5127_v31, %v1357_v58  ;;  %4353 = vmatmul.msk.f32.gmra.mxu0 %vm858_vm0, %v899_v57 }
 0x116   : > { %vm1486_vm14 = vcmp.gt.f32.partialorder %v1422_v61, 0.0  ;;  %v1550_v62 = vmul.f32 0.01, %v1422_v61 }
 0x118   : > { %v5223_v1 = vsel %vm1486_vm14, %v1422_v61, %v1550_v62  ;;  %v905_v62 = vld [vmem:[%s5058_s26 + $0x120] sm:$0xff] }
 0x119   : > { %v1195_v6 = vpop.f32.mrf.mxu0 }
 0x11a   : > { %v1358_v8 = vmul.f32 %v5120_v27, %v1195_v6 }
 0x11c   : > { %v1423_v10 = vadd.f32 %v5127_v31, %v1358_v8  ;;  %4354 = vmatmul.msk.f32.gmra.mxu0 %vm858_vm0, %v900_v7  ;;  %v906_v7 = vld [vmem:[%s5058_s26 + $0x128] sm:$0xff]  ;;  %v923_v8 = vld [vmem:[%s5058_s26 + $0x1b0] sm:$0xff] }
 0x11d   : > { %4377 = vmatmul.msk.f32.gmra.mxu2 %vm858_vm0, %v923_v8 }
 0x11e   : > { %vm1487_vm1 = vcmp.gt.f32.partialorder %v1423_v10, 0.0  ;;  %v1551_v11 = vmul.f32 0.01, %v1423_v10 }
 0x120   : > { %v5233_v16 = vsel %vm1487_vm1, %v1423_v10, %v1551_v11 }
 0x121   : > { %8476 = vst [vmem:[#allocation14_spill] sm:$0xff] %v5233_v16  ;;  %v1198_v18 = vpop.f32.mrf.mxu0 }
 0x122   : > { %v1359_v23 = vmul.f32 %v5120_v27, %v1198_v18  ;;  %v907_v18 = vld [vmem:[%s5058_s26 + $0x130] sm:$0xff] }
 0x124   : > { %4355 = vmatmul.msk.f32.gmra.mxu0 %vm858_vm0, %v901_v19  ;;  %v1424_v24 = vadd.f32 %v5127_v31, %v1359_v23 }
 0x126   : > { %v1552_v32 = vmul.f32 0.01, %v1424_v24  ;;  %vm1488_vm2 = vcmp.gt.f32.partialorder %v1424_v24, 0.0 }
 0x128   : > { %v5250_v38 = vsel %vm1488_vm2, %v1424_v24, %v1552_v32 }
 0x129   : > { %v1201_v20 = vpop.f32.mrf.mxu0 }
 0x12a   : > { %v1360_v35 = vmul.f32 %v5120_v27, %v1201_v20  ;;  %v924_v20 = vld [vmem:[%s5058_s26 + $0x1b8] sm:$0xff] }
 0x12b   : > { %4378 = vmatmul.msk.f32.gmra.mxu2 %vm858_vm0, %v924_v20 }
 0x12c   : > { %4356 = vmatmul.msk.f32.gmra.mxu0 %vm858_vm0, %v902_v21  ;;  %v1425_v39 = vadd.f32 %v5127_v31, %v1360_v35 }
 0x12e   : > { %v1553_v55 = vmul.f32 0.01, %v1425_v39  ;;  %vm1489_vm4 = vcmp.gt.f32.partialorder %v1425_v39, 0.0 }
 0x130   : > { %v5263_v58 = vsel %vm1489_vm4, %v1425_v39, %v1553_v55  ;;  %v925_v39 = vld [vmem:[%s5058_s26 + $0x1c0] sm:$0xff] }
 0x131   : > { %v1204_v25 = vpop.f32.mrf.mxu0  ;;  %8477 = vst [vmem:[#allocation15_spill] sm:$0xff] %v5263_v58 }
 0x132   : > { %v1361_v28 = vmul.f32 %v5120_v27, %v1204_v25 }
 0x133   : > { %4379 = vmatmul.msk.f32.gmra.mxu2 %vm858_vm0, %v925_v39  ;;  %v912_v39 = vld [vmem:[%s5058_s26 + $0x158] sm:$0xff] }
 0x134   : > { %v1426_v36 = vadd.f32 %v5127_v31, %v1361_v28  ;;  %4357 = vmatmul.msk.f32.gmra.mxu0 %vm858_vm0, %v903_v26 }
 0x136   : > { %vm1490_vm3 = vcmp.gt.f32.partialorder %v1426_v36, 0.0  ;;  %v1554_v37 = vmul.f32 0.01, %v1426_v36 }
 0x138   : > { %v5253_v41 = vsel %vm1490_vm3, %v1426_v36, %v1554_v37  ;;  %v908_v36 = vld [vmem:[%s5058_s26 + $0x138] sm:$0xff] }
 0x139   : > { %v1207_v48 = vpop.f32.mrf.mxu0 }
 0x13a   : > { %v1362_v53 = vmul.f32 %v5120_v27, %v1207_v48 }
 0x13c   : > { %v1427_v56 = vadd.f32 %v5127_v31, %v1362_v53  ;;  %4358 = vmatmul.msk.f32.gmra.mxu0 %vm858_vm0, %v904_v49 }
 0x13e   : > { %vm1491_vm5 = vcmp.gt.f32.partialorder %v1427_v56, 0.0  ;;  %v1555_v57 = vmul.f32 0.01, %v1427_v56 }
 0x140   : > { %v5265_v59 = vsel %vm1491_vm5, %v1427_v56, %v1555_v57 }
 0x141   : > { %8478 = vst [vmem:[#allocation16_spill] sm:$0xff] %v5265_v59  ;;  %v1210_v61 = vpop.f32.mrf.mxu0 }
 0x142   : > { %v1363_v9 = vmul.f32 %v5120_v27, %v1210_v61  ;;  %v909_v61 = vld [vmem:[%s5058_s26 + $0x140] sm:$0xff] }
 0x144   : > { %4359 = vmatmul.msk.f32.gmra.mxu0 %vm858_vm0, %v905_v62  ;;  %v1428_v10 = vadd.f32 %v5127_v31, %v1363_v9  ;;  %v926_v62 = vld [vmem:[%s5058_s26 + $0x1c8] sm:$0xff] }
 0x145   : > { %4380 = vmatmul.msk.f32.gmra.mxu2 %vm858_vm0, %v926_v62 }
 0x146   : > { %v1556_v21 = vmul.f32 0.01, %v1428_v10  ;;  %vm1492_vm6 = vcmp.gt.f32.partialorder %v1428_v10, 0.0 }
 0x148   : > { %v5286_v26 = vsel %vm1492_vm6, %v1428_v10, %v1556_v21 }
 0x149   : > { %v1213_v6 = vpop.f32.mrf.mxu0 }
 0x14a   : > { %v1364_v23 = vmul.f32 %v5120_v27, %v1213_v6  ;;  %v910_v6 = vld [vmem:[%s5058_s26 + $0x148] sm:$0xff] }
 0x14c   : > { %4360 = vmatmul.msk.f32.gmra.mxu0 %vm858_vm0, %v906_v7  ;;  %v1429_v28 = vadd.f32 %v5127_v31, %v1364_v23  ;;  %v927_v7 = vld [vmem:[%s5058_s26 + $0x1d0] sm:$0xff] }
 0x14d   : > { %4381 = vmatmul.msk.f32.gmra.mxu2 %vm858_vm0, %v927_v7 }
 0x14e   : > { %v1557_v48 = vmul.f32 0.01, %v1429_v28  ;;  %vm1493_vm8 = vcmp.gt.f32.partialorder %v1429_v28, 0.0 }
 0x150   : > { %v5299_v54 = vsel %vm1493_vm8, %v1429_v28, %v1557_v48 }
 0x151   : > { %v1216_v11 = vpop.f32.mrf.mxu0 }
 0x152   : > { %v1365_v19 = vmul.f32 %v5120_v27, %v1216_v11  ;;  %v911_v11 = vld [vmem:[%s5058_s26 + $0x150] sm:$0xff] }
 0x154   : > { %v1430_v24 = vadd.f32 %v5127_v31, %v1365_v19  ;;  %4361 = vmatmul.msk.f32.gmra.mxu0 %vm858_vm0, %v907_v18  ;;  %v928_v19 = vld [vmem:[%s5058_s26 + $0x1d8] sm:$0xff] }
 0x155   : > { %4382 = vmatmul.msk.f32.gmra.mxu2 %vm858_vm0, %v928_v19 }
 0x156   : > { %vm1494_vm7 = vcmp.gt.f32.partialorder %v1430_v24, 0.0  ;;  %v1558_v25 = vmul.f32 0.01, %v1430_v24 }
 0x158   : > { %v5289_v29 = vsel %vm1494_vm7, %v1430_v24, %v1558_v25 }
 0x159   : > { %v1219_v35 = vpop.f32.mrf.mxu0 }
 0x15a   : > { %v1366_v37 = vmul.f32 %v5120_v27, %v1219_v35 }
 0x15c   : > { %v1431_v49 = vadd.f32 %v5127_v31, %v1366_v37  ;;  %4362 = vmatmul.msk.f32.gmra.mxu0 %vm858_vm0, %v908_v36 }
 0x15e   : > { %vm1495_vm9 = vcmp.gt.f32.partialorder %v1431_v49, 0.0  ;;  %v1559_v53 = vmul.f32 0.01, %v1431_v49 }
 0x160   : > { %v5301_v55 = vsel %vm1495_vm9, %v1431_v49, %v1559_v53  ;;  %v929_v49 = vld [vmem:[%s5058_s26 + $0x1e0] sm:$0xff] }
 0x161   : > { %8479 = vst [vmem:[#allocation17_spill] sm:$0xff] %v5301_v55  ;;  %v1222_v57 = vpop.f32.mrf.mxu0  ;;  %4383 = vmatmul.msk.f32.gmra.mxu2 %vm858_vm0, %v929_v49 }
 0x162   : > { %v1367_v8 = vmul.f32 %v5120_v27, %v1222_v57 }
 0x164   : > { %4363 = vmatmul.msk.f32.gmra.mxu0 %vm858_vm0, %v909_v61  ;;  %v1432_v9 = vadd.f32 %v5127_v31, %v1367_v8  ;;  %v913_v8 = vld [vmem:[%s5058_s26 + $0x160] sm:$0xff] }
 0x166   : > { %v1560_v20 = vmul.f32 0.01, %v1432_v9  ;;  %vm1496_vm10 = vcmp.gt.f32.partialorder %v1432_v9, 0.0 }
 0x168   : > { %v5322_v25 = vsel %vm1496_vm10, %v1432_v9, %v1560_v20  ;;  %v930_v9 = vld [vmem:[%s5058_s26 + $0x1e8] sm:$0xff] }
 0x169   : > { %v1225_v0 = vpop.f32.mrf.mxu0  ;;  %8480 = vst [vmem:[#allocation18_spill] sm:$0xff] %v5322_v25  ;;  %4384 = vmatmul.msk.f32.gmra.mxu2 %vm858_vm0, %v930_v9  ;;  %v916_v9 = vld [vmem:[%s5058_s26 + $0x178] sm:$0xff] }
 0x16a   : > { %v1368_v21 = vmul.f32 %v5120_v27, %v1225_v0 }
 0x16c   : > { %4364 = vmatmul.msk.f32.gmra.mxu0 %vm858_vm0, %v910_v6  ;;  %v1433_v28 = vadd.f32 %v5127_v31, %v1368_v21 }
 0x16e   : > { %v1561_v53 = vmul.f32 0.01, %v1433_v28  ;;  %vm1497_vm12 = vcmp.gt.f32.partialorder %v1433_v28, 0.0 }
 0x170   : > { %v5335_v62 = vsel %vm1497_vm12, %v1433_v28, %v1561_v53  ;;  %v932_v28 = vld [vmem:[%s5058_s26 + $0x1f8] sm:$0xff] }
 0x171   : > { %v1228_v10 = vpop.f32.mrf.mxu0  ;;  %8481 = vst [vmem:[#allocation19_spill] sm:$0xff] %v5335_v62 }
 0x172   : > { %v1369_v18 = vmul.f32 %v5120_v27, %v1228_v10 }
 0x174   : > { %v1434_v23 = vadd.f32 %v5127_v31, %v1369_v18  ;;  %4365 = vmatmul.msk.f32.gmra.mxu0 %vm858_vm0, %v911_v11  ;;  %v914_v11 = vld [vmem:[%s5058_s26 + $0x168] sm:$0xff]  ;;  %v931_v18 = vld [vmem:[%s5058_s26 + $0x1f0] sm:$0xff] }
 0x175   : > { %4385 = vmatmul.msk.f32.gmra.mxu2 %vm858_vm0, %v931_v18 }
 0x176   : > { %vm1498_vm11 = vcmp.gt.f32.partialorder %v1434_v23, 0.0  ;;  %v1562_v24 = vmul.f32 0.01, %v1434_v23 }
 0x178   : > { %v5325_v35 = vsel %vm1498_vm11, %v1434_v23, %v1562_v24  ;;  %v915_v23 = vld [vmem:[%s5058_s26 + $0x170] sm:$0xff] }
 0x179   : > { %v1231_v37 = vpop.f32.mrf.mxu0 }
 0x17a   : > { %v1370_v48 = vmul.f32 %v5120_v27, %v1231_v37 }
 0x17c   : > { %v1435_v57 = vadd.f32 %v5127_v31, %v1370_v48  ;;  %4366 = vmatmul.msk.f32.gmra.mxu0 %vm858_vm0, %v912_v39 }
 0x17d   : > { %4386 = vmatmul.msk.f32.gmra.mxu2 %vm858_vm0, %v932_v28  ;;  %v917_v28 = vld [vmem:[%s5058_s26 + $0x180] sm:$0xff] }
 0x17e   : > { %vm1499_vm13 = vcmp.gt.f32.partialorder %v1435_v57, 0.0  ;;  %v1563_v61 = vmul.f32 0.01, %v1435_v57 }
 0x180   : > { %v5337_v0 = vsel %vm1499_vm13, %v1435_v57, %v1563_v61 }
 0x181   : > { %8482 = vst [vmem:[#allocation20_spill] sm:$0xff] %v5337_v0  ;;  %v1234_v7 = vpop.f32.mrf.mxu0 }
 0x182   : > { %v1371_v19 = vmul.f32 %v5120_v27, %v1234_v7 }
 0x184   : > { %4367 = vmatmul.msk.f32.gmra.mxu0 %vm858_vm0, %v913_v8  ;;  %v1436_v20 = vadd.f32 %v5127_v31, %v1371_v19 }
 0x186   : > { %v1564_v37 = vmul.f32 0.01, %v1436_v20  ;;  %vm1500_vm14 = vcmp.gt.f32.partialorder %v1436_v20, 0.0 }
 0x188   : > { %v5358_v53 = vsel %vm1500_vm14, %v1436_v20, %v1564_v37  ;;  %v537_v37 = vlaneseq }
 0x189   : > { %v1237_v10 = vpop.f32.mrf.mxu0 }
 0x18a   : > { %v1372_v39 = vmul.f32 %v5120_v27, %v1237_v10 }
 0x18c   : > { %4368 = vmatmul.msk.f32.gmra.mxu0 %vm858_vm0, %v914_v11  ;;  %v1437_v57 = vadd.f32 %v5127_v31, %v1372_v39 }
 0x18e   : > { %v1565_v11 = vmul.f32 0.01, %v1437_v57  ;;  %vm1501_vm1 = vcmp.gt.f32.partialorder %v1437_v57, 0.0 }
 0x190   : > { %v5369_v20 = vsel %vm1501_vm1, %v1437_v57, %v1565_v11  ;;  %v919_v11 = vld [vmem:[%s5058_s26 + $0x190] sm:$0xff] }
 0x191   : > { %v1240_v21 = vpop.f32.mrf.mxu0  ;;  %8483 = vst [vmem:[#allocation21_spill] sm:$0xff] %v5369_v20 }
 0x192   : > { %v1373_v24 = vmul.f32 %v5120_v27, %v1240_v21 }
 0x194   : > { %v1438_v48 = vadd.f32 %v5127_v31, %v1373_v24  ;;  %4369 = vmatmul.msk.f32.gmra.mxu0 %vm858_vm0, %v915_v23 }
 0x196   : > { %vm1502_vm15 = vcmp.gt.f32.partialorder %v1438_v48, 0.0  ;;  %v1566_v49 = vmul.f32 0.01, %v1438_v48 }
 0x198   : > { %v5361_v61 = vsel %vm1502_vm15, %v1438_v48, %v1566_v49  ;;  %v918_v48 = vld [vmem:[%s5058_s26 + $0x188] sm:$0xff]  ;;  %v5378_v49 = vshrl.u32 %v537_v37, 7  ;;  %s4924_s26 = smov 64  }
 0x199   : > { %v1243_v8 = vpop.f32.mrf.mxu0 }
 0x19a   : > { %v1374_v10 = vmul.f32 %v5120_v27, %v1243_v8  ;;  %v539_v57 = vadd.s32 8, %v5378_v49  ;;  %v543_v17 = vadd.s32 40, %v5378_v49  ;;  %v551_v3 = vadd.s32 104, %v5378_v49 }
 0x19c   : > { %v1439_v18 = vadd.f32 %v5127_v31, %v1374_v10  ;;  %4370 = vmatmul.msk.f32.gmra.mxu0 %vm858_vm0, %v916_v9 }
 0x19e   : > { %vm1503_vm2 = vcmp.gt.f32.partialorder %v1439_v18, 0.0  ;;  %v1567_v19 = vmul.f32 0.01, %v1439_v18 }
 0x1a0   : > { %v5371_v21 = vsel %vm1503_vm2, %v1439_v18, %v1567_v19  ;;  %v603_v19 = vand.u32 15, %v539_v57 }
 0x1a1   : > { %8484 = vst [vmem:[#allocation22_spill] sm:$0xff] %v5371_v21  ;;  %v1246_v24 = vpop.f32.mrf.mxu0 }
 0x1a2   : > { %v1375_v8 = vmul.f32 %v5120_v27, %v1246_v24  ;;  %vm667_vm5 = vcmp.ne.s32.totalorder %v603_v19, 15  ;;  %v607_v19 = vand.u32 15, %v543_v17 }
 0x1a3   : > { %v5402_v14 = vsel %vm667_vm5, 1.0, %v8353_v22 }
 0x1a4   : > { %4371 = vmatmul.msk.f32.gmra.mxu0 %vm858_vm0, %v917_v28  ;;  %v1440_v9 = vadd.f32 %v5127_v31, %v1375_v8  ;;  %v541_v28 = vadd.s32 24, %v5378_v49  ;;  %v5390_v8 = vpop.f32.mrf.mxu2  ;;  %8485 = vst [vmem:[#allocation23_spill] sm:$0xff] %v5402_v14  ;;  %vm671_vm9 = vcmp.ne.s32.totalorder %v607_v19, 15  ;;  %v1728_v19 = vsel %vm858_vm0, %v5136_v40, 0.0 }
 0x1a5   : > { %v5422_v56 = vsel %vm671_vm9, 1.0, %v8353_v22 }
 0x1a6   : > { %v1568_v6 = vmul.f32 0.01, %v1440_v9  ;;  %vm1504_vm3 = vcmp.gt.f32.partialorder %v1440_v9, 0.0  ;;  %8489 = vst [vmem:[#allocation27_spill] sm:$0xff] %v5422_v56 }
 0x1a9   : > { %v1249_v39 = vpop.f32.mrf.mxu0 }
 0x1aa   : > { %v1376_v60 = vmul.f32 %v5120_v27, %v1249_v39 }
 0x1ac   : > { %4372 = vmatmul.msk.f32.gmra.mxu0 %vm858_vm0, %v918_v48  ;;  %v605_v48 = vand.u32 15, %v541_v28  ;;  %v1441_v57 = vadd.f32 %v5127_v31, %v1376_v60  ;;  %v545_v28 = vadd.s32 56, %v5378_v49  ;;  %v1665_v60 = vmul.f32 %v5402_v14, %v5147_v50 }
 0x1ae   : > { %vm669_vm6 = vcmp.ne.s32.totalorder %v605_v48, 15  ;;  %v1569_v52 = vmul.f32 0.01, %v1441_v57  ;;  %vm1505_vm7 = vcmp.gt.f32.partialorder %v1441_v57, 0.0  ;;  %v609_v48 = vand.u32 15, %v545_v28 }
 0x1af   : > { %v1729_v7 = vsel %vm858_vm0, %v1665_v60, 0.0  ;;  %v549_v60 = vadd.s32 88, %v5378_v49 }
 0x1b0   : > { %v5412_v17 = vsel %vm1505_vm7, %v1441_v57, %v1569_v52  ;;  %v1731_v52 = vsel %vm858_vm0, %v5139_v42, 0.0  ;;  %vm673_vm10 = vcmp.ne.s32.totalorder %v609_v48, 15  ;;  %v1730_v57 = vadd.f32 %v1729_v7, %v1728_v19 }
 0x1b1   : > { %v1252_v10 = vpop.f32.mrf.mxu0  ;;  %8487 = vst [vmem:[#allocation25_spill] sm:$0xff] %v5412_v17 }
 0x1b2   : > { %v1377_v18 = vmul.f32 %v5120_v27, %v1252_v10  ;;  %v5393_v10 = vsel %vm1504_vm3, %v1440_v9, %v1568_v6 }
 0x1b4   : > { %v1442_v37 = vadd.f32 %v5127_v31, %v1377_v18  ;;  %4373 = vmatmul.msk.f32.gmra.mxu0 %vm858_vm0, %v919_v11 }
 0x1b6   : > { %vm1506_vm4 = vcmp.gt.f32.partialorder %v1442_v37, 0.0  ;;  %v1570_v24 = vmul.f32 0.01, %v1442_v37 }
 0x1b8   : > { %v5396_v46 = vsel %vm1506_vm4, %v1442_v37, %v1570_v24  ;;  %v5409_v37 = vsel %vm669_vm6, 1.0, %v8353_v22  ;;  %v547_v24 = vadd.s32 72, %v5378_v49 }
 0x1b9   : > { %v1255_v18 = vpop.f32.mrf.mxu0  ;;  %8486 = vst [vmem:[#allocation24_spill] sm:$0xff] %v5409_v37  ;;  %v1667_v36 = vmul.f32 %v5409_v37, %v5149_v51 }
 0x1ba   : > { %v1378_v11 = vmul.f32 %v5120_v27, %v1255_v18  ;;  %v1306_v18 = vpop.f32.mrf.mxu2  ;;  %v611_v32 = vand.u32 15, %v547_v24 }
 0x1bb   : > { %v1733_v28 = vsel %vm858_vm0, %v1667_v36, 0.0  ;;  %v1395_v36 = vmul.f32 %v5120_v27, %v1306_v18 }
 0x1bc   : > { %v1443_v6 = vadd.f32 %v5127_v31, %v1378_v11  ;;  %v5433_v11 = vsel %vm673_vm10, 1.0, %v8353_v22  ;;  %vm675_vm11 = vcmp.ne.s32.totalorder %v611_v32, 15 }
 0x1bd   : > { %8490 = vst [vmem:[#allocation28_spill] sm:$0xff] %v5433_v11  ;;  %v1671_v34 = vmul.f32 %v5433_v11, %v5177_v13 }
 0x1be   : > { %vm1507_vm8 = vcmp.gt.f32.partialorder %v1443_v6, 0.0  ;;  %v1571_v9 = vmul.f32 0.01, %v1443_v6 }
 0x1c0   : > { %v5414_v23 = vsel %vm1507_vm8, %v1443_v6, %v1571_v9  ;;  %v1669_v6 = vmul.f32 %v5422_v56, %v5175_v12  ;;  %v1732_v9 = vadd.f32 %v1731_v52, %v1730_v57  ;;  %v5443_v52 = vsel %vm675_vm11, 1.0, %v8353_v22 }
 0x1c1   : > { %8488 = vst [vmem:[#allocation26_spill] sm:$0xff] %v5414_v23  ;;  %v1258_v39 = vpop.f32.mrf.mxu0  ;;  %v613_v57 = vand.u32 15, %v549_v60  ;;  %v615_v56 = vand.u32 15, %v551_v3  ;;  %v1673_v18 = vmul.f32 %v5443_v52, %v5203_v44  ;;  %v553_v22 = vadd.s32 120, %v5378_v49 }
 0x1c2   : > { %v1309_v24 = vpop.f32.mrf.mxu2  ;;  %v1734_v48 = vadd.f32 %v1733_v28, %v1732_v9  ;;  %v1737_v19 = vsel %vm858_vm0, %v1669_v6, 0.0  ;;  %8491 = vst [vmem:[#allocation29_spill] sm:$0xff] %v5443_v52  ;;  %v1379_v5 = vmul.f32 %v5120_v27, %v1258_v39  ;;  %v1460_v6 = vadd.f32 %v5127_v31, %v1395_v36 }
 0x1c3   : > { %v1741_v9 = vsel %vm858_vm0, %v1671_v34, 0.0  ;;  %vm677_vm12 = vcmp.ne.s32.totalorder %v613_v57, 15  ;;  %v1743_v39 = vsel %vm858_vm0, %v5192_v30, 0.0  ;;  %vm679_vm13 = vcmp.ne.s32.totalorder %v615_v56, 15 }
 0x1c4   : > { %v1736_v32 = vadd.f32 %v1735_v47, %v1734_v48  ;;  %v1444_v47 = vadd.f32 %v5127_v31, %v1379_v5  ;;  %v1396_v3 = vmul.f32 %v5120_v27, %v1309_v24  ;;  %v1745_v36 = vsel %vm858_vm0, %v1673_v18, 0.0 }
 0x1c5   : > { %v1588_v52 = vmul.f32 0.01, %v1460_v6  ;;  %vm1524_vm14 = vcmp.gt.f32.partialorder %v1460_v6, 0.0  ;;  %v557_v12 = vadd.s32 152, %v5378_v49 }
 0x1c6   : > { %v1738_v28 = vadd.f32 %v1737_v19, %v1736_v32  ;;  %v8492_v32 = vmov 0.0   ;;  %v1572_v24 = vmul.f32 0.01, %v1444_v47  ;;  %vm1508_vm15 = vcmp.gt.f32.partialorder %v1444_v47, 0.0 }
 0x1c7   : > { %v5460_v34 = vsel %vm677_vm12, 1.0, %v8492_v32  ;;  %v5465_v56 = vsel %vm679_vm13, 1.0, %v8492_v32 }
 0x1c8   : > { %v1740_v11 = vadd.f32 %v1739_v43, %v1738_v28  ;;  %8493 = vst [vmem:[#allocation30_spill] sm:$0xff] %v5460_v34  ;;  %v617_v43 = vand.u32 15, %v553_v22  ;;  %v555_v22 = vadd.s32 136, %v5378_v49 }
 0x1c9   : > { %v1261_v7 = vpop.f32.mrf.mxu0  ;;  %8494 = vst [vmem:[#allocation31_spill] sm:$0xff] %v5465_v56 }
 0x1ca   : > { %v1312_v60 = vpop.f32.mrf.mxu2  ;;  %v1742_v19 = vadd.f32 %v1741_v9, %v1740_v11  ;;  %v1380_v11 = vmul.f32 %v5120_v27, %v1261_v7  ;;  %v1461_v9 = vadd.f32 %v5127_v31, %v1396_v3  ;;  %vm5475_vm2 = vcmp.ne.s32.totalorder %v617_v43, 15 }
 0x1cb   : > { %v1397_v48 = vmul.f32 %v5120_v27, %v1312_v60  ;;  %v5481_v3 = vsel %vm1508_vm15, %v1444_v47, %v1572_v24  ;;  %v619_v13 = vand.u32 15, %v555_v22  ;;  %v5502_v22 = vsel %vm5475_vm2, 1.0, %v8492_v32 }
 0x1cc   : > { %v1744_v37 = vadd.f32 %v1743_v39, %v1742_v19  ;;  %v1747_v39 = vsel %vm858_vm0, %v5195_v33, 0.0  ;;  %v1675_v19 = vmul.f32 %v5460_v34, %v5205_v45  ;;  %8497 = vst [vmem:[#allocation32_spill] sm:$0xff] %v5481_v3  ;;  %vm1525_vm4 = vcmp.gt.f32.partialorder %v1461_v9, 0.0 }
 0x1cd   : > { %v1462_v28 = vadd.f32 %v5127_v31, %v1397_v48  ;;  %8498 = vst [vmem:[#allocation33_spill] sm:$0xff] %v5502_v22  ;;  %vm683_vm6 = vcmp.ne.s32.totalorder %v619_v13, 15 }
 0x1ce   : > { %v1746_v60 = vadd.f32 %v1745_v36, %v1744_v37  ;;  %v1445_v37 = vadd.f32 %v5127_v31, %v1380_v11  ;;  %v5522_v51 = vsel %vm683_vm6, 1.0, %v8492_v32 }
 0x1cf   : > { %vm1526_vm1 = vcmp.gt.f32.partialorder %v1462_v28, 0.0  ;;  %v1590_v14 = vmul.f32 0.01, %v1462_v28  ;;  %8501 = vst [vmem:[#allocation36_spill] sm:$0xff] %v5522_v51 }
 0x1d0   : > { %v1748_v11 = vadd.f32 %v1747_v39, %v1746_v60  ;;  %v621_v39 = vand.u32 15, %v557_v12  ;;  %vm1509_vm7 = vcmp.gt.f32.partialorder %v1445_v37, 0.0 }
 0x1d1   : > { %v1264_v57 = vpop.f32.mrf.mxu0  ;;  %v5484_v36 = vsel %vm1526_vm1, %v1462_v28, %v1590_v14 }
 0x1d2   : > { %v1381_v5 = vmul.f32 %v5120_v27, %v1264_v57  ;;  %v5471_v57 = vsel %vm1524_vm14, %v1460_v6, %v1588_v52  ;;  %v1315_v52 = vpop.f32.mrf.mxu2  ;;  %vm685_vm9 = vcmp.ne.s32.totalorder %v621_v39, 15 }
 0x1d3   : > { %v1398_v44 = vmul.f32 %v5120_v27, %v1315_v52  ;;  %v1573_v52 = vmul.f32 0.01, %v1445_v37 }
 0x1d4   : > { %v1446_v18 = vadd.f32 %v5127_v31, %v1381_v5  ;;  %v1589_v5 = vmul.f32 0.01, %v1461_v9 }
 0x1d5   : > { %v1463_v28 = vadd.f32 %v5127_v31, %v1398_v44  ;;  %v1751_v44 = vsel %vm858_vm0, %v5220_v63, 0.0  ;;  %v5517_v45 = vsel %vm1509_vm7, %v1445_v37, %v1573_v52  ;;  %v1681_v37 = vmul.f32 %v5522_v51, %v5263_v58 }
 0x1d6   : > { %vm1510_vm3 = vcmp.gt.f32.partialorder %v1446_v18, 0.0  ;;  %v1574_v7 = vmul.f32 0.01, %v1446_v18  ;;  %v5505_v47 = vsel %vm1525_vm4, %v1461_v9, %v1589_v5  ;;  %8499 = vst [vmem:[#allocation34_spill] sm:$0xff] %v5517_v45  ;;  %v5533_v52 = vsel %vm685_vm9, 1.0, %v8492_v32 }
 0x1d7   : > { %vm1527_vm5 = vcmp.gt.f32.partialorder %v1463_v28, 0.0  ;;  %v1591_v60 = vmul.f32 0.01, %v1463_v28  ;;  %8502 = vst [vmem:[#allocation37_spill] sm:$0xff] %v5533_v52  ;;  %v1761_v39 = vsel %vm858_vm0, %v1681_v37, 0.0 }
 0x1d8   : > { %v5486_v6 = vsel %vm1510_vm3, %v1446_v18, %v1574_v7  ;;  %v1749_v18 = vsel %vm858_vm0, %v1675_v19, 0.0  ;;  %v1677_v7 = vmul.f32 %v5465_v56, %v5231_v15  ;;  %v559_v19 = vadd.s32 168, %v5378_v49 }
 0x1d9   : > { %v1267_v24 = vpop.f32.mrf.mxu0  ;;  %v5510_v48 = vsel %vm1527_vm5, %v1463_v28, %v1591_v60  ;;  %v1750_v56 = vadd.f32 %v1749_v18, %v1748_v11  ;;  %v1679_v15 = vmul.f32 %v5502_v22, %v5233_v16  ;;  %v1755_v18 = vsel %vm858_vm0, %v5223_v1, 0.0 }
 0x1da   : > { %v1382_v14 = vmul.f32 %v5120_v27, %v1267_v24  ;;  %v1318_v9 = vpop.f32.mrf.mxu2  ;;  %v1753_v5 = vsel %vm858_vm0, %v1677_v7, 0.0  ;;  %v623_v7 = vand.u32 15, %v559_v19 }
 0x1db   : > { %v1752_v13 = vadd.f32 %v1751_v44, %v1750_v56  ;;  %v561_v56 = vadd.s32 184, %v5378_v49  ;;  %v1759_v44 = vsel %vm858_vm0, %v5250_v38, 0.0  ;;  %v1399_v51 = vmul.f32 %v5120_v27, %v1318_v9 }
 0x1dc   : > { %v1447_v43 = vadd.f32 %v5127_v31, %v1382_v14  ;;  %v1757_v14 = vsel %vm858_vm0, %v1679_v15, 0.0  ;;  %vm687_vm10 = vcmp.ne.s32.totalorder %v623_v7, 15  ;;  %v1683_v15 = vmul.f32 %v5533_v52, %v5265_v59 }
 0x1dd   : > { %v1754_v60 = vadd.f32 %v1753_v5, %v1752_v13  ;;  %v625_v19 = vand.u32 15, %v561_v56  ;;  %v563_v5 = vadd.s32 200, %v5378_v49  ;;  %v1763_v7 = vsel %vm858_vm0, %v5253_v41, 0.0 }
 0x1de   : > { %vm1511_vm8 = vcmp.gt.f32.partialorder %v1447_v43, 0.0  ;;  %v1575_v24 = vmul.f32 0.01, %v1447_v43  ;;  %v1765_v37 = vsel %vm858_vm0, %v1683_v15, 0.0  ;;  %v1464_v59 = vadd.f32 %v5127_v31, %v1399_v51 }
 0x1df   : > { %vm689_vm11 = vcmp.ne.s32.totalorder %v625_v19, 15  ;;  %v627_v52 = vand.u32 15, %v563_v5  ;;  %v1767_v9 = vsel %vm858_vm0, %v5286_v26, 0.0  ;;  %v1771_v51 = vsel %vm858_vm0, %v5289_v29, 0.0 }
 0x1e0   : > { %v5519_v12 = vsel %vm1511_vm8, %v1447_v43, %v1575_v24  ;;  %v1756_v43 = vadd.f32 %v1755_v18, %v1754_v60  ;;  %v5542_v18 = vsel %vm687_vm10, 1.0, %v8492_v32  ;;  %vm1528_vm13 = vcmp.gt.f32.partialorder %v1464_v59, 0.0 }
 0x1e1   : > { %8500 = vst [vmem:[#allocation35_spill] sm:$0xff] %v5519_v12  ;;  %v1270_v28 = vpop.f32.mrf.mxu0  ;;  %v1685_v56 = vmul.f32 %v5542_v18, %v5299_v54  ;;  %vm691_vm12 = vcmp.ne.s32.totalorder %v627_v52, 15 }
 0x1e2   : > { %v1758_v24 = vadd.f32 %v1757_v14, %v1756_v43  ;;  %v1321_v11 = vpop.f32.mrf.mxu2  ;;  %8503 = vst [vmem:[#allocation38_spill] sm:$0xff] %v5542_v18  ;;  %v1383_v43 = vmul.f32 %v5120_v27, %v1270_v28  ;;  %v5568_v52 = vsel %vm691_vm12, 1.0, %v8492_v32 }
 0x1e3   : > { %v1400_v19 = vmul.f32 %v5120_v27, %v1321_v11  ;;  %8505 = vst [vmem:[#allocation40_spill] sm:$0xff] %v5568_v52 }
 0x1e4   : > { %v1760_v13 = vadd.f32 %v1759_v44, %v1758_v24  ;;  %v565_v24 = vadd.s32 216, %v5378_v49  ;;  %v1448_v28 = vadd.f32 %v5127_v31, %v1383_v43 }
 0x1e6   : > { %v1762_v14 = vadd.f32 %v1761_v39, %v1760_v13  ;;  %v5556_v39 = vsel %vm689_vm11, 1.0, %v8492_v32  ;;  %v1769_v13 = vsel %vm858_vm0, %v1685_v56, 0.0  ;;  %v1576_v11 = vmul.f32 0.01, %v1448_v28 }
 0x1e7   : > { %8504 = vst [vmem:[#allocation39_spill] sm:$0xff] %v5556_v39  ;;  %vm1512_vm14 = vcmp.gt.f32.partialorder %v1448_v28, 0.0 }
 0x1e8   : > { %v1764_v44 = vadd.f32 %v1763_v7, %v1762_v14  ;;  %v629_v14 = vand.u32 15, %v565_v24  ;;  %v1465_v24 = vadd.f32 %v5127_v31, %v1400_v19 }
 0x1e9   : > { %v1273_v60 = vpop.f32.mrf.mxu0 }
 0x1ea   : > { %v1766_v58 = vadd.f32 %v1765_v37, %v1764_v44  ;;  %v1324_v15 = vpop.f32.mrf.mxu2  ;;  %v1592_v37 = vmul.f32 0.01, %v1464_v59  ;;  %v567_v44 = vadd.s32 232, %v5378_v49  ;;  %vm5573_vm1 = vcmp.ne.s32.totalorder %v629_v14, 15 }
 0x1eb   : > { %v1401_v5 = vmul.f32 %v5120_v27, %v1324_v15  ;;  %vm1529_vm3 = vcmp.gt.f32.partialorder %v1465_v24, 0.0 }
 0x1ec   : > { %v1768_v7 = vadd.f32 %v1767_v9, %v1766_v58  ;;  %v1384_v58 = vmul.f32 %v5120_v27, %v1273_v60  ;;  %v569_v60 = vadd.s32 248, %v5378_v49 }
 0x1ed   : > { %v1466_v43 = vadd.f32 %v5127_v31, %v1401_v5  ;;  %v1687_v5 = vmul.f32 %v5556_v39, %v5301_v55  ;;  %v571_v39 = vadd.s32 264, %v5378_v49  ;;  %v1779_v55 = vsel %vm858_vm0, %v5325_v35, 0.0 }
 0x1ee   : > { %v1770_v56 = vadd.f32 %v1769_v13, %v1768_v7  ;;  %v631_v7 = vand.u32 15, %v567_v44  ;;  %v633_v16 = vand.u32 15, %v569_v60 }
 0x1ef   : > { %vm1530_vm15 = vcmp.gt.f32.partialorder %v1466_v43, 0.0  ;;  %v1594_v13 = vmul.f32 0.01, %v1466_v43 }
 0x1f0   : > { %v1772_v15 = vadd.f32 %v1771_v51, %v1770_v56  ;;  %vm5616_vm4 = vcmp.ne.s32.totalorder %v631_v7, 15  ;;  %vm697_vm8 = vcmp.ne.s32.totalorder %v633_v16, 15 }
 0x1f1   : > { %v1276_v18 = vpop.f32.mrf.mxu0 }
 0x1f2   : > { %v1385_v22 = vmul.f32 %v5120_v27, %v1276_v18  ;;  %v5577_v18 = vsel %vm1528_vm13, %v1464_v59, %v1592_v37  ;;  %v5590_v59 = vsel %vm1530_vm15, %v1466_v43, %v1594_v13  ;;  %v1327_v51 = vpop.f32.mrf.mxu2  ;;  %v1593_v37 = vmul.f32 0.01, %v1465_v24 }
 0x1f3   : > { %v5607_v43 = vsel %vm5573_vm1, 1.0, %v8492_v32  ;;  %v1773_v13 = vsel %vm858_vm0, %v1687_v5, 0.0 }
 0x1f4   : > { %v1450_v9 = vadd.f32 %v5127_v31, %v1385_v22  ;;  %v5582_v22 = vsel %vm1512_vm14, %v1448_v28, %v1576_v11  ;;  %v5587_v31 = vld [vmem:[%s8341_s2 + $0x1] ss:$0 sm:$0xff]  ;;  %v5599_v28 = vld [vmem:[%s8341_s2] ss:$0 sm:$0xff]  ;;  %v1689_v11 = vmul.f32 %v5568_v52, %v5335_v62  ;;  %8508 = vst [vmem:[#allocation41_spill] sm:$0xff] %v5607_v43  ;;  %v5622_v50 = vsel %vm1529_vm3, %v1465_v24, %v1593_v37 }
 0x1f5   : > { %v1449_v19 = vadd.f32 %v5587_v31, %v1384_v58  ;;  %v1402_v56 = vmul.f32 %v5599_v28, %v1327_v51  ;;  %v1774_v34 = vadd.f32 %v1773_v13, %v1772_v15  ;;  %v1691_v7 = vmul.f32 %v5607_v43, %v5337_v0 }
 0x1f6   : > { %vm1514_vm2 = vcmp.gt.f32.partialorder %v1450_v9, 0.0  ;;  %v1578_v27 = vmul.f32 0.01, %v1450_v9  ;;  %v5634_v24 = vsel %vm5616_vm4, 1.0, %v8492_v32  ;;  %v5648_v15 = vsel %vm697_vm8, 1.0, %v8492_v32 }
 0x1f7   : > { %v1467_v44 = vadd.f32 %v5587_v31, %v1402_v56  ;;  %v1577_v62 = vmul.f32 0.01, %v1449_v19  ;;  %vm1513_vm6 = vcmp.gt.f32.partialorder %v1449_v19, 0.0  ;;  %8511 = vst [vmem:[#allocation42_spill] sm:$0xff] %v5634_v24  ;;  %v1693_v52 = vmul.f32 %v5634_v24, %v5369_v20 }
 0x1f8   : > { %v5592_v14 = vsel %vm1514_vm2, %v1450_v9, %v1578_v27  ;;  %v1775_v27 = vsel %vm858_vm0, %v5322_v25, 0.0  ;;  %v1777_v25 = vsel %vm858_vm0, %v1689_v11, 0.0  ;;  %v635_v11 = vand.u32 15, %v571_v39  ;;  %8514 = vst [vmem:[#allocation45_spill] sm:$0xff] %v5648_v15 }
 0x1f9   : > { %v1279_v9 = vpop.f32.mrf.mxu0  ;;  %vm1531_vm5 = vcmp.gt.f32.partialorder %v1467_v44, 0.0  ;;  %v1595_v5 = vmul.f32 0.01, %v1467_v44  ;;  %v1776_v60 = vadd.f32 %v1775_v27, %v1774_v34  ;;  %v5638_v13 = vsel %vm1513_vm6, %v1449_v19, %v1577_v62 }
 0x1fa   : > { %v1386_v51 = vmul.f32 %v5599_v28, %v1279_v9  ;;  %v1330_v37 = vpop.f32.mrf.mxu2  ;;  %8512 = vst [vmem:[#allocation43_spill] sm:$0xff] %v5638_v13  ;;  %v573_v39 = vadd.s32 280, %v5378_v49  ;;  %v1783_v62 = vsel %vm858_vm0, %v5358_v53, 0.0  ;;  %vm699_vm9 = vcmp.ne.s32.totalorder %v635_v11, 15 }
 0x1fb   : > { %v5627_v9 = vsel %vm1531_vm5, %v1467_v44, %v1595_v5  ;;  %v1778_v44 = vadd.f32 %v1777_v25, %v1776_v60  ;;  %v1781_v5 = vsel %vm858_vm0, %v1691_v7, 0.0  ;;  %v1785_v19 = vsel %vm858_vm0, %v1693_v52, 0.0 }
 0x1fc   : > { %v1451_v58 = vadd.f32 %v5587_v31, %v1386_v51  ;;  %v4307_v7 = vsel %vm699_vm9, 1.0, %v8492_v32  ;;  %v1787_v60 = vsel %vm858_vm0, %v5361_v61, 0.0  ;;  %v1403_v11 = vmul.f32 %v5599_v28, %v1330_v37 }
 0x1fd   : > { %v1780_v43 = vadd.f32 %v1779_v55, %v1778_v44  ;;  %v575_v44 = vadd.s32 296, %v5378_v49  ;;  %v577_v0 = vadd.s32 312, %v5378_v49 }
 0x1fe   : > { %vm1515_vm7 = vcmp.gt.f32.partialorder %v1451_v58, 0.0  ;;  %v1579_v56 = vmul.f32 0.01, %v1451_v58 }
 0x1ff   : > { %v1782_v25 = vadd.f32 %v1781_v5, %v1780_v43  ;;  %v1697_v5 = vmul.f32 %v4307_v7, %v5412_v17 }
 0x200   : > { %v5640_v51 = vsel %vm1515_vm7, %v1451_v58, %v1579_v56  ;;  %v1695_v58 = vmul.f32 %v5648_v15, %v5371_v21  ;;  %v637_v56 = vand.u32 15, %v573_v39  ;;  %v1791_v39 = vsel %vm858_vm0, %v5393_v10, 0.0 }
 0x201   : > { %8513 = vst [vmem:[#allocation44_spill] sm:$0xff] %v5640_v51  ;;  %v1282_v27 = vpop.f32.mrf.mxu0  ;;  %v1784_v16 = vadd.f32 %v1783_v62, %v1782_v25  ;;  %v639_v25 = vand.u32 15, %v575_v44 }
 0x202   : > { %v1333_v55 = vpop.f32.mrf.mxu2  ;;  %v1789_v43 = vsel %vm858_vm0, %v1695_v58, 0.0  ;;  %vm701_vm10 = vcmp.ne.s32.totalorder %v637_v56, 15  ;;  %v1387_v62 = vmul.f32 %v5599_v28, %v1282_v27  ;;  %v579_v58 = vadd.s32 328, %v5378_v49 }
 0x203   : > { %v1786_v34 = vadd.f32 %v1785_v19, %v1784_v16  ;;  %v1468_v19 = vadd.f32 %v5587_v31, %v1403_v11  ;;  %v1793_v16 = vsel %vm858_vm0, %v1697_v5, 0.0  ;;  %v4308_v37 = vsel %vm701_vm10, 1.0, %v8492_v32 }
 0x204   : > { %v1795_v27 = vsel %vm858_vm0, %v5396_v46, 0.0  ;;  %vm703_vm11 = vcmp.ne.s32.totalorder %v639_v25, 15  ;;  %v1699_v11 = vmul.f32 %v4308_v37, %v5414_v23  ;;  %v641_v5 = vand.u32 15, %v577_v0 }
 0x205   : > { %v1788_v52 = vadd.f32 %v1787_v60, %v1786_v34  ;;  %v1452_v34 = vadd.f32 %v5587_v31, %v1387_v62  ;;  %v1404_v60 = vmul.f32 %v5599_v28, %v1333_v55  ;;  %v1596_v17 = vmul.f32 0.01, %v1468_v19 }
 0x206   : > { %v643_v21 = vand.u32 15, %v579_v58  ;;  %vm1532_vm12 = vcmp.gt.f32.partialorder %v1468_v19, 0.0  ;;  %v4309_v20 = vsel %vm703_vm11, 1.0, %v8492_v32  ;;  %v1797_v0 = vsel %vm858_vm0, %v1699_v11, 0.0 }
 0x207   : > { %v1790_v15 = vadd.f32 %v1789_v43, %v1788_v52  ;;  %v1580_v25 = vmul.f32 0.01, %v1452_v34  ;;  %vm1516_vm13 = vcmp.gt.f32.partialorder %v1452_v34, 0.0  ;;  %v1469_v37 = vadd.f32 %v5587_v31, %v1404_v60 }
 0x208   : > { %vm5684_vm15 = vcmp.ne.s32.totalorder %v641_v5, 15  ;;  %vm5692_vm1 = vcmp.ne.s32.totalorder %v643_v21, 15  ;;  %v581_v60 = vadd.s32 344, %v5378_v49 }
 0x209   : > { %v1285_v24 = vpop.f32.mrf.mxu0  ;;  %v1792_v7 = vadd.f32 %v1791_v39, %v1790_v15  ;;  %vm1533_vm3 = vcmp.gt.f32.partialorder %v1469_v37, 0.0 }
 0x20a   : > { %v1336_v56 = vpop.f32.mrf.mxu2  ;;  %v1388_v55 = vmul.f32 %v5599_v28, %v1285_v24 }
 0x20b   : > { %v1405_v44 = vmul.f32 %v5599_v28, %v1336_v56  ;;  %v1794_v43 = vadd.f32 %v1793_v16, %v1792_v7  ;;  %v5688_v7 = vsel %vm1532_vm12, %v1468_v19, %v1596_v17 }
 0x20c   : > { %v1453_v11 = vadd.f32 %v5587_v31, %v1388_v55 }
 0x20d   : > { %v1470_v62 = vadd.f32 %v5587_v31, %v1405_v44  ;;  %v1796_v39 = vadd.f32 %v1795_v27, %v1794_v43  ;;  %v1799_v27 = vsel %vm858_vm0, %v5481_v3, 0.0  ;;  %v5697_v43 = vsel %vm1516_vm13, %v1452_v34, %v1580_v25 }
 0x20e   : > { %v1701_v3 = vmul.f32 %v4309_v20, %v5517_v45  ;;  %v583_v20 = vadd.s32 360, %v5378_v49  ;;  %vm1517_vm4 = vcmp.gt.f32.partialorder %v1453_v11, 0.0  ;;  %v1807_v45 = vsel %vm858_vm0, %v5582_v22, 0.0 }
 0x20f   : > { %vm1534_vm14 = vcmp.gt.f32.partialorder %v1470_v62, 0.0  ;;  %v1598_v56 = vmul.f32 0.01, %v1470_v62  ;;  %v1798_v23 = vadd.f32 %v1797_v0, %v1796_v39  ;;  %v4311_v39 = vsel %vm5692_vm1, 1.0, %v8492_v32 }
 0x210   : > { %v645_v0 = vand.u32 15, %v581_v60  ;;  %v1801_v58 = vsel %vm858_vm0, %v1701_v3, 0.0  ;;  %v647_v60 = vand.u32 15, %v583_v20 }
 0x211   : > { %v1288_v52 = vpop.f32.mrf.mxu0  ;;  %v5700_v5 = vsel %vm1534_vm14, %v1470_v62, %v1598_v56  ;;  %v4310_v62 = vsel %vm5684_vm15, 1.0, %v8492_v32  ;;  %v1800_v56 = vadd.f32 %v1799_v27, %v1798_v23  ;;  %v1803_v23 = vsel %vm858_vm0, %v5486_v6, 0.0 }
 0x212   : > { %v1389_v15 = vmul.f32 %v5599_v28, %v1288_v52  ;;  %v1339_v17 = vpop.f32.mrf.mxu2  ;;  %v1597_v52 = vmul.f32 0.01, %v1469_v37  ;;  %vm709_vm7 = vcmp.ne.s32.totalorder %v645_v0, 15  ;;  %vm711_vm8 = vcmp.ne.s32.totalorder %v647_v60, 15  ;;  %v516_v60 = vld [vmem:[%s8342_s3 + $0x30] sm:$0xff] }
 0x213   : > { %v4312_v20 = vsel %vm709_vm7, 1.0, %v8492_v32 }
 0x214   : > { %v1454_v16 = vadd.f32 %v5587_v31, %v1389_v15  ;;  %v1406_v15 = vmul.f32 %v5599_v28, %v1339_v17  ;;  %v5720_v21 = vsel %vm1533_vm3, %v1469_v37, %v1597_v52  ;;  %v1802_v52 = vadd.f32 %v1801_v58, %v1800_v56 }
 0x216   : > { %vm1518_vm2 = vcmp.gt.f32.partialorder %v1454_v16, 0.0  ;;  %v1582_v44 = vmul.f32 0.01, %v1454_v16  ;;  %v1804_v0 = vadd.f32 %v1803_v23, %v1802_v52  ;;  %v4313_v23 = vsel %vm711_vm8, 1.0, %v8492_v32  ;;  %v517_v52 = vld [vmem:[%s8342_s3 + $0x38] sm:$0xff] }
 0x217   : > { %1873 = vmatpush.msra.mxu1 %v517_v52  ;;  %vm1886_vm8 = vcmask 31744  }
 0x218   : > { %v5702_v19 = vsel %vm1518_vm2, %v1454_v16, %v1582_v44  ;;  %v1471_v16 = vadd.f32 %v5587_v31, %v1406_v15  ;;  %v1581_v44 = vmul.f32 0.01, %v1453_v11  ;;  %v585_v15 = vadd.s32 376, %v5378_v49 }
 0x219   : > { %v1291_v25 = vpop.f32.mrf.mxu0  ;;  %1874 = vmatpush.msra.mxu1 %v516_v60  ;;  %v591_v60 = vadd.s32 424, %v5378_v49 }
 0x21a   : > { %v1390_v55 = vmul.f32 %v5599_v28, %v1291_v25  ;;  %v1599_v34 = vmul.f32 0.01, %v1471_v16  ;;  %v1703_v25 = vmul.f32 %v4310_v62, %v5519_v12  ;;  %vm1535_vm5 = vcmp.gt.f32.partialorder %v1471_v16, 0.0 }
 0x21b   : > { %v5731_v3 = vsel %vm1517_vm4, %v1453_v11, %v1581_v44  ;;  %v1705_v12 = vmul.f32 %v4311_v39, %v5638_v13  ;;  %v649_v56 = vand.u32 15, %v585_v15  ;;  %v587_v11 = vadd.s32 392, %v5378_v49 }
 0x21c   : > { %v1455_v17 = vadd.f32 %v5587_v31, %v1390_v55  ;;  %v5726_v24 = vsel %vm1535_vm5, %v1471_v16, %v1599_v34  ;;  %8519 = vst [vmem:[#allocation46_spill] sm:$0xff] %v5731_v3  ;;  %v1805_v55 = vsel %vm858_vm0, %v1703_v25, 0.0  ;;  %v1707_v39 = vmul.f32 %v4312_v20, %v5640_v51 }
 0x21d   : > { %v1806_v44 = vadd.f32 %v1805_v55, %v1804_v0  ;;  %v1809_v58 = vsel %vm858_vm0, %v1705_v12, 0.0  ;;  %v589_v25 = vadd.s32 408, %v5378_v49  ;;  %v1394_v15 = vmul.f32 %v5599_v28, %v5390_v8  ;;  %v515_v0 = vld [vmem:[%s8342_s3 + $0x28] sm:$0xff] }
 0x21e   : > { %vm1519_vm6 = vcmp.gt.f32.partialorder %v1455_v17, 0.0  ;;  %v1583_v27 = vmul.f32 0.01, %v1455_v17  ;;  %v1811_v12 = vsel %vm858_vm0, %v5592_v14, 0.0  ;;  %vm713_vm9 = vcmp.ne.s32.totalorder %v649_v56, 15  ;;  %1875 = vmatpush.msra.mxu1 %v515_v0  ;;  %v512_v0 = vld [vmem:[%s8342_s3 + $0x10] sm:$0xff] }
 0x21f   : > { %v651_v55 = vand.u32 15, %v587_v11  ;;  %v1813_v20 = vsel %vm858_vm0, %v1707_v39, 0.0  ;;  %v4314_v34 = vsel %vm713_vm9, 1.0, %v8492_v32  ;;  %v514_v11 = vld [vmem:[%s8342_s3 + $0x20] sm:$0xff]  ;;  %vm1890_vm5 = vcmask 1043456  }
 0x220   : > { %v5733_v62 = vsel %vm1519_vm6, %v1455_v17, %v1583_v27  ;;  %v1808_v27 = vadd.f32 %v1807_v45, %v1806_v44  ;;  %v1709_v44 = vmul.f32 %v4313_v23, %v5731_v3  ;;  %1876 = vmatpush.msra.mxu1 %v514_v11 }
 0x221   : > { %8520 = vst [vmem:[#allocation47_spill] sm:$0xff] %v5733_v62  ;;  %v1294_v16 = vpop.f32.mrf.mxu0  ;;  %vm715_vm10 = vcmp.ne.s32.totalorder %v651_v55, 15 }
 0x222   : > { %v1391_v17 = vmul.f32 %v5599_v28, %v1294_v16  ;;  %v1810_v45 = vadd.f32 %v1809_v58, %v1808_v27  ;;  %v1459_v58 = vadd.f32 %v5587_v31, %v1394_v15  ;;  %v1815_v27 = vsel %vm858_vm0, %v5697_v43, 0.0 }
 0x223   : > { %v4315_v55 = vsel %vm715_vm10, 1.0, %v8492_v32 }
 0x224   : > { %v1456_v16 = vadd.f32 %v5587_v31, %v1391_v17  ;;  %v1812_v8 = vadd.f32 %v1811_v12, %v1810_v45  ;;  %v653_v17 = vand.u32 15, %v589_v25  ;;  %v1817_v12 = vsel %vm858_vm0, %v1709_v44, 0.0 }
 0x225   : > { %v1711_v25 = vmul.f32 %v4314_v34, %v5733_v62  ;;  %v1819_v44 = vsel %vm858_vm0, %v5702_v19, 0.0  ;;  %v593_v34 = vadd.s32 440, %v5378_v49  ;;  %vm1523_vm14 = vcmp.gt.f32.partialorder %v1459_v58, 0.0 }
 0x226   : > { %v1814_v39 = vadd.f32 %v1813_v20, %v1812_v8  ;;  %v1584_v23 = vmul.f32 0.01, %v1456_v16  ;;  %vm1520_vm11 = vcmp.gt.f32.partialorder %v1456_v16, 0.0  ;;  %vm5783_vm13 = vcmp.ne.s32.totalorder %v653_v17, 15 }
 0x227   : > { %v1587_v8 = vmul.f32 0.01, %v1459_v58  ;;  %v655_v17 = vand.u32 15, %v591_v60  ;;  %v1821_v62 = vsel %vm858_vm0, %v1711_v25, 0.0 }
 0x228   : > { %v1816_v15 = vadd.f32 %v1815_v27, %v1814_v39  ;;  %v5790_v11 = vsel %vm1520_vm11, %v1456_v16, %v1584_v23  ;;  %v511_v39 = vld [vmem:[%s8342_s3 + $0x8] sm:$0xff]  ;;  %v510_v16 = vld [vmem:[%s8342_s3] sm:$0xff]  ;;  %v4316_v23 = vsel %vm5783_vm13, 1.0, %v8492_v32 }
 0x229   : > { %v1297_v37 = vpop.f32.mrf.mxu0  ;;  %v5808_v60 = vsel %vm1523_vm14, %v1459_v58, %v1587_v8  ;;  %vm719_vm15 = vcmp.ne.s32.totalorder %v655_v17, 15 }
 0x22a   : > { %v1392_v56 = vmul.f32 %v5599_v28, %v1297_v37  ;;  %v513_v37 = vld [vmem:[%s8342_s3 + $0x18] sm:$0xff]  ;;  %v4317_v20 = vsel %vm719_vm15, 1.0, %v8492_v32 }
 0x22b   : > { %1877 = vmatpush.msra.mxu1 %v513_v37 }
 0x22c   : > { %v1457_v52 = vadd.f32 %v5587_v31, %v1392_v56  ;;  %v1818_v56 = vadd.f32 %v1817_v12, %v1816_v15  ;;  %v657_v12 = vand.u32 15, %v593_v34 }
 0x22d   : > { %1878 = vmatpush.msra.mxu1 %v512_v0  ;;  %v1715_v0 = vmul.f32 %v4316_v23, %v5808_v60  ;;  %v599_v23 = vadd.s32 488, %v5378_v49 }
 0x22e   : > { %vm1521_vm12 = vcmp.gt.f32.partialorder %v1457_v52, 0.0  ;;  %v1585_v45 = vmul.f32 0.01, %v1457_v52  ;;  %v1820_v37 = vadd.f32 %v1819_v44, %v1818_v56  ;;  %vm721_vm2 = vcmp.ne.s32.totalorder %v657_v12, 15 }
 0x22f   : > { %1879 = vmatpush.msra.mxu1 %v511_v39  ;;  %v1829_v34 = vsel %vm858_vm0, %v1715_v0, 0.0  ;;  %v1717_v56 = vmul.f32 %v4317_v20, %v5505_v47  ;;  %v4318_v39 = vsel %vm721_vm2, 1.0, %v8492_v32 }
 0x230   : > { %v5792_v27 = vsel %vm1521_vm12, %v1457_v52, %v1585_v45  ;;  %v1823_v52 = vsel %vm858_vm0, %v5790_v11, 0.0  ;;  %v1822_v25 = vadd.f32 %v1821_v62, %v1820_v37  ;;  %v1831_v37 = vsel %vm858_vm0, %v5471_v57, 0.0 }
 0x231   : > { %v1713_v3 = vmul.f32 %v4315_v55, %v5792_v27  ;;  %v1300_v51 = vpop.f32.mrf.mxu0  ;;  %1880 = vmatpush.msra.mxu1 %v510_v16  ;;  %v1833_v12 = vsel %vm858_vm0, %v1717_v56, 0.0 }
 0x232   : > { %v1393_v13 = vmul.f32 %v5599_v28, %v1300_v51  ;;  %v595_v28 = vadd.s32 456, %v5378_v49  ;;  %v1824_v55 = vadd.f32 %v1823_v52, %v1822_v25  ;;  %v1719_v25 = vmul.f32 %v4318_v39, %v5510_v48 }
 0x233   : > { %v1825_v51 = vsel %vm858_vm0, %v1713_v3, 0.0 }
 0x234   : > { %v1458_v15 = vadd.f32 %v5587_v31, %v1393_v13  ;;  %v1826_v8 = vadd.f32 %v1825_v51, %v1824_v55  ;;  %v659_v62 = vand.u32 15, %v595_v28  ;;  %v597_v31 = vadd.s32 472, %v5378_v49 }
 0x235   : > { %v1835_v51 = vsel %vm858_vm0, %v5484_v36, 0.0  ;;  %v663_v55 = vand.u32 15, %v599_v23  ;;  %v1837_v20 = vsel %vm858_vm0, %v1719_v25, 0.0 }
 0x236   : > { %vm1522_vm1 = vcmp.gt.f32.partialorder %v1458_v15, 0.0  ;;  %v1586_v45 = vmul.f32 0.01, %v1458_v15  ;;  %vm723_vm3 = vcmp.ne.s32.totalorder %v659_v62, 15  ;;  %v661_v16 = vand.u32 15, %v597_v31 }
 0x237   : > { %vm727_vm6 = vcmp.ne.s32.totalorder %v663_v55, 15 }
 0x238   : > { %v5815_v58 = vsel %vm1522_vm1, %v1458_v15, %v1586_v45  ;;  %v4319_v15 = vsel %vm723_vm3, 1.0, %v8492_v32  ;;  %vm725_vm4 = vcmp.ne.s32.totalorder %v661_v16, 15  ;;  %v601_v45 = vadd.s32 504, %v5378_v49 }
 0x239   : > { %v1827_v13 = vsel %vm858_vm0, %v5815_v58, 0.0  ;;  %v1957_v3 = vmax.f32 %v5790_v11, %v5815_v58  ;;  %v4320_v62 = vsel %vm725_vm4, 1.0, %v8492_v32  ;;  %v1843_v16 = vsel %vm858_vm0, %v5590_v59, 0.0 }
 0x23a   : > { %v1828_v44 = vadd.f32 %v1827_v13, %v1826_v8  ;;  %v1721_v8 = vmul.f32 %v4319_v15, %v5622_v50  ;;  %v518_v13 = vld [vmem:[%s8343_s4] sm:$0xf]  ;;  %v1723_v39 = vmul.f32 %v4320_v62, %v5627_v9  ;;  %v8550_v58 = vmax.f32 %v5577_v18, %v5590_v59 }
 0x23b   : > { %4388 = vmatpush.msk.msrb.mxu2 %vm1890_vm5, %v518_v13  ;;  %v8558_v59 = vld [vmem:[#allocation33_spill] sm:$0xff] }
 0x23c   : > { %v1830_v17 = vadd.f32 %v1829_v34, %v1828_v44  ;;  %v1839_v44 = vsel %vm858_vm0, %v5577_v18, 0.0  ;;  %v665_v34 = vand.u32 15, %v601_v45  ;;  %v1841_v56 = vsel %vm858_vm0, %v1721_v8, 0.0 }
 0x23e   : > { %v1832_v52 = vadd.f32 %v1831_v37, %v1830_v17  ;;  %v4321_v17 = vsel %vm727_vm6, 1.0, %v8492_v32  ;;  %vm729_vm7 = vcmp.ne.s32.totalorder %v665_v34, 15 }
 0x23f   : > { %v4322_v25 = vsel %vm729_vm7, 1.0, %v8492_v32 }
 0x240   : > { %v1834_v28 = vadd.f32 %v1833_v12, %v1832_v52  ;;  %v1845_v52 = vsel %vm858_vm0, %v1723_v39, 0.0  ;;  %v1725_v12 = vmul.f32 %v4321_v17, %v5720_v21  ;;  %v1727_v45 = vmul.f32 %v4322_v25, %v5726_v24 }
 0x242   : > { %v1836_v0 = vadd.f32 %v1835_v51, %v1834_v28  ;;  %v1847_v28 = vsel %vm858_vm0, %v5688_v7, 0.0  ;;  %v1849_v55 = vsel %vm858_vm0, %v1725_v12, 0.0  ;;  %v1853_v62 = vsel %vm858_vm0, %v1727_v45, 0.0 }
 0x244   : > { %v1838_v31 = vadd.f32 %v1837_v20, %v1836_v0  ;;  %v1851_v20 = vsel %vm858_vm0, %v5700_v5, 0.0 }
 0x246   : > { %v1840_v49 = vadd.f32 %v1839_v44, %v1838_v31 }
 0x248   : > { %v1842_v37 = vadd.f32 %v1841_v56, %v1840_v49 }
 0x24a   : > { %v1844_v23 = vadd.f32 %v1843_v16, %v1842_v37 }
 0x24c   : > { %v1846_v15 = vadd.f32 %v1845_v52, %v1844_v23 }
 0x24e   : > { %v1848_v51 = vadd.f32 %v1847_v28, %v1846_v15 }
 0x250   : > { %v1850_v0 = vadd.f32 %v1849_v55, %v1848_v51 }
 0x252   : > { %v1852_v8 = vadd.f32 %v1851_v20, %v1850_v0 }
 0x254   : > { %v1854_v31 = vadd.f32 %v1853_v62, %v1852_v8 }
 0x256   : > { %v1855_v13 = vrot.slane %v1854_v31, 4 }
 0x258   : > { %v1856_v44 = vadd.f32 %v1855_v13, %v1854_v31  ;;  %v8523_v13 = vmax.f32 %v5136_v40, %v5139_v42  ;;  %v8527_v40 = vmax.f32 %v5250_v38, %v5253_v41  ;;  %v8533_v41 = vmax.f32 %v5358_v53, %v5361_v61 }
 0x259   : > { %v8538_v61 = vmax.f32 %v5582_v22, %v5592_v14  ;;  %v8543_v14 = vld [vmem:[#allocation7_spill] sm:$0xff] }
 0x25a   : > { %v1857_v32 = vrot.slane %v1856_v44, 2 }
 0x25c   : > { %v1858_v34 = vadd.f32 %v1857_v32, %v1856_v44  ;;  %v8524_v32 = vmax.f32 %v5164_v2, %v5167_v4  ;;  %v8528_v2 = vmax.f32 %v5286_v26, %v5289_v29  ;;  %v8534_v29 = vmax.f32 %v5393_v10, %v5396_v46 }
 0x25d   : > { %v8539_v46 = vmax.f32 %v5697_v43, %v5702_v19  ;;  %v8546_v19 = vmax.f32 %v5471_v57, %v5484_v36  ;;  %v8554_v36 = vmax.f32 %v5688_v7, %v5700_v5  ;;  %v8563_v5 = vld [vmem:[#allocation19_spill] sm:$0xff] }
 0x25e   : > { %v1859_v49 = vrot.slane %v1858_v34, 1 }
 0x260   : > { %v1860_v56 = vadd.f32 %v1859_v49, %v1858_v34  ;;  %v8525_v49 = vmax.f32 %v5192_v30, %v5195_v33  ;;  %v8529_v30 = vld [vmem:[#allocation17_spill] sm:$0xff] }
 0x261   : > { %v8530_v33 = vmax.f32 %v5299_v54, %v8529_v30  ;;  %v8564_v30 = vld [vmem:[#allocation20_spill] sm:$0xff] }
 0x262   : > { %v1861_v39 = vmul.f32 0.0020833334, %v1860_v56 }
 0x264   : > { %4387 = vmatmul.msk.f32.vlgmr.msra.gmra.mxu1 %vm858_vm0, %v1861_v39  ;;  %v8526_v39 = vmax.f32 %v5220_v63, %v5223_v1  ;;  %v8531_v1 = vld [vmem:[#allocation18_spill] sm:$0xff] }
 0x2e1   : > { %v1882_v17 = vpop.f32.mrf.mxu1 }
 0x2e2   : > { %v1885_v37 = vmax.f32 %v1882_v17, 0.0 }
 0x2e4   : > { %4389 = vmatmul.msk.f32.vlgmr.msrb.gmra.mxu2 %vm1886_vm8, %v1885_v37  ;;  %v8532_v37 = vmax.f32 %v8531_v1, %v5325_v35  ;;  %v8535_v35 = vld [vmem:[#allocation32_spill] sm:$0xff] }
 0x367   : > { %v1911_v16 = vpop.f32.mrf.mxu2 }
 0x368   : > { %v4390_v23 = vmul.f32 -1.442695, %v1911_v16  ;;  %v8536_v16 = vmax.f32 %v8535_v35, %v5486_v6  ;;  %v8540_v6 = vld [vmem:[#allocation21_spill] sm:$0xff]  ;;  %v8570_v35 = vld [vmem:[#allocation27_spill] sm:$0xff] }
 0x36a   : > { %4782 = vpow2.f32 %v4390_v23 }
 0x370   : > { %v4783_v52 = vpop.eup %4782 }
 0x371   : > { %v1917_v12 = vadd.f32 1.0, %v4783_v52  ;;  %v8537_v52 = vld [vmem:[#allocation30_spill] sm:$0xff] }
 0x373   : > { %4784 = vrcp.f32 %v1917_v12  ;;  %v1929_v51 = vand.u32 2147483648, %v1917_v12  ;;  %v1927_v45 = vand.u32 2147483647, %v1917_v12  ;;  %vm1923_vm10 = vweird.f32 %v1917_v12 }
 0x375   : > { %v1930_v20 = vor.u32 1.1754944e-38, %v1929_v51  ;;  %vm1928_vm12 = vcmp.eq.f32.partialorder %v1927_v45, 8.507059e+37  ;;  %v8544_v51 = vld [vmem:[#allocation8_spill] sm:$0xff] }
 0x379   : > { %v4785_v25 = vpop.eup %4784 }
 0x37a   : > { %v1919_v15 = vmul.f32 %v4785_v25, %v1917_v12  ;;  %vm1924_vm9 = vweird.f32 %v4785_v25 }
 0x37b   : > { %vm1925_vm11 = vmor %vm1923_vm10, %vm1924_vm9 }
 0x37c   : > { %v1920_v28 = vsub.f32 1.0, %v1919_v15 }
 0x37e   : > { %v1921_v55 = vmul.f32 %v4785_v25, %v1920_v28 }
 0x380   : > { %v1922_v0 = vadd.f32 %v4785_v25, %v1921_v55  ;;  %v8545_v55 = vmax.f32 %v8543_v14, %v8544_v51  ;;  %v8578_v14 = vld [vmem:[#allocation29_spill] sm:$0xff] }
 0x382   : > { %v1926_v8 = vsel %vm1925_vm11, %v4785_v25, %v1922_v0  ;;  %v8541_v25 = vld [vmem:[#allocation22_spill] sm:$0xff]  ;;  %v8547_v0 = vld [vmem:[#allocation9_spill] sm:$0xff] }
 0x383   : > { %v1931_v62 = vsel %vm1928_vm12, %v1930_v20, %v1926_v8  ;;  %v8542_v15 = vmax.f32 %v8540_v6, %v8541_v25  ;;  %v8548_v20 = vld [vmem:[#allocation10_spill] sm:$0xff]  ;;  %v1958_v6 = vmax.f32 %v5792_v27, %v5808_v60  ;;  %v8575_v25 = vld [vmem:[#allocation43_spill] sm:$0xff]  ;;  %v8583_v60 = vld [vmem:[#allocation36_spill] sm:$0xff] }
 0x384   : > { %v5858_v31 = vperm.slane %v1931_v62, 0  ;;  %v8549_v8 = vmax.f32 %v8547_v0, %v8548_v20  ;;  %v8551_v62 = vld [vmem:[#allocation11_spill] sm:$0xff] }
 0x385   : > { %v8582_v0 = vld [vmem:[#allocation31_spill] sm:$0xff] }
 0x386   : > { %v1966_v44 = vmul.f32 %v5858_v31, %v8523_v13  ;;  %v1968_v34 = vmul.f32 %v5858_v31, %v8524_v32  ;;  %v1970_v56 = vmul.f32 %v5858_v31, %v8525_v49  ;;  %v1972_v17 = vmul.f32 %v5858_v31, %v8526_v39  ;;  %v8552_v13 = vld [vmem:[#allocation12_spill] sm:$0xff]  ;;  %v8556_v49 = vld [vmem:[#allocation14_spill] sm:$0xff] }
 0x387   : > { %v1974_v42 = vmul.f32 %v5858_v31, %v8527_v40  ;;  %v1976_v4 = vmul.f32 %v5858_v31, %v8528_v2  ;;  %v1977_v63 = vmul.f32 %v5858_v31, %v8530_v33  ;;  %v1978_v38 = vmul.f32 %v5858_v31, %v8532_v37  ;;  %v8560_v40 = vld [vmem:[#allocation16_spill] sm:$0xff] }
 0x388   : > { %2030 = vst.msk [vmem:[#allocation2 + $0x28] sm:$0xff] %vm858_vm0, %v1966_v44  ;;  %v1980_v26 = vmul.f32 %v5858_v31, %v8533_v41  ;;  %v1982_v54 = vmul.f32 %v5858_v31, %v8534_v29  ;;  %v1984_v23 = vmul.f32 %v5858_v31, %v8536_v16  ;;  %v1986_v12 = vmul.f32 %v5858_v31, %v8538_v61  ;;  %v8566_v37 = vld [vmem:[#allocation24_spill] sm:$0xff]  ;;  %v8567_v41 = vld [vmem:[#allocation25_spill] sm:$0xff] }
 0x389   : > { %2032 = vst.msk [vmem:[#allocation2 + $0x38] sm:$0xff] %vm858_vm0, %v1968_v34  ;;  %v2009_v53 = vmul.f32 %v8537_v52, %v1977_v63  ;;  %v1988_v10 = vmul.f32 %v5858_v31, %v8539_v46  ;;  %v1981_v28 = vmul.f32 %v5858_v31, %v8542_v15  ;;  %v1990_v22 = vmul.f32 %v5858_v31, %v1957_v3  ;;  %v8555_v34 = vld [vmem:[#allocation13_spill] sm:$0xff]  ;;  %v8574_v46 = vld [vmem:[#allocation28_spill] sm:$0xff] }
 0x38a   : > { %2034 = vst.msk [vmem:[#allocation2 + $0x48] sm:$0xff] %vm858_vm0, %v1970_v56  ;;  %v1967_v43 = vmul.f32 %v5858_v31, %v8545_v55  ;;  %v1992_v45 = vmul.f32 %v5858_v31, %v8546_v19  ;;  %v1969_v11 = vmul.f32 %v5858_v31, %v8549_v8  ;;  %v1994_v3 = vmul.f32 %v5858_v31, %v8550_v58  ;;  %v8576_v15 = vld [vmem:[#allocation44_spill] sm:$0xff]  ;;  %v8579_v55 = vld [vmem:[#allocation46_spill] sm:$0xff] }
 0x38b   : > { %2036 = vst.msk [vmem:[#allocation2 + $0x58] sm:$0xff] %vm858_vm0, %v1972_v17  ;;  %v8553_v44 = vmax.f32 %v8551_v62, %v8552_v13  ;;  %v1996_v32 = vmul.f32 %v5858_v31, %v8554_v36  ;;  %v8557_v56 = vmax.f32 %v8555_v34, %v8556_v49  ;;  %v2013_v39 = vmul.f32 %v8558_v59, %v1981_v28  ;;  %v8559_v17 = vld [vmem:[#allocation15_spill] sm:$0xff] }
 0x38c   : > { %2038 = vst.msk [vmem:[#allocation2 + $0x68] sm:$0xff] %vm858_vm0, %v1974_v42  ;;  %v8561_v42 = vmax.f32 %v8559_v17, %v8560_v40  ;;  %v8565_v33 = vmax.f32 %v8563_v5, %v8564_v30  ;;  %v8577_v28 = vmax.f32 %v8575_v25, %v8576_v15  ;;  %v1991_v27 = vmul.f32 %v5858_v31, %v1958_v6  ;;  %v2097_v5 = vld [vmem:[#allocation2 + $0x20] sm:$0xff] }
 0x38d   : > { %2040 = vst.msk [vmem:[#allocation2 + $0x78] sm:$0xff] %vm858_vm0, %v1976_v4  ;;  %v1971_v57 = vmul.f32 %v5858_v31, %v8553_v44  ;;  %v1973_v18 = vmul.f32 %v5858_v31, %v8557_v56  ;;  %v8562_v4 = vld [vmem:[#allocation23_spill] sm:$0xff]  ;;  %v8586_v13 = vmax.f32 %v5622_v50, %v5627_v9  ;;  %v8588_v34 = vmax.f32 %v5720_v21, %v5726_v24  ;;  %v8591_v9 = vld [vmem:[#allocation41_spill] sm:$0xff]  ;;  %v8592_v21 = vld [vmem:[#allocation42_spill] sm:$0xff] }
 0x38e   : > { %2042 = vst.msk [vmem:[#allocation2 + $0x88] sm:$0xff] %vm858_vm0, %v1978_v38  ;;  %v1975_v2 = vmul.f32 %v5858_v31, %v8561_v42  ;;  %v1999_v7 = vmul.f32 %v8562_v4, %v1967_v43  ;;  %v1979_v63 = vmul.f32 %v5858_v31, %v8565_v33  ;;  %v2001_v38 = vmul.f32 %v8566_v37, %v1969_v11  ;;  %v8580_v43 = vld [vmem:[#allocation47_spill] sm:$0xff] }
 0x38f   : > { %2044 = vst.msk [vmem:[#allocation2 + $0x98] sm:$0xff] %vm858_vm0, %v1980_v26  ;;  %v8568_v26 = vld [vmem:[#allocation26_spill] sm:$0xff]  ;;  %v2003_v16 = vmul.f32 %v8570_v35, %v1971_v57  ;;  %v8581_v19 = vmax.f32 %v8579_v55, %v8580_v43  ;;  %v8584_v11 = vmax.f32 %v5505_v47, %v5510_v48  ;;  %v1995_v44 = vmul.f32 %v5858_v31, %v8586_v13  ;;  %v8589_v48 = vld [vmem:[#allocation39_spill] sm:$0xff] }
 0x390   : > { %2041 = vst.msk [vmem:[#allocation2 + $0x80] sm:$0xff] %vm858_vm0, %v2009_v53  ;;  %v8569_v29 = vmax.f32 %v8567_v41, %v8568_v26  ;;  %v8572_v53 = vld [vmem:[#allocation35_spill] sm:$0xff]  ;;  %v2007_v51 = vmul.f32 %v8578_v14, %v1975_v2  ;;  %v2011_v20 = vmul.f32 %v8582_v0, %v1979_v63  ;;  %v8587_v57 = vld [vmem:[#allocation38_spill] sm:$0xff]  ;;  %v1997_v47 = vmul.f32 %v5858_v31, %v8588_v34 }
 0x391   : > { %2046 = vst.msk [vmem:[#allocation2 + $0xa8] sm:$0xff] %vm858_vm0, %v1982_v54  ;;  %v1993_v58 = vmul.f32 %v5858_v31, %v8584_v11  ;;  %v2027_v24 = vmul.f32 %v8592_v21, %v1995_v44  ;;  %v2094_v2 = vld [vmem:[#allocation2 + $0x8] sm:$0xff]  ;;  %v2095_v26 = vld [vmem:[#allocation2 + $0x10] sm:$0xff] }
 0x392   : > { %2048 = vst.msk [vmem:[#allocation2 + $0xb8] sm:$0xff] %vm858_vm0, %v1984_v23  ;;  %v1983_v54 = vmul.f32 %v5858_v31, %v8569_v29  ;;  %v8571_v23 = vld [vmem:[#allocation34_spill] sm:$0xff] }
 0x393   : > { %2050 = vst.msk [vmem:[#allocation2 + $0xc8] sm:$0xff] %vm858_vm0, %v1986_v12  ;;  %v8573_v61 = vmax.f32 %v8571_v23, %v8572_v53  ;;  %v2025_v17 = vmul.f32 %v8591_v9, %v1993_v58  ;;  %v2098_v63 = vld [vmem:[#allocation2 + $0x28] sm:$0xff]  ;;  %v412_v21 = vld [vmem:[%s8344_s5 + $0xb0] sm:$0xff] }
 0x394   : > { %2052 = vst.msk [vmem:[#allocation2 + $0xd8] sm:$0xff] %vm858_vm0, %v1988_v10  ;;  %v2005_v10 = vmul.f32 %v8574_v46, %v1973_v18  ;;  %v2015_v8 = vmul.f32 %v8583_v60, %v1983_v54  ;;  %v8590_v18 = vld [vmem:[#allocation40_spill] sm:$0xff]  ;;  %v488_v14 = vld [vmem:[%s8344_s5 + $0x310] sm:$0xff] }
 0x395   : > { %2054 = vst.msk [vmem:[#allocation2 + $0xe8] sm:$0xff] %vm858_vm0, %v1990_v22  ;;  %v1985_v12 = vmul.f32 %v5858_v31, %v8573_v61  ;;  %v1987_v22 = vmul.f32 %v5858_v31, %v8577_v28  ;;  %v2110_v56 = vld [vmem:[#allocation2 + $0x88] sm:$0xff]  ;;  %v2100_v61 = vld [vmem:[#allocation2 + $0x38] sm:$0xff] }
 0x396   : > { %2056 = vst.msk [vmem:[#allocation2 + $0xf8] sm:$0xff] %vm858_vm0, %v1992_v45  ;;  %v1989_v45 = vmul.f32 %v5858_v31, %v8581_v19  ;;  %v8593_v31 = vld [vmem:[#allocation45_spill] sm:$0xff]  ;;  %v2112_v29 = vld [vmem:[#allocation2 + $0x98] sm:$0xff] }
 0x397   : > { %v2109_v1 = vld [vmem:[#allocation2 + $0x80] sm:$0xff]  ;;  %2058 = vst.msk [vmem:[#allocation2 + $0x108] sm:$0xff] %vm858_vm0, %v1994_v3  ;;  %v2019_v36 = vmul.f32 %v8587_v57, %v1987_v22  ;;  %v2029_v42 = vmul.f32 %v8593_v31, %v1997_v47  ;;  %v4513_v23 = vpack.i.bf16 %v2095_v26, %v2112_v29 }
 0x398   : > { %2244 = vrot.lane.b32.xlu0 %v2109_v1, %s4924_s26  ;;  %2060 = vst.msk [vmem:[#allocation2 + $0x118] sm:$0xff] %vm858_vm0, %v1996_v32  ;;  %v8585_v3 = vld [vmem:[#allocation37_spill] sm:$0xff]  ;;  %v2096_v32 = vld [vmem:[#allocation2 + $0x18] sm:$0xff]  ;;  %v2021_v49 = vmul.f32 %v8589_v48, %v1989_v45 }
 0x399   : > { %2045 = vst.msk [vmem:[#allocation2 + $0xa0] sm:$0xff] %vm858_vm0, %v2013_v39  ;;  %v2017_v62 = vmul.f32 %v8585_v3, %v1985_v12  ;;  %v2023_v39 = vmul.f32 %v8590_v18, %v1991_v27  ;;  %v2114_v30 = vld [vmem:[#allocation2 + $0xa8] sm:$0xff]  ;;  %v2116_v15 = vld [vmem:[#allocation2 + $0xb8] sm:$0xff] }
 0x39a   : > { %2031 = vst.msk [vmem:[#allocation2 + $0x30] sm:$0xff] %vm858_vm0, %v1999_v7  ;;  %v4523_v41 = vpack.i.bf16 %v2097_v5, %v2114_v30  ;;  %v2118_v53 = vld [vmem:[#allocation2 + $0xc8] sm:$0xff] }
 0x39b   : > { %2033 = vst.msk [vmem:[#allocation2 + $0x40] sm:$0xff] %vm858_vm0, %v2001_v38  ;;  %v2120_v55 = vld [vmem:[#allocation2 + $0xd8] sm:$0xff]  ;;  %v2102_v27 = vld [vmem:[#allocation2 + $0x48] sm:$0xff] }
 0x39c   : > { %2035 = vst.msk [vmem:[#allocation2 + $0x50] sm:$0xff] %vm858_vm0, %v2003_v16  ;;  %v2122_v47 = vld [vmem:[#allocation2 + $0xe8] sm:$0xff] }
 0x39d   : > { %2037 = vst.msk [vmem:[#allocation2 + $0x60] sm:$0xff] %vm858_vm0, %v2005_v10  ;;  %v2124_v58 = vld [vmem:[#allocation2 + $0xf8] sm:$0xff] }
 0x39e   : > { %2039 = vst.msk [vmem:[#allocation2 + $0x70] sm:$0xff] %vm858_vm0, %v2007_v51  ;;  %v2104_v51 = vld [vmem:[#allocation2 + $0x58] sm:$0xff] }
 0x39f   : > { %2043 = vst.msk [vmem:[#allocation2 + $0x90] sm:$0xff] %vm858_vm0, %v2011_v20 }
 0x3a0   : > { %v2113_v50 = vld [vmem:[#allocation2 + $0xa0] sm:$0xff]  ;;  %2047 = vst.msk [vmem:[#allocation2 + $0xb0] sm:$0xff] %vm858_vm0, %v2015_v8  ;;  %2246 = vrot.lane.b32.xlu0 %v2110_v56, %s4924_s26 }
 0x3a1   : > { %v4518_v40 = vpack.i.bf16 %v2096_v32, %v2113_v50  ;;  %2049 = vst.msk [vmem:[#allocation2 + $0xc0] sm:$0xff] %vm858_vm0, %v2017_v62  ;;  %v2099_v6 = vld [vmem:[#allocation2 + $0x30] sm:$0xff]  ;;  %v2106_v62 = vld [vmem:[#allocation2 + $0x68] sm:$0xff]  ;;  %v6052_v32 = vld [vmem:[#allocation2 + $0x19] sm:$0xff] }
 0x3a2   : > { %2051 = vst.msk [vmem:[#allocation2 + $0xd0] sm:$0xff] %vm858_vm0, %v2019_v36  ;;  %v2101_v54 = vld [vmem:[#allocation2 + $0x40] sm:$0xff]  ;;  %v4533_v22 = vpack.i.bf16 %v2099_v6, %v2116_v15 }
 0x3a3   : > { %4519 = vrot.lane.b32.xlu2 %v4518_v40, %s4924_s26  ;;  %2053 = vst.msk [vmem:[#allocation2 + $0xe0] sm:$0xff] %vm858_vm0, %v2021_v49  ;;  %v4543_v12 = vpack.i.bf16 %v2101_v54, %v2118_v53  ;;  %v2103_v28 = vld [vmem:[#allocation2 + $0x50] sm:$0xff]  ;;  %v6050_v36 = vld [vmem:[#allocation2 + $0x1f] sm:$0xff] }
 0x3a4   : > { %2055 = vst.msk [vmem:[#allocation2 + $0xf0] sm:$0xff] %vm858_vm0, %v2023_v39  ;;  %v4553_v19 = vpack.i.bf16 %v2103_v28, %v2120_v55  ;;  %v2105_v34 = vld [vmem:[#allocation2 + $0x60] sm:$0xff]  ;;  %v4583_v49 = vpack.i.bf16 %v6052_v32, %v6050_v36  ;;  %v6056_v39 = vld [vmem:[#allocation2 + $0x17] sm:$0xff] }
 0x3a5   : > { %2057 = vst.msk [vmem:[#allocation2 + $0x100] sm:$0xff] %vm858_vm0, %v2025_v17  ;;  %v2107_v20 = vld [vmem:[#allocation2 + $0x70] sm:$0xff]  ;;  %v4563_v56 = vpack.i.bf16 %v2105_v34, %v2122_v47  ;;  %v6087_v26 = vld [vmem:[#allocation2 + $0x41] sm:$0xff]  ;;  %v6117_v28 = vld [vmem:[#allocation2 + $0x59] sm:$0xff] }
 0x3a6   : > { %2059 = vst.msk [vmem:[#allocation2 + $0x110] sm:$0xff] %vm858_vm0, %v2027_v24  ;;  %v2111_v7 = vld [vmem:[#allocation2 + $0x90] sm:$0xff]  ;;  %v4573_v13 = vpack.i.bf16 %v2107_v20, %v2124_v58  ;;  %v2108_v24 = vld [vmem:[#allocation2 + $0x78] sm:$0xff]  ;;  %v6111_v6 = vld [vmem:[#allocation2 + $0x67] sm:$0xff] }
 0x3a7   : > { %2061 = vst.msk [vmem:[#allocation2 + $0x120] sm:$0xff] %vm858_vm0, %v2029_v42  ;;  %v4508_v33 = vpack.i.bf16 %v2094_v2, %v2111_v7  ;;  %v2115_v1 = vld [vmem:[#allocation2 + $0xb0] sm:$0xff]  ;;  %v6115_v15 = vld [vmem:[#allocation2 + $0x5f] sm:$0xff]  ;;  %v399_v58 = vld [vmem:[%s8344_s5 + $0x48] sm:$0xff] }
 0x3a8   : > { %v4528_v38 = vpack.i.bf16 %v2098_v63, %v2115_v1  ;;  %v2117_v16 = vld [vmem:[#allocation2 + $0xc0] sm:$0xff]  ;;  %v6062_v17 = vld [vmem:[#allocation2 + $0x37] sm:$0xff]  ;;  %v6066_v42 = vld [vmem:[#allocation2 + $0x2f] sm:$0xff]  ;;  %v4623_v55 = vpack.i.bf16 %v6117_v28, %v6115_v15 }
 0x3a9   : > { %4509 = vrot.lane.b32.xlu1 %v4508_v33, %s4924_s26  ;;  %v4538_v10 = vpack.i.bf16 %v2100_v61, %v2117_v16  ;;  %v2119_v45 = vld [vmem:[#allocation2 + $0xd0] sm:$0xff]  ;;  %v6077_v33 = vld [vmem:[#allocation2 + $0x27] sm:$0xff] }
 0x3aa   : > { %4529 = vrot.lane.b32.xlu0 %v4528_v38, %s4924_s26  ;;  %v2121_v25 = vld [vmem:[#allocation2 + $0xe0] sm:$0xff]  ;;  %v4548_v11 = vpack.i.bf16 %v2102_v27, %v2119_v45  ;;  %v6064_v40 = vld [vmem:[#allocation2 + $0x31] sm:$0xff]  ;;  %v6068_v2 = vld [vmem:[#allocation2 + $0x29] sm:$0xff] }
 0x3ab   : > { %4524 = vrot.lane.b32.xlu2 %v4523_v41, %s4924_s26  ;;  %v4558_v43 = vpack.i.bf16 %v2104_v51, %v2121_v25  ;;  %v2123_v8 = vld [vmem:[#allocation2 + $0xf0] sm:$0xff]  ;;  %v4598_v5 = vpack.i.bf16 %v6064_v40, %v6062_v17  ;;  %v4593_v30 = vpack.i.bf16 %v6068_v2, %v6066_v42  ;;  %v6079_v63 = vld [vmem:[#allocation2 + $0x21] sm:$0xff] }
 0x3ac   : > { %v4568_v44 = vpack.i.bf16 %v2106_v62, %v2123_v8  ;;  %v2125_v50 = vld [vmem:[#allocation2 + $0x100] sm:$0xff]  ;;  %v6081_v1 = vld [vmem:[#allocation2 + $0x4f] sm:$0xff]  ;;  %v4588_v29 = vpack.i.bf16 %v6079_v63, %v6077_v33  ;;  %v6137_v20 = vld [vmem:[#allocation2 + $0x57] sm:$0xff] }
 0x3ad   : > { %v4578_v7 = vpack.i.bf16 %v2108_v24, %v2125_v50  ;;  %v6083_v38 = vld [vmem:[#allocation2 + $0x49] sm:$0xff]  ;;  %v6113_v25 = vld [vmem:[#allocation2 + $0x61] sm:$0xff]  ;;  %v6139_v27 = vld [vmem:[#allocation2 + $0x51] sm:$0xff] }
 0x3ae   : > { %v6085_v41 = vld [vmem:[#allocation2 + $0x47] sm:$0xff]  ;;  %v4613_v54 = vpack.i.bf16 %v6083_v38, %v6081_v1  ;;  %v404_v53 = vld [vmem:[%s8344_s5 + $0x70] sm:$0xff]  ;;  %v4628_v51 = vpack.i.bf16 %v6113_v25, %v6111_v6  ;;  %v6141_v8 = vld [vmem:[#allocation2 + $0x7f] sm:$0xff] }
 0x3af   : > { %v4608_v16 = vpack.i.bf16 %v6087_v26, %v6085_v41  ;;  %v403_v61 = vld [vmem:[%s8344_s5 + $0x68] sm:$0xff]  ;;  %v400_v45 = vld [vmem:[%s8344_s5 + $0x50] sm:$0xff]  ;;  %v421_v50 = vld [vmem:[%s8344_s5 + $0xf8] sm:$0xff] }
 0x3b0   : > { %v6148_v62 = vld [vmem:[#allocation2 + $0x77] sm:$0xff]  ;;  %2921 = vmatpush.msra.mxu2 %v421_v50  ;;  %v2146_v50 = vld [vmem:[#allocation2 + $0xa9] sm:$0xff] }
 0x3b1   : > { %4514 = vrot.lane.b32.xlu1 %v4513_v23, %s4924_s26  ;;  %v405_v23 = vld [vmem:[%s8344_s5 + $0x78] sm:$0xff]  ;;  %v2154_v59 = vld [vmem:[#allocation2 + $0xe9] sm:$0xff] }
 0x3b2   : > { %4544 = vrot.lane.b32.xlu0 %v4543_v12, %s4924_s26  ;;  %4451 = vmatpush.msra.mxu3 %v405_v23  ;;  %v6107_v12 = vld [vmem:[#allocation2 + $0x3f] sm:$0xff]  ;;  %v6318_v9 = vld [vmem:[#allocation2 + $0xd7] sm:$0xff] }
 0x3b3   : > { %4539 = vrot.lane.b32.xlu2 %v4538_v10, %s4924_s26  ;;  %2808 = vmatpush.msrb.mxu1 %v405_v23  ;;  %v6109_v10 = vld [vmem:[#allocation2 + $0x39] sm:$0xff]  ;;  %v395_v23 = vld [vmem:[%s8344_s5 + $0x28] sm:$0xff]  ;;  %v2151_v18 = vld [vmem:[#allocation2 + $0xd1] sm:$0xff] }
 0x3b4   : > { %4452 = vmatpush.msra.mxu3 %v404_v53  ;;  %v501_v24 = vld [vmem:[%s8344_s5 + $0x378] sm:$0xff]  ;;  %v4698_v3 = vpack.i.bf16 %v2151_v18, %v6318_v9 }
 0x3b5   : > { %2809 = vmatpush.msrb.mxu1 %v404_v53  ;;  %3486 = vmatpush.msrb.mxu0 %v501_v24  ;;  %v6188_v53 = vld [vmem:[#allocation2 + $0x8f] sm:$0xff] }
 0x3b6   : > { %4453 = vmatpush.msra.mxu3 %v403_v61  ;;  %v391_v24 = vld [vmem:[%s8344_s5 + $0x8] sm:$0xff] }
 0x3b7   : > { %2810 = vmatpush.msrb.mxu1 %v403_v61  ;;  %v6190_v61 = vld [vmem:[#allocation2 + $0x89] sm:$0xff] }
 0x3b8   : > { %8597 = vst [vmem:[#allocation21_spill] sm:$0xff] %v6190_v61 }
 0x3b9   : > { %4534 = vrot.lane.b32.xlu1 %v4533_v22, %s4924_s26  ;;  %v4603_v22 = vpack.i.bf16 %v6109_v10, %v6107_v12 }
 0x3ba   : > { %4559 = vrot.lane.b32.xlu0 %v4558_v43, %s4924_s26  ;;  %v402_v43 = vld [vmem:[%s8344_s5 + $0x60] sm:$0xff] }
 0x3bb   : > { %4554 = vrot.lane.b32.xlu2 %v4553_v19, %s4924_s26  ;;  %v401_v19 = vld [vmem:[%s8344_s5 + $0x58] sm:$0xff]  ;;  %4454 = vmatpush.msra.mxu3 %v402_v43 }
 0x3bc   : > { %2811 = vmatpush.msrb.mxu1 %v402_v43  ;;  %v394_v43 = vld [vmem:[%s8344_s5 + $0x20] sm:$0xff] }
 0x3bd   : > { %4455 = vmatpush.msra.mxu3 %v401_v19 }
 0x3be   : > { %2812 = vmatpush.msrb.mxu1 %v401_v19  ;;  %v419_v19 = vld [vmem:[%s8344_s5 + $0xe8] sm:$0xff] }
 0x3bf   : > { %4456 = vmatpush.msra.mxu3 %v400_v45 }
 0x3c0   : > { %2813 = vmatpush.msrb.mxu1 %v400_v45  ;;  %v393_v45 = vld [vmem:[%s8344_s5 + $0x18] sm:$0xff] }
 0x3c1   : > { %4549 = vrot.lane.b32.xlu1 %v4548_v11, %s4924_s26  ;;  %v6143_v11 = vld [vmem:[#allocation2 + $0x79] sm:$0xff]  ;;  %4457 = vmatpush.msra.mxu3 %v399_v58 }
 0x3c2   : > { %4574 = vrot.lane.b32.xlu0 %v4573_v13, %s4924_s26  ;;  %8594 = vst [vmem:[#allocation17_spill] sm:$0xff] %v6143_v11  ;;  %v6150_v13 = vld [vmem:[#allocation2 + $0x71] sm:$0xff]  ;;  %v4643_v34 = vpack.i.bf16 %v6143_v11, %v6141_v8  ;;  %2814 = vmatpush.msrb.mxu1 %v399_v58  ;;  %v418_v58 = vld [vmem:[%s8344_s5 + $0xe0] sm:$0xff]  ;;  %v2172_v11 = vld [vmem:[#allocation2 + $0x128] sm:$0xff] }
 0x3c3   : > { %4569 = vrot.lane.b32.xlu2 %v4568_v44, %s4924_s26  ;;  %8595 = vst [vmem:[#allocation18_spill] sm:$0xff] %v6150_v13  ;;  %v4618_v44 = vpack.i.bf16 %v6139_v27, %v6137_v20  ;;  %v4638_v47 = vpack.i.bf16 %v6150_v13, %v6148_v62 }
 0x3c9   : > { %4564 = vrot.lane.b32.xlu1 %v4563_v56, %s4924_s26  ;;  %v397_v56 = vld [vmem:[%s8344_s5 + $0x38] sm:$0xff] }
 0x3ca   : > { %4584 = vrot.lane.b32.xlu0 %v4583_v49, %s4924_s26  ;;  %v398_v49 = vld [vmem:[%s8344_s5 + $0x40] sm:$0xff] }
 0x3cb   : > { %2342 = vrot.lane.b32.xlu2 %v6056_v39, %s4924_s26  ;;  %4458 = vmatpush.msra.mxu3 %v398_v49 }
 0x3cc   : > { %2815 = vmatpush.msrb.mxu1 %v398_v49  ;;  %v417_v49 = vld [vmem:[%s8344_s5 + $0xd8] sm:$0xff] }
 0x3cd   : > { %4459 = vmatpush.msra.mxu3 %v397_v56 }
 0x3ce   : > { %2816 = vmatpush.msrb.mxu1 %v397_v56  ;;  %v6222_v56 = vld [vmem:[#allocation2 + $0xaf] sm:$0xff] }
 0x3d1   : > { %4579 = vrot.lane.b32.xlu1 %v4578_v7, %s4924_s26  ;;  %v396_v7 = vld [vmem:[%s8344_s5 + $0x30] sm:$0xff] }
 0x3d2   : > { %4599 = vrot.lane.b32.xlu0 %v4598_v5, %s4924_s26  ;;  %v420_v5 = vld [vmem:[%s8344_s5 + $0xf0] sm:$0xff]  ;;  %4460 = vmatpush.msra.mxu3 %v396_v7 }
 0x3d3   : > { %4594 = vrot.lane.b32.xlu2 %v4593_v30, %s4924_s26  ;;  %v6179_v30 = vld [vmem:[#allocation2 + $0x6f] sm:$0xff]  ;;  %2922 = vmatpush.msra.mxu2 %v420_v5  ;;  %v6229_v5 = vld [vmem:[#allocation2 + $0xa1] sm:$0xff] }
 0x3d4   : > { %2817 = vmatpush.msrb.mxu1 %v396_v7  ;;  %4461 = vmatpush.msra.mxu3 %v395_v23  ;;  %v6227_v7 = vld [vmem:[#allocation2 + $0xa7] sm:$0xff]  ;;  %8599 = vst [vmem:[#allocation7_spill] sm:$0xff] %v6229_v5 }
 0x3d5   : > { %2923 = vmatpush.msra.mxu2 %v419_v19  ;;  %v500_v19 = vld [vmem:[%s8344_s5 + $0x370] sm:$0xff] }
 0x3d6   : > { %2818 = vmatpush.msrb.mxu1 %v395_v23  ;;  %4462 = vmatpush.msra.mxu3 %v394_v43 }
 0x3d7   : > { %2924 = vmatpush.msra.mxu2 %v418_v58  ;;  %v6254_v58 = vld [vmem:[#allocation2 + $0x9f] sm:$0xff]  ;;  %3487 = vmatpush.msrb.mxu0 %v500_v19 }
 0x3d8   : > { %4463 = vmatpush.msra.mxu3 %v393_v45  ;;  %2819 = vmatpush.msrb.mxu1 %v394_v43  ;;  %v415_v43 = vld [vmem:[%s8344_s5 + $0xc8] sm:$0xff]  ;;  %v6274_v19 = vld [vmem:[#allocation2 + $0xbf] sm:$0xff] }
 0x3d9   : > { %4589 = vrot.lane.b32.xlu1 %v4588_v29, %s4924_s26  ;;  %v6181_v29 = vld [vmem:[#allocation2 + $0x69] sm:$0xff]  ;;  %2925 = vmatpush.msra.mxu2 %v417_v49  ;;  %v414_v49 = vld [vmem:[%s8344_s5 + $0xc0] sm:$0xff] }
 0x3da   : > { %4614 = vrot.lane.b32.xlu0 %v4613_v54, %s4924_s26  ;;  %8596 = vst [vmem:[#allocation32_spill] sm:$0xff] %v6181_v29  ;;  %v6183_v54 = vld [vmem:[#allocation2 + $0x97] sm:$0xff]  ;;  %2820 = vmatpush.msrb.mxu1 %v393_v45 }
 0x3db   : > { %4609 = vrot.lane.b32.xlu2 %v4608_v16, %s4924_s26  ;;  %v2143_v16 = vld [vmem:[#allocation2 + $0x91] sm:$0xff] }
 0x3dc   : > { %v453_v45 = vld [vmem:[%s8344_s5 + $0x1f8] sm:$0xff] }
 0x3e1   : > { %4604 = vrot.lane.b32.xlu1 %v4603_v22, %s4924_s26  ;;  %v4633_v22 = vpack.i.bf16 %v6181_v29, %v6179_v30 }
 0x3e2   : > { %4629 = vrot.lane.b32.xlu0 %v4628_v51, %s4924_s26  ;;  %v4658_v51 = vpack.i.bf16 %v2143_v16, %v6183_v54  ;;  %v416_v16 = vld [vmem:[%s8344_s5 + $0xd0] sm:$0xff] }
 0x3e3   : > { %4624 = vrot.lane.b32.xlu2 %v4623_v55, %s4924_s26  ;;  %v4653_v55 = vpack.i.bf16 %v6190_v61, %v6188_v53  ;;  %2926 = vmatpush.msra.mxu2 %v416_v16  ;;  %v413_v16 = vld [vmem:[%s8344_s5 + $0xb8] sm:$0xff] }
 0x3e5   : > { %2927 = vmatpush.msra.mxu2 %v415_v43  ;;  %v498_v43 = vld [vmem:[%s8344_s5 + $0x360] sm:$0xff] }
 0x3e7   : > { %2928 = vmatpush.msra.mxu2 %v414_v49 }
 0x3e9   : > { %4619 = vrot.lane.b32.xlu1 %v4618_v44, %s4924_s26  ;;  %v392_v44 = vld [vmem:[%s8344_s5 + $0x10] sm:$0xff]  ;;  %2929 = vmatpush.msra.mxu2 %v413_v16 }
 0x3ea   : > { %4644 = vrot.lane.b32.xlu0 %v4643_v34, %s4924_s26  ;;  %v6215_v34 = vld [vmem:[#allocation2 + $0x87] sm:$0xff]  ;;  %4464 = vmatpush.msra.mxu3 %v392_v44  ;;  %v496_v16 = vld [vmem:[%s8344_s5 + $0x350] sm:$0xff] }
 0x3eb   : > { %4639 = vrot.lane.b32.xlu2 %v4638_v47, %s4924_s26  ;;  %v6217_v47 = vld [vmem:[#allocation2 + $0x81] sm:$0xff]  ;;  %2821 = vmatpush.msrb.mxu1 %v392_v44  ;;  %v6256_v44 = vld [vmem:[#allocation2 + $0x99] sm:$0xff] }
 0x3ec   : > { %8598 = vst [vmem:[#allocation22_spill] sm:$0xff] %v6217_v47  ;;  %v4648_v23 = vpack.i.bf16 %v6217_v47, %v6215_v34  ;;  %4465 = vmatpush.msra.mxu3 %v391_v24  ;;  %v4663_v31 = vpack.i.bf16 %v6256_v44, %v6254_v58  ;;  %2930 = vmatpush.msra.mxu2 %v412_v21  ;;  %v410_v21 = vld [vmem:[%s8344_s5 + $0xa0] sm:$0xff] }
 0x3ed   : > { %8600 = vst [vmem:[#allocation8_spill] sm:$0xff] %v6256_v44  ;;  %2822 = vmatpush.msrb.mxu1 %v391_v24  ;;  %v497_v24 = vld [vmem:[%s8344_s5 + $0x358] sm:$0xff] }
 0x3ee   : > { %v2168_v47 = vld [vmem:[#allocation2 + $0x119] sm:$0xff] }
 0x3f1   : > { %4634 = vrot.lane.b32.xlu1 %v4633_v22, %s4924_s26  ;;  %v4673_v22 = vpack.i.bf16 %v2146_v50, %v6222_v56  ;;  %v499_v50 = vld [vmem:[%s8344_s5 + $0x368] sm:$0xff] }
 0x3f2   : > { %4659 = vrot.lane.b32.xlu0 %v4658_v51, %s4924_s26  ;;  %v4668_v51 = vpack.i.bf16 %v6229_v5, %v6227_v7  ;;  %3488 = vmatpush.msrb.mxu0 %v499_v50  ;;  %v6407_v5 = vld [vmem:[#allocation2 + $0xff] sm:$0xff] }
 0x3f3   : > { %4654 = vrot.lane.b32.xlu2 %v4653_v55, %s4924_s26  ;;  %v390_v55 = vld [vmem:[%s8344_s5] sm:$0xff] }
 0x3f4   : > { %4466 = vmatpush.msra.mxu3 %v390_v55  ;;  %2823 = vmatpush.msrb.mxu1 %v390_v55  ;;  %v411_v55 = vld [vmem:[%s8344_s5 + $0xa8] sm:$0xff] }
 0x3f5   : > { %3489 = vmatpush.msrb.mxu0 %v498_v43  ;;  %v6297_v43 = vld [vmem:[#allocation2 + $0xb1] sm:$0xff]  ;;  %2931 = vmatpush.msra.mxu2 %v411_v55 }
 0x3f6   : > { %3147 = vmatpush.msrb.mxu3 %v453_v45  ;;  %v2148_v45 = vld [vmem:[#allocation2 + $0xb9] sm:$0xff]  ;;  %8601 = vst [vmem:[#allocation9_spill] sm:$0xff] %v6297_v43 }
 0x3f7   : > { %v4683_v50 = vpack.i.bf16 %v2148_v45, %v6274_v19  ;;  %3490 = vmatpush.msrb.mxu0 %v497_v24  ;;  %v452_v45 = vld [vmem:[%s8344_s5 + $0x1f0] sm:$0xff]  ;;  %v495_v24 = vld [vmem:[%s8344_s5 + $0x348] sm:$0xff]  ;;  %2932 = vmatpush.msra.mxu2 %v410_v21  ;;  %v409_v55 = vld [vmem:[%s8344_s5 + $0x98] sm:$0xff] }
 0x3f8   : > { %3148 = vmatpush.msrb.mxu3 %v452_v45  ;;  %v408_v21 = vld [vmem:[%s8344_s5 + $0x90] sm:$0xff]  ;;  %v493_v45 = vld [vmem:[%s8344_s5 + $0x338] sm:$0xff] }
 0x3f9   : > { %4649 = vrot.lane.b32.xlu1 %v4648_v23, %s4924_s26  ;;  %3491 = vmatpush.msrb.mxu0 %v496_v16  ;;  %v494_v16 = vld [vmem:[%s8344_s5 + $0x340] sm:$0xff] }
 0x3fa   : > { %4674 = vrot.lane.b32.xlu0 %v4673_v22, %s4924_s26  ;;  %v6269_v22 = vld [vmem:[#allocation2 + $0xc7] sm:$0xff]  ;;  %2933 = vmatpush.msra.mxu2 %v409_v55  ;;  %v492_v55 = vld [vmem:[%s8344_s5 + $0x330] sm:$0xff] }
 0x3fb   : > { %4669 = vrot.lane.b32.xlu2 %v4668_v51, %s4924_s26  ;;  %v2149_v51 = vld [vmem:[#allocation2 + $0xc1] sm:$0xff]  ;;  %3492 = vmatpush.msrb.mxu0 %v495_v24 }
 0x3fc   : > { %v4688_v49 = vpack.i.bf16 %v2149_v51, %v6269_v22  ;;  %v6295_v51 = vld [vmem:[#allocation2 + $0xb7] sm:$0xff]  ;;  %2934 = vmatpush.msra.mxu2 %v408_v21  ;;  %v407_v24 = vld [vmem:[%s8344_s5 + $0x88] sm:$0xff] }
 0x3fd   : > { %v6267_v23 = vpop.permute.xlu2 %4519  ;;  %v4678_v48 = vpack.i.bf16 %v6297_v43, %v6295_v51  ;;  %3493 = vmatpush.msrb.mxu0 %v494_v16  ;;  %v6345_v16 = vld [vmem:[#allocation2 + $0xf7] sm:$0xff]  ;;  %v491_v21 = vld [vmem:[%s8344_s5 + $0x328] sm:$0xff] }
 0x3fe   : > { %2935 = vmatpush.msra.mxu2 %v407_v24  ;;  %v490_v24 = vld [vmem:[%s8344_s5 + $0x320] sm:$0xff] }
 0x3ff   : > { %3494 = vmatpush.msrb.mxu0 %v493_v45  ;;  %v437_v45 = vld [vmem:[%s8344_s5 + $0x178] sm:$0xff] }
 0x400   : > { %3034 = vmatpush.msra.mxu1 %v437_v45  ;;  %v2153_v45 = vld [vmem:[#allocation2 + $0xe1] sm:$0xff] }
 0x401   : > { %4664 = vrot.lane.b32.xlu1 %v4663_v31, %s4924_s26  ;;  %v6299_v31 = vld [vmem:[#allocation2 + $0xdf] sm:$0xff]  ;;  %3495 = vmatpush.msrb.mxu0 %v492_v55  ;;  %v6365_v55 = vld [vmem:[#allocation2 + $0xef] sm:$0xff] }
 0x402   : > { %4689 = vrot.lane.b32.xlu0 %v4688_v49, %s4924_s26  ;;  %v4713_v52 = vpack.i.bf16 %v2154_v59, %v6365_v55  ;;  %v487_v59 = vld [vmem:[%s8344_s5 + $0x308] sm:$0xff] }
 0x403   : > { %4684 = vrot.lane.b32.xlu2 %v4683_v50, %s4924_s26  ;;  %v2152_v50 = vld [vmem:[#allocation2 + $0xd9] sm:$0xff]  ;;  %3496 = vmatpush.msrb.mxu0 %v491_v21 }
 0x404   : > { %v4703_v57 = vpack.i.bf16 %v2152_v50, %v6299_v31  ;;  %v6339_v50 = vld [vmem:[#allocation2 + $0xcf] sm:$0xff] }
 0x405   : > { %v6310_v49 = vpop.permute.xlu2 %4524  ;;  %3497 = vmatpush.msrb.mxu0 %v490_v24 }
 0x409   : > { %4679 = vrot.lane.b32.xlu1 %v4678_v48, %s4924_s26  ;;  %v2150_v48 = vld [vmem:[#allocation2 + $0xc9] sm:$0xff] }
 0x40a   : > { %4704 = vrot.lane.b32.xlu0 %v4703_v57, %s4924_s26  ;;  %v2245_v60 = vpop.permute.xlu0 %2244  ;;  %v406_v57 = vld [vmem:[%s8344_s5 + $0x80] sm:$0xff]  ;;  %v4693_v0 = vpack.i.bf16 %v2150_v48, %v6339_v50 }
 0x40b   : > { %4699 = vrot.lane.b32.xlu2 %v4698_v3, %s4924_s26  ;;  %v6343_v18 = vsel %vm858_vm0, %v6141_v8, %v2245_v60  ;;  %v451_v3 = vld [vmem:[%s8344_s5 + $0x1e8] sm:$0xff]  ;;  %v2155_v8 = vld [vmem:[#allocation2 + $0xf1] sm:$0xff]  ;;  %2936 = vmatpush.msra.mxu2 %v406_v57 }
 0x40c   : > { %2869 = vmatmul.f32.vlgmr.msra.gmra.mxu3 %v6343_v18  ;;  %v489_v57 = vld [vmem:[%s8344_s5 + $0x318] sm:$0xff]  ;;  %v6379_v48 = vld [vmem:[#allocation2 + $0xe7] sm:$0xff] }
 0x40d   : > { %v6357_v60 = vpop.permute.xlu2 %4539  ;;  %3149 = vmatpush.msrb.mxu3 %v451_v3  ;;  %v4718_v3 = vpack.i.bf16 %v2155_v8, %v6345_v16  ;;  %3498 = vmatpush.msrb.mxu0 %v489_v57  ;;  %v2157_v57 = vld [vmem:[#allocation2 + $0x101] sm:$0xff]  ;;  %v4708_v46 = vpack.i.bf16 %v2153_v45, %v6379_v48 }
 0x40e   : > { %v435_v45 = vld [vmem:[%s8344_s5 + $0x168] sm:$0xff] }
 0x40f   : > { %3499 = vmatpush.msrb.mxu0 %v488_v14  ;;  %v486_v14 = vld [vmem:[%s8344_s5 + $0x300] sm:$0xff] }
 0x411   : > { %4694 = vrot.lane.b32.xlu1 %v4693_v0, %s4924_s26  ;;  %v436_v0 = vld [vmem:[%s8344_s5 + $0x170] sm:$0xff]  ;;  %3500 = vmatpush.msrb.mxu0 %v487_v59 }
 0x412   : > { %4719 = vrot.lane.b32.xlu0 %v4718_v3, %s4924_s26  ;;  %v2247_v21 = vpop.permute.xlu0 %2246  ;;  %3035 = vmatpush.msra.mxu1 %v436_v0  ;;  %v2156_v3 = vld [vmem:[#allocation2 + $0xf9] sm:$0xff]  ;;  %v2062_v0 = vld [vmem:[#allocation2 + $0x7] sm:$0xff] }
 0x413   : > { %4714 = vrot.lane.b32.xlu2 %v4713_v52, %s4924_s26  ;;  %v6383_v8 = vsel %vm858_vm0, %v6215_v34, %v2247_v21  ;;  %v450_v52 = vld [vmem:[%s8344_s5 + $0x1e0] sm:$0xff]  ;;  %v2161_v21 = vld [vmem:[#allocation2 + $0x110] sm:$0xff]  ;;  %3501 = vmatpush.msrb.mxu0 %v486_v14 }
 0x414   : > { %2872 = vmatmul.f32.gmra.mxu3 %v6383_v8  ;;  %v6397_v34 = vld [vmem:[#allocation2 + $0x107] sm:$0xff]  ;;  %v4728_v37 = vpack.i.bf16 %v2161_v21, %v2156_v3  ;;  %3036 = vmatpush.msra.mxu1 %v435_v45 }
 0x415   : > { %v6395_v24 = vpop.permute.xlu2 %4554  ;;  %8602 = vst [vmem:[#allocation10_spill] sm:$0xff] %v6397_v34  ;;  %3150 = vmatpush.msrb.mxu3 %v450_v52  ;;  %v4733_v35 = vpack.i.bf16 %v2157_v57, %v6397_v34  ;;  %v2167_v57 = vld [vmem:[#allocation2 + $0x120] sm:$0xff]  ;;  %v2162_v34 = vld [vmem:[#allocation2 + $0x109] sm:$0xff] }
 0x419   : > { %4709 = vrot.lane.b32.xlu1 %v4708_v46, %s4924_s26  ;;  %v449_v46 = vld [vmem:[%s8344_s5 + $0x1d8] sm:$0xff] }
 0x41a   : > { %4734 = vrot.lane.b32.xlu0 %v4733_v35, %s4924_s26  ;;  %v2163_v35 = vld [vmem:[#allocation2 + $0x111] sm:$0xff]  ;;  %3151 = vmatpush.msrb.mxu3 %v449_v46 }
 0x41b   : > { %v4510_v4 = vpop.permute.xlu1 %4509  ;;  %4729 = vrot.lane.b32.xlu2 %v4728_v37, %s4924_s26  ;;  %v2160_v37 = vld [vmem:[#allocation2 + $0x108] sm:$0xff]  ;;  %v4743_v21 = vpack.i.bf16 %v2163_v35, %v2167_v57  ;;  %v434_v35 = vld [vmem:[%s8344_s5 + $0x160] sm:$0xff]  ;;  %v448_v57 = vld [vmem:[%s8344_s5 + $0x1d0] sm:$0xff] }
 0x41c   : > { %v4512_v52 = vunpack.i.h.bf16 %v4510_v4  ;;  %v4511_v43 = vunpack.i.l.bf16 %v4510_v4  ;;  %v6409_v44 = vpop.permute.xlu0 %4529  ;;  %v4723_v3 = vpack.i.bf16 %v6407_v5, %v2160_v37  ;;  %v2063_v46 = vld [vmem:[#allocation2 + $0xf] sm:$0xff]  ;;  %v2169_v37 = vld [vmem:[#allocation2 + $0x121] sm:$0xff]  ;;  %3037 = vmatpush.msra.mxu1 %v434_v35  ;;  %3152 = vmatpush.msrb.mxu3 %v448_v57  ;;  %v433_v35 = vld [vmem:[%s8344_s5 + $0x158] sm:$0xff]  ;;  %v4521_v57 = vunpack.i.l.bf16 %v6267_v23 }
 0x41d   : > { %v6417_v59 = vpop.permute.xlu2 %4569 }
 0x41e   : > { %v2630_v4 = vsel %vm858_vm0, %v2062_v0, %v4512_v52  ;;  %v6422_v14 = vsel %vm858_vm0, %v6188_v53, %v4511_v43  ;;  %v2126_v0 = vld [vmem:[#allocation2 + $0x9] sm:$0xff]  ;;  %3038 = vmatpush.msra.mxu1 %v433_v35  ;;  %v4526_v35 = vunpack.i.l.bf16 %v6310_v49 }
 0x41f   : > { %2824 = vmatmul.f32.vlgmr.msrb.gmra.mxu1 %v2630_v4  ;;  %2875 = vmatmul.f32.gmra.mxu3 %v6422_v14  ;;  %v6429_v53 = vld [vmem:[#allocation2 + $0x10f] sm:$0xff] }
 0x421   : > { %4724 = vrot.lane.b32.xlu1 %v4723_v3, %s4924_s26  ;;  %v6439_v3 = vld [vmem:[#allocation2 + $0x127] sm:$0xff] }
 0x422   : > { %4744 = vrot.lane.b32.xlu0 %v4743_v21, %s4924_s26  ;;  %v2166_v21 = vld [vmem:[#allocation2 + $0x118] sm:$0xff] }
 0x423   : > { %v4515_v45 = vpop.permute.xlu1 %4514  ;;  %2530 = vrot.lane.b32.xlu2 %v2162_v34, %s4924_s26  ;;  %v4738_v13 = vpack.i.bf16 %v6429_v53, %v2166_v21  ;;  %v4527_v21 = vunpack.i.h.bf16 %v6310_v49  ;;  %v6498_v49 = vsel %vm858_vm0, %v6227_v7, %v4526_v35  ;;  %v4531_v7 = vunpack.i.l.bf16 %v6409_v44 }
 0x424   : > { %v4517_v52 = vunpack.i.h.bf16 %v4515_v45  ;;  %v4516_v61 = vunpack.i.l.bf16 %v4515_v45  ;;  %v6431_v43 = vpop.permute.xlu0 %4544 }
 0x425   : > { %v2343_v4 = vpop.permute.xlu2 %2342 }
 0x426   : > { %v2631_v34 = vsel %vm858_vm0, %v2063_v46, %v4517_v52  ;;  %v2662_v45 = vsel %vm858_vm0, %v2126_v0, %v2343_v4  ;;  %v6446_v29 = vsel %vm858_vm0, %v6183_v54, %v4516_v61  ;;  %v4758_v46 = vpack.i.bf16 %v2169_v37, %v6439_v3  ;;  %v6460_v61 = vld [vmem:[#allocation2 + $0x117] sm:$0xff]  ;;  %v6462_v4 = vld [vmem:[#allocation2 + $0x11f] sm:$0xff] }
 0x427   : > { %2827 = vmatmul.f32.gmra.mxu1 %v2631_v34  ;;  %2937 = vmatmul.f32.vlgmr.msra.gmra.mxu2 %v2662_v45  ;;  %v4753_v0 = vpack.i.bf16 %v2172_v11, %v2168_v47  ;;  %v4522_v52 = vunpack.i.h.bf16 %v6267_v23  ;;  %v447_v11 = vld [vmem:[%s8344_s5 + $0x1c8] sm:$0xff]  ;;  %v4748_v47 = vpack.i.bf16 %v6462_v4, %v6460_v61  ;;  %v6475_v23 = vsel %vm858_vm0, %v6254_v58, %v4521_v57  ;;  %v432_v37 = vld [vmem:[%s8344_s5 + $0x150] sm:$0xff] }
 0x428   : > { %2878 = vmatmul.f32.gmra.mxu3 %v6446_v29  ;;  %3039 = vmatpush.msra.mxu1 %v432_v37  ;;  %v2173_v45 = vld [vmem:[#allocation2 + $0x130] sm:$0xff]  ;;  %v2633_v57 = vsel %vm858_vm0, %v6050_v36, %v4527_v21  ;;  %v4557_v36 = vunpack.i.h.bf16 %v6395_v24 }
 0x429   : > { %4739 = vrot.lane.b32.xlu1 %v4738_v13, %s4924_s26  ;;  %3153 = vmatpush.msrb.mxu3 %v447_v11  ;;  %v2632_v13 = vsel %vm858_vm0, %v6056_v39, %v4522_v52  ;;  %v2171_v39 = vld [vmem:[#allocation2 + $0x12f] sm:$0xff] }
 0x42a   : > { %4759 = vrot.lane.b32.xlu0 %v4758_v46, %s4924_s26  ;;  %v4763_v52 = vpack.i.bf16 %v2171_v39, %v2173_v45  ;;  %v2127_v39 = vld [vmem:[#allocation2 + $0x11] sm:$0xff] }
 0x42b   : > { %v6457_v54 = vpop.permute.xlu1 %4534  ;;  %4754 = vrot.lane.b32.xlu2 %v4753_v0, %s4924_s26 }
 0x42c   : > { %v6464_v34 = vpop.permute.xlu0 %4559 }
 0x42f   : > { %2830 = vmatmul.f32.gmra.mxu1 %v2632_v13  ;;  %v446_v13 = vld [vmem:[%s8344_s5 + $0x1c0] sm:$0xff] }
 0x430   : > { %2881 = vmatmul.f32.gmra.mxu3 %v6475_v23 }
 0x431   : > { %4749 = vrot.lane.b32.xlu1 %v4748_v47, %s4924_s26  ;;  %v431_v47 = vld [vmem:[%s8344_s5 + $0x148] sm:$0xff]  ;;  %3154 = vmatpush.msrb.mxu3 %v446_v13  ;;  %v4536_v13 = vunpack.i.l.bf16 %v6457_v54 }
 0x432   : > { %3040 = vmatpush.msra.mxu1 %v431_v47 }
 0x433   : > { %v6484_v46 = vpop.permute.xlu1 %4549 }
 0x434   : > { %v4552_v58 = vunpack.i.h.bf16 %v6484_v46  ;;  %v6487_v0 = vpop.permute.xlu0 %4574 }
 0x436   : > { %v6493_v11 = vsel %vm858_vm0, %v6085_v41, %v4552_v58  ;;  %v4532_v41 = vunpack.i.h.bf16 %v6409_v44  ;;  %v6522_v58 = vsel %vm858_vm0, %v6081_v1, %v4557_v36  ;;  %v6528_v44 = vsel %vm858_vm0, %v6222_v56, %v4531_v7 }
 0x437   : > { %2833 = vmatmul.f32.gmra.mxu1 %v2633_v57  ;;  %3502 = vmatmul.f32.vlgmr.msrb.gmra.mxu0 %v6493_v11  ;;  %v445_v57 = vld [vmem:[%s8344_s5 + $0x1b8] sm:$0xff]  ;;  %v4537_v1 = vunpack.i.h.bf16 %v6457_v54  ;;  %v4562_v56 = vunpack.i.h.bf16 %v6464_v34  ;;  %v6555_v7 = vsel %vm858_vm0, %v6295_v51, %v4536_v13  ;;  %v444_v54 = vld [vmem:[%s8344_s5 + $0x1b0] sm:$0xff]  ;;  %v4546_v13 = vunpack.i.l.bf16 %v6431_v43 }
 0x438   : > { %2884 = vmatmul.f32.gmra.mxu3 %v6498_v49  ;;  %v6518_v35 = vsel %vm858_vm0, %v6077_v33, %v4532_v41  ;;  %v430_v33 = vld [vmem:[%s8344_s5 + $0x140] sm:$0xff] }
 0x439   : > { %4764 = vrot.lane.b32.xlu1 %v4763_v52, %s4924_s26  ;;  %3155 = vmatpush.msrb.mxu3 %v445_v57  ;;  %v6545_v36 = vsel %vm858_vm0, %v6066_v42, %v4537_v1  ;;  %v6549_v41 = vsel %vm858_vm0, %v6137_v20, %v4562_v56  ;;  %v429_v42 = vld [vmem:[%s8344_s5 + $0x138] sm:$0xff]  ;;  %v4542_v20 = vunpack.i.h.bf16 %v6357_v60  ;;  %v6592_v56 = vpop.permute.xlu2 %4594 }
 0x43a   : > { %3041 = vmatpush.msra.mxu1 %v430_v33 }
 0x43b   : > { %v6511_v37 = vpop.permute.xlu1 %4564  ;;  %3156 = vmatpush.msrb.mxu3 %v444_v54  ;;  %v6572_v57 = vsel %vm858_vm0, %v6062_v17, %v4542_v20  ;;  %v443_v17 = vld [vmem:[%s8344_s5 + $0x1a8] sm:$0xff]  ;;  %v4596_v54 = vunpack.i.l.bf16 %v6592_v56 }
 0x43c   : > { %v6513_v21 = vpop.permute.xlu0 %4584  ;;  %3042 = vmatpush.msra.mxu1 %v429_v42 }
 0x43d   : > { %v4586_v45 = vunpack.i.l.bf16 %v6513_v21  ;;  %3157 = vmatpush.msrb.mxu3 %v443_v17 }
 0x43f   : > { %2836 = vmatmul.f32.gmra.mxu1 %v6518_v35  ;;  %3505 = vmatmul.f32.gmra.mxu0 %v6522_v58  ;;  %v2663_v52 = vsel %vm858_vm0, %v2127_v39, %v4586_v45  ;;  %v4567_v39 = vunpack.i.h.bf16 %v6511_v37  ;;  %v4541_v45 = vunpack.i.l.bf16 %v6357_v60 }
 0x440   : > { %2887 = vmatmul.f32.gmra.mxu3 %v6528_v44  ;;  %2940 = vmatmul.f32.gmra.mxu2 %v2663_v52 }
 0x441   : > { %v6576_v33 = vsel %vm858_vm0, %v6115_v15, %v4567_v39  ;;  %v6584_v60 = vsel %vm858_vm0, %v6274_v19, %v4541_v45  ;;  %v428_v15 = vld [vmem:[%s8344_s5 + $0x130] sm:$0xff]  ;;  %v4547_v19 = vunpack.i.h.bf16 %v6431_v43  ;;  %v2665_v39 = vsel %vm858_vm0, %v6079_v63, %v4596_v54 }
 0x442   : > { %3043 = vmatpush.msra.mxu1 %v428_v15  ;;  %v6613_v43 = vsel %vm858_vm0, %v6269_v22, %v4546_v13  ;;  %v4577_v63 = vunpack.i.h.bf16 %v6487_v0  ;;  %v4551_v22 = vunpack.i.l.bf16 %v6484_v46  ;;  %v426_v46 = vld [vmem:[%s8344_s5 + $0x120] sm:$0xff] }
 0x443   : > { %v6541_v47 = vpop.permute.xlu1 %4579  ;;  %v6601_v42 = vsel %vm858_vm0, %v6107_v12, %v4547_v19  ;;  %v427_v12 = vld [vmem:[%s8344_s5 + $0x128] sm:$0xff] }
 0x444   : > { %v6621_v45 = vpop.permute.xlu0 %4599  ;;  %3044 = vmatpush.msra.mxu1 %v427_v12  ;;  %v6639_v15 = vsel %vm858_vm0, %v6339_v50, %v4551_v22  ;;  %v4556_v50 = vunpack.i.l.bf16 %v6395_v24  ;;  %v425_v24 = vld [vmem:[%s8344_s5 + $0x118] sm:$0xff]  ;;  %v6674_v12 = vpop.permute.xlu2 %4609  ;;  %v424_v22 = vld [vmem:[%s8344_s5 + $0x110] sm:$0xff] }
 0x446   : > { %3045 = vmatpush.msra.mxu1 %v426_v46  ;;  %v423_v46 = vld [vmem:[%s8344_s5 + $0x108] sm:$0xff] }
 0x447   : > { %2839 = vmatmul.f32.gmra.mxu1 %v6545_v36  ;;  %3508 = vmatmul.f32.gmra.mxu0 %v6549_v41 }
 0x448   : > { %2890 = vmatmul.f32.gmra.mxu3 %v6555_v7  ;;  %3046 = vmatpush.msra.mxu1 %v425_v24  ;;  %v4571_v24 = vunpack.i.l.bf16 %v6417_v59 }
 0x44a   : > { %3047 = vmatpush.msra.mxu1 %v424_v22  ;;  %v4576_v22 = vunpack.i.l.bf16 %v6487_v0 }
 0x44b   : > { %v6567_v51 = vpop.permute.xlu1 %4589 }
 0x44c   : > { %v4591_v52 = vunpack.i.l.bf16 %v6567_v51  ;;  %3048 = vmatpush.msra.mxu1 %v423_v46 }
 0x44e   : > { %v2664_v1 = vsel %vm858_vm0, %v6052_v32, %v4591_v52  ;;  %v4572_v32 = vunpack.i.h.bf16 %v6417_v59  ;;  %v4601_v52 = vunpack.i.l.bf16 %v6621_v45  ;;  %v509_v59 = vld [vmem:[%s8344_s5 + $0x3b8] sm:$0xff] }
 0x44f   : > { %2842 = vmatmul.f32.gmra.mxu1 %v6572_v57  ;;  %3511 = vmatmul.f32.gmra.mxu0 %v6576_v33 }
 0x450   : > { %2943 = vmatmul.f32.gmra.mxu2 %v2664_v1  ;;  %2893 = vmatmul.f32.gmra.mxu3 %v6584_v60  ;;  %v6605_v20 = vsel %vm858_vm0, %v6111_v6, %v4572_v32  ;;  %v442_v6 = vld [vmem:[%s8344_s5 + $0x1a0] sm:$0xff]  ;;  %v6629_v1 = vsel %vm858_vm0, %v6179_v30, %v4577_v63  ;;  %v6635_v17 = vsel %vm858_vm0, %v6068_v2, %v4601_v52  ;;  %v441_v30 = vld [vmem:[%s8344_s5 + $0x198] sm:$0xff]  ;;  %v4582_v2 = vunpack.i.h.bf16 %v6541_v47  ;;  %v6696_v52 = vpop.permute.xlu0 %4614 }
 0x451   : > { %3158 = vmatpush.msrb.mxu3 %v442_v6 }
 0x452   : > { %v6656_v13 = vsel %vm858_vm0, %v6148_v62, %v4582_v2  ;;  %v440_v62 = vld [vmem:[%s8344_s5 + $0x190] sm:$0xff] }
 0x453   : > { %v6647_v32 = vpop.permute.xlu1 %4604  ;;  %3159 = vmatpush.msrb.mxu3 %v441_v30  ;;  %v422_v30 = vld [vmem:[%s8344_s5 + $0x100] sm:$0xff] }
 0x454   : > { %v4606_v19 = vunpack.i.l.bf16 %v6647_v32  ;;  %3049 = vmatpush.msra.mxu1 %v422_v30  ;;  %v468_v30 = vld [vmem:[%s8344_s5 + $0x270] sm:$0xff] }
 0x455   : > { %3160 = vmatpush.msrb.mxu3 %v440_v62 }
 0x456   : > { %v6662_v54 = vsel %vm858_vm0, %v6064_v40, %v4606_v19  ;;  %v4561_v40 = vunpack.i.l.bf16 %v6464_v34  ;;  %v439_v34 = vld [vmem:[%s8344_s5 + $0x188] sm:$0xff] }
 0x457   : > { %2845 = vmatmul.f32.gmra.mxu1 %v6601_v42  ;;  %3514 = vmatmul.f32.gmra.mxu0 %v6605_v20 }
 0x458   : > { %2946 = vmatmul.f32.gmra.mxu2 %v2665_v39  ;;  %2896 = vmatmul.f32.gmra.mxu3 %v6613_v43  ;;  %v6666_v39 = vsel %vm858_vm0, %v6318_v9, %v4556_v50  ;;  %v4611_v9 = vunpack.i.l.bf16 %v6674_v12  ;;  %v6688_v63 = vsel %vm858_vm0, %v6299_v31, %v4561_v40  ;;  %v4616_v31 = vunpack.i.l.bf16 %v6696_v52  ;;  %v438_v50 = vld [vmem:[%s8344_s5 + $0x180] sm:$0xff]  ;;  %v6762_v0 = vpop.permute.xlu0 %4629 }
 0x459   : > { %3161 = vmatpush.msrb.mxu3 %v439_v34  ;;  %v6738_v40 = vsel %vm858_vm0, %v6365_v55, %v4571_v24  ;;  %v485_v55 = vld [vmem:[%s8344_s5 + $0x2f8] sm:$0xff]  ;;  %v4631_v46 = vunpack.i.l.bf16 %v6762_v0 }
 0x45a   : > { %v6684_v6 = vsel %vm858_vm0, %v6109_v10, %v4611_v9  ;;  %v4566_v10 = vunpack.i.l.bf16 %v6511_v37  ;;  %v6712_v2 = vsel %vm858_vm0, %v6087_v26, %v4616_v31  ;;  %8603 = vst [vmem:[#allocation11_spill] sm:$0xff] %v6738_v40  ;;  %v6743_v9 = vpop.permute.xlu2 %4624  ;;  %3373 = vmatpush.msrb.mxu1 %v485_v55  ;;  %v4581_v31 = vunpack.i.l.bf16 %v6541_v47 }
 0x45b   : > { %v6721_v19 = vpop.permute.xlu1 %4619  ;;  %3162 = vmatpush.msrb.mxu3 %v438_v50  ;;  %v4587_v50 = vunpack.i.h.bf16 %v6513_v21 }
 0x45c   : > { %v6716_v37 = vsel %vm858_vm0, %v6379_v48, %v4566_v10  ;;  %v4621_v26 = vunpack.i.l.bf16 %v6721_v19  ;;  %v469_v48 = vld [vmem:[%s8344_s5 + $0x278] sm:$0xff]  ;;  %v6760_v10 = vsel %vm858_vm0, %v6345_v16, %v4576_v22  ;;  %v6779_v16 = vsel %vm858_vm0, %v6407_v5, %v4581_v31  ;;  %v484_v5 = vld [vmem:[%s8344_s5 + $0x2f0] sm:$0xff] }
 0x45d   : > { %3260 = vmatpush.msrb.mxu2 %v469_v48  ;;  %3607 = vmatpush.msra.mxu3 %v509_v59  ;;  %8605 = vst [vmem:[#allocation13_spill] sm:$0xff] %v6760_v10  ;;  %v4792_v48 = vld [vmem:[#allocation2 + $0x18] sm:$0xff] }
 0x45e   : > { %v6734_v62 = vsel %vm858_vm0, %v6083_v38, %v4621_v26  ;;  %v4626_v38 = vunpack.i.l.bf16 %v6743_v9  ;;  %8607 = vst [vmem:[#allocation15_spill] sm:$0xff] %v6779_v16  ;;  %3374 = vmatpush.msrb.mxu1 %v484_v5 }
 0x45f   : > { %2848 = vmatmul.f32.gmra.mxu1 %v6493_v11  ;;  %3517 = vmatmul.f32.gmra.mxu0 %v6629_v1 }
 0x460   : > { %2949 = vmatmul.f32.gmra.mxu2 %v6635_v17  ;;  %2899 = vmatmul.f32.gmra.mxu3 %v6639_v15  ;;  %v6756_v34 = vsel %vm858_vm0, %v6139_v27, %v4626_v38  ;;  %v6775_v27 = vsel %vm858_vm0, %v6117_v28, %v4631_v46  ;;  %v2694_v28 = vsel %vm858_vm0, %v4792_v48, %v4587_v50  ;;  %v4592_v38 = vunpack.i.h.bf16 %v6567_v51  ;;  %v467_v46 = vld [vmem:[%s8344_s5 + $0x268] sm:$0xff]  ;;  %v508_v51 = vld [vmem:[%s8344_s5 + $0x3b0] sm:$0xff] }
 0x461   : > { %8604 = vst [vmem:[#allocation12_spill] sm:$0xff] %v6756_v34  ;;  %3261 = vmatpush.msrb.mxu2 %v468_v30  ;;  %3608 = vmatpush.msra.mxu3 %v508_v51  ;;  %v4597_v48 = vunpack.i.h.bf16 %v6592_v56 }
 0x462   : > { %8606 = vst [vmem:[#allocation14_spill] sm:$0xff] %v6775_v27  ;;  %v6798_v59 = vpop.permute.xlu2 %4639 }
 0x463   : > { %v6784_v24 = vpop.permute.xlu1 %4634  ;;  %v4641_v55 = vunpack.i.l.bf16 %v6798_v59  ;;  %3262 = vmatpush.msrb.mxu2 %v467_v46  ;;  %v4794_v46 = vld [vmem:[#allocation2 + $0x28] sm:$0xff] }
 0x464   : > { %v4636_v26 = vunpack.i.l.bf16 %v6784_v24 }
 0x466   : > { %v6796_v21 = vsel %vm858_vm0, %v6113_v25, %v4636_v26  ;;  %v4793_v25 = vld [vmem:[#allocation2 + $0x20] sm:$0xff]  ;;  %v6820_v26 = vpop.permute.xlu0 %4644 }
 0x467   : > { %2851 = vmatmul.f32.gmra.mxu1 %v6522_v58  ;;  %3520 = vmatmul.f32.gmra.mxu0 %v6656_v13  ;;  %8609 = vst [vmem:[#allocation19_spill] sm:$0xff] %v6796_v21  ;;  %v2695_v30 = vsel %vm858_vm0, %v4793_v25, %v4592_v38  ;;  %v4646_v5 = vunpack.i.l.bf16 %v6820_v26  ;;  %v2696_v25 = vsel %vm858_vm0, %v4794_v46, %v4597_v48  ;;  %v466_v46 = vld [vmem:[%s8344_s5 + $0x260] sm:$0xff] }
 0x468   : > { %2952 = vmatmul.f32.gmra.mxu2 %v6662_v54  ;;  %2902 = vmatmul.f32.gmra.mxu3 %v6666_v39 }
 0x469   : > { %3263 = vmatpush.msrb.mxu2 %v466_v46 }
 0x46f   : > { %2854 = vmatmul.f32.gmra.mxu1 %v6549_v41  ;;  %3523 = vmatmul.f32.gmra.mxu0 %v6343_v18 }
 0x470   : > { %2955 = vmatmul.f32.gmra.mxu2 %v6684_v6  ;;  %2905 = vmatmul.f32.gmra.mxu3 %v6688_v63 }
 0x477   : > { %2857 = vmatmul.f32.gmra.mxu1 %v6576_v33  ;;  %3526 = vmatmul.f32.gmra.mxu0 %v6383_v8 }
 0x478   : > { %2958 = vmatmul.f32.gmra.mxu2 %v6712_v2  ;;  %2908 = vmatmul.f32.gmra.mxu3 %v6716_v37 }
 0x47f   : > { %2860 = vmatmul.f32.gmra.mxu1 %v6605_v20  ;;  %3529 = vmatmul.f32.gmra.mxu0 %v6422_v14 }
 0x480   : > { %2961 = vmatmul.f32.gmra.mxu2 %v6734_v62  ;;  %2911 = vmatmul.f32.gmra.mxu3 %v6738_v40 }
 0x487   : > { %2863 = vmatmul.f32.gmra.mxu1 %v6629_v1  ;;  %3532 = vmatmul.f32.gmra.mxu0 %v6446_v29 }
 0x488   : > { %2964 = vmatmul.f32.gmra.mxu2 %v6756_v34  ;;  %2914 = vmatmul.f32.gmra.mxu3 %v6760_v10 }
 0x48f   : > { %2866 = vmatmul.f32.gmra.mxu1 %v6656_v13  ;;  %3535 = vmatmul.f32.gmra.mxu0 %v6475_v23  ;;  %v6781_v47 = vpop.f32.mrf.mxu3 }
 0x490   : > { %8608 = vst [vmem:[#allocation16_spill] sm:$0xff] %v6781_v47  ;;  %2967 = vmatmul.f32.gmra.mxu2 %v6775_v27  ;;  %2917 = vmatmul.f32.gmra.mxu3 %v6779_v16 }
 0x497   : > { %3050 = vmatmul.f32.vlgmr.msra.gmra.mxu1 %v2694_v28  ;;  %3538 = vmatmul.f32.gmra.mxu0 %v6498_v49  ;;  %v6802_v22 = vpop.f32.mrf.mxu3 }
 0x498   : > { %2970 = vmatmul.f32.gmra.mxu2 %v6796_v21  ;;  %3163 = vmatmul.f32.vlgmr.msrb.gmra.mxu3 %v6518_v35  ;;  %8610 = vst [vmem:[#allocation20_spill] sm:$0xff] %v6802_v22  ;;  %v8611_v35 = vld [vmem:[#allocation32_spill] sm:$0xff] }
 0x499   : > { %v6815_v50 = vsel %vm858_vm0, %v8611_v35, %v4641_v55  ;;  %v483_v55 = vld [vmem:[%s8344_s5 + $0x2e8] sm:$0xff]  ;;  %v4602_v35 = vunpack.i.h.bf16 %v6621_v45  ;;  %v465_v22 = vld [vmem:[%s8344_s5 + $0x258] sm:$0xff] }
 0x49a   : > { %8612 = vst [vmem:[#allocation25_spill] sm:$0xff] %v6815_v50  ;;  %3375 = vmatpush.msrb.mxu1 %v483_v55  ;;  %3264 = vmatpush.msrb.mxu2 %v465_v22 }
 0x49c   : > { %v6806_v31 = vpop.f32.mrf.mxu1 }
 0x49f   : > { %3053 = vmatmul.f32.gmra.mxu1 %v2695_v30  ;;  %3541 = vmatmul.f32.gmra.mxu0 %v6528_v44  ;;  %v6839_v30 = vpop.permute.xlu1 %4649 }
 0x4a0   : > { %2973 = vmatmul.f32.gmra.mxu2 %v6815_v50  ;;  %3166 = vmatmul.f32.gmra.mxu3 %v6545_v36  ;;  %v8614_v36 = vld [vmem:[#allocation18_spill] sm:$0xff]  ;;  %v4651_v51 = vunpack.i.l.bf16 %v6839_v30 }
 0x4a1   : > { %v6837_v56 = vsel %vm858_vm0, %v8614_v36, %v4646_v5  ;;  %v4795_v5 = vld [vmem:[#allocation2 + $0x30] sm:$0xff]  ;;  %v6858_v36 = vpop.permute.xlu2 %4654 }
 0x4a2   : > { %v6825_v28 = vpop.f32.mrf.mxu3  ;;  %8615 = vst [vmem:[#allocation34_spill] sm:$0xff] %v6837_v56  ;;  %v4656_v46 = vunpack.i.l.bf16 %v6858_v36 }
 0x4a3   : > { %8613 = vst [vmem:[#allocation26_spill] sm:$0xff] %v6825_v28 }
 0x4a4   : > { %v6828_v38 = vpop.f32.mrf.mxu1 }
 0x4a7   : > { %3056 = vmatmul.f32.gmra.mxu1 %v2696_v25  ;;  %3544 = vmatmul.f32.gmra.mxu0 %v6555_v7  ;;  %v2697_v25 = vsel %vm858_vm0, %v4795_v5, %v4602_v35  ;;  %v482_v5 = vld [vmem:[%s8344_s5 + $0x2e0] sm:$0xff] }
 0x4a8   : > { %2976 = vmatmul.f32.gmra.mxu2 %v6837_v56  ;;  %3169 = vmatmul.f32.gmra.mxu3 %v6572_v57  ;;  %v8617_v57 = vld [vmem:[#allocation17_spill] sm:$0xff] }
 0x4a9   : > { %v6856_v45 = vsel %vm858_vm0, %v8617_v57, %v4651_v51  ;;  %3376 = vmatpush.msrb.mxu1 %v482_v5  ;;  %v4796_v51 = vld [vmem:[#allocation2 + $0x38] sm:$0xff]  ;;  %v6880_v57 = vpop.permute.xlu0 %4659  ;;  %v4612_v5 = vunpack.i.h.bf16 %v6674_v12 }
 0x4aa   : > { %8618 = vst [vmem:[#allocation43_spill] sm:$0xff] %v6856_v45  ;;  %v6909_v22 = vpop.f32.mrf.mxu2 }
 0x4ab   : > { %v6845_v55 = vpop.f32.mrf.mxu3 }
 0x4ac   : > { %8616 = vst [vmem:[#allocation35_spill] sm:$0xff] %v6845_v55  ;;  %v6847_v48 = vpop.f32.mrf.mxu1  ;;  %v4607_v55 = vunpack.i.h.bf16 %v6647_v32 }
 0x4af   : > { %3059 = vmatmul.f32.gmra.mxu1 %v2697_v25  ;;  %3547 = vmatmul.f32.gmra.mxu0 %v6584_v60  ;;  %v6872_v25 = vsel %vm858_vm0, %v4796_v51, %v4607_v55 }
 0x4b0   : > { %2979 = vmatmul.f32.gmra.mxu2 %v6856_v45  ;;  %3172 = vmatmul.f32.gmra.mxu3 %v6601_v42  ;;  %8620 = vst [vmem:[#allocation46_spill] sm:$0xff] %v6872_v25  ;;  %v8621_v42 = vld [vmem:[#allocation22_spill] sm:$0xff] }
 0x4b1   : > { %v6878_v32 = vsel %vm858_vm0, %v8621_v42, %v4656_v46  ;;  %v4797_v46 = vld [vmem:[#allocation2 + $0x40] sm:$0xff] }
 0x4b2   : > { %8622 = vst [vmem:[#allocation47_spill] sm:$0xff] %v6878_v32  ;;  %v6894_v42 = vsel %vm858_vm0, %v4797_v46, %v4612_v5  ;;  %v4617_v5 = vunpack.i.h.bf16 %v6696_v52 }
 0x4b3   : > { %v6864_v28 = vpop.f32.mrf.mxu3  ;;  %8624 = vst [vmem:[#allocation18_spill] sm:$0xff] %v6894_v42 }
 0x4b4   : > { %8619 = vst [vmem:[#allocation44_spill] sm:$0xff] %v6864_v28  ;;  %v6866_v35 = vpop.f32.mrf.mxu1  ;;  %v4661_v28 = vunpack.i.l.bf16 %v6880_v57 }
 0x4b7   : > { %3062 = vmatmul.f32.gmra.mxu1 %v6872_v25  ;;  %3550 = vmatmul.f32.gmra.mxu0 %v6613_v43  ;;  %v4798_v25 = vld [vmem:[#allocation2 + $0x48] sm:$0xff] }
 0x4b8   : > { %2982 = vmatmul.f32.gmra.mxu2 %v6878_v32  ;;  %3175 = vmatmul.f32.gmra.mxu3 %v6493_v11  ;;  %v8625_v11 = vld [vmem:[#allocation21_spill] sm:$0xff]  ;;  %v6905_v32 = vpop.permute.xlu1 %4664 }
 0x4b9   : > { %v6900_v12 = vsel %vm858_vm0, %v8625_v11, %v4661_v28  ;;  %v4666_v46 = vunpack.i.l.bf16 %v6905_v32  ;;  %v481_v11 = vld [vmem:[%s8344_s5 + $0x2d8] sm:$0xff] }
 0x4ba   : > { %8626 = vst [vmem:[#allocation17_spill] sm:$0xff] %v6900_v12  ;;  %3377 = vmatpush.msrb.mxu1 %v481_v11 }
 0x4bb   : > { %v6886_v55 = vpop.f32.mrf.mxu3 }
 0x4bc   : > { %8623 = vst [vmem:[#allocation32_spill] sm:$0xff] %v6886_v55  ;;  %v6888_v51 = vpop.f32.mrf.mxu1  ;;  %v507_v55 = vld [vmem:[%s8344_s5 + $0x3a8] sm:$0xff] }
 0x4bd   : > { %3609 = vmatpush.msra.mxu3 %v507_v55  ;;  %v6931_v55 = vpop.permute.xlu2 %4669 }
 0x4bf   : > { %3065 = vmatmul.f32.gmra.mxu1 %v6894_v42  ;;  %3553 = vmatmul.f32.gmra.mxu0 %v6639_v15 }
 0x4c0   : > { %2985 = vmatmul.f32.gmra.mxu2 %v6900_v12  ;;  %3178 = vmatmul.f32.gmra.mxu3 %v6522_v58  ;;  %v6921_v12 = vsel %vm858_vm0, %v4798_v25, %v4617_v5  ;;  %v6925_v58 = vld [vmem:[#allocation2 + $0x91] sm:$0xff]  ;;  %v4622_v25 = vunpack.i.h.bf16 %v6721_v19  ;;  %v4671_v5 = vunpack.i.l.bf16 %v6931_v55  ;;  %v6957_v45 = vpop.permute.xlu1 %4679 }
 0x4c1   : > { %8628 = vst [vmem:[#allocation21_spill] sm:$0xff] %v6921_v12  ;;  %v6929_v52 = vsel %vm858_vm0, %v6925_v58, %v4666_v46  ;;  %v464_v46 = vld [vmem:[%s8344_s5 + $0x250] sm:$0xff] }
 0x4c2   : > { %8629 = vst [vmem:[#allocation48_spill] sm:$0xff] %v6925_v58  ;;  %3265 = vmatpush.msrb.mxu2 %v464_v46  ;;  %v4800_v58 = vld [vmem:[#allocation2 + $0x50] sm:$0xff]  ;;  %v4627_v46 = vunpack.i.h.bf16 %v6743_v9 }
 0x4c3   : > { %v6913_v42 = vpop.f32.mrf.mxu3  ;;  %8630 = vst [vmem:[#allocation49_spill] sm:$0xff] %v6929_v52  ;;  %v6935_v11 = vpop.f32.mrf.mxu2  ;;  %v8637_v9 = vld [vmem:[#allocation7_spill] sm:$0xff] }
 0x4c4   : > { %8627 = vst [vmem:[#allocation22_spill] sm:$0xff] %v6913_v42  ;;  %v6915_v28 = vpop.f32.mrf.mxu1 }
 0x4c5   : > { %v6982_v56 = vpop.permute.xlu2 %4684 }
 0x4c7   : > { %3068 = vmatmul.f32.gmra.mxu1 %v6921_v12  ;;  %3556 = vmatmul.f32.gmra.mxu0 %v6666_v39 }
 0x4c8   : > { %2988 = vmatmul.f32.gmra.mxu2 %v6929_v52  ;;  %3181 = vmatmul.f32.gmra.mxu3 %v6549_v41  ;;  %v6947_v52 = vsel %vm858_vm0, %v4800_v58, %v4622_v25  ;;  %v8633_v41 = vld [vmem:[#allocation8_spill] sm:$0xff] }
 0x4c9   : > { %8632 = vst [vmem:[#allocation51_spill] sm:$0xff] %v6947_v52  ;;  %v6953_v19 = vsel %vm858_vm0, %v8633_v41, %v4671_v5  ;;  %v480_v41 = vld [vmem:[%s8344_s5 + $0x2d0] sm:$0xff] }
 0x4ca   : > { %8634 = vst [vmem:[#allocation8_spill] sm:$0xff] %v6953_v19  ;;  %3378 = vmatpush.msrb.mxu1 %v480_v41 }
 0x4cb   : > { %v6939_v42 = vpop.f32.mrf.mxu3 }
 0x4cc   : > { %8631 = vst [vmem:[#allocation50_spill] sm:$0xff] %v6939_v42  ;;  %v6941_v12 = vpop.f32.mrf.mxu1  ;;  %v6955_v42 = vpop.permute.xlu0 %4674 }
 0x4cd   : > { %v4676_v58 = vunpack.i.l.bf16 %v6955_v42 }
 0x4cf   : > { %3071 = vmatmul.f32.gmra.mxu1 %v6947_v52  ;;  %3559 = vmatmul.f32.gmra.mxu0 %v6688_v63 }
 0x4d0   : > { %2991 = vmatmul.f32.gmra.mxu2 %v6953_v19  ;;  %3184 = vmatmul.f32.gmra.mxu3 %v6576_v33  ;;  %v4801_v19 = vld [vmem:[#allocation2 + $0x58] sm:$0xff] }
 0x4d1   : > { %v6974_v33 = vsel %vm858_vm0, %v4801_v19, %v4627_v46  ;;  %v4681_v19 = vunpack.i.l.bf16 %v6957_v45 }
 0x4d2   : > { %8636 = vst [vmem:[#allocation53_spill] sm:$0xff] %v6974_v33 }
 0x4d3   : > { %v2944_v25 = vpop.f32.mrf.mxu2  ;;  %v6963_v52 = vpop.f32.mrf.mxu3 }
 0x4d4   : > { %8635 = vst [vmem:[#allocation52_spill] sm:$0xff] %v6963_v52  ;;  %v6965_v47 = vpop.f32.mrf.mxu1  ;;  %v6968_v5 = vadd.f32 %v2944_v25, %v6847_v48  ;;  %v6980_v52 = vsel %vm858_vm0, %v8637_v9, %v4676_v58  ;;  %v4632_v48 = vunpack.i.h.bf16 %v6762_v0  ;;  %v6987_v25 = vpop.permute.xlu1 %4694  ;;  %v463_v9 = vld [vmem:[%s8344_s5 + $0x248] sm:$0xff]  ;;  %v4802_v0 = vld [vmem:[#allocation2 + $0x60] sm:$0xff] }
 0x4d5   : > { %8638 = vst [vmem:[#allocation7_spill] sm:$0xff] %v6980_v52  ;;  %3266 = vmatpush.msrb.mxu2 %v463_v9  ;;  %v7019_v9 = vpop.permute.xlu2 %4699 }
 0x4d7   : > { %3074 = vmatmul.f32.gmra.mxu1 %v6974_v33  ;;  %3562 = vmatmul.f32.gmra.mxu0 %v6716_v37 }
 0x4d8   : > { %2994 = vmatmul.f32.gmra.mxu2 %v6980_v52  ;;  %3187 = vmatmul.f32.gmra.mxu3 %v6605_v20  ;;  %v7000_v20 = vpop.permute.xlu0 %4689  ;;  %v7003_v52 = vsel %vm858_vm0, %v4802_v0, %v4632_v48  ;;  %v4637_v48 = vunpack.i.h.bf16 %v6784_v24  ;;  %v4686_v0 = vunpack.i.l.bf16 %v6982_v56  ;;  %v4804_v24 = vld [vmem:[#allocation2 + $0x68] sm:$0xff] }
 0x4d9   : > { %8640 = vst [vmem:[#allocation55_spill] sm:$0xff] %v7003_v52 }
 0x4db   : > { %v2947_v46 = vpop.f32.mrf.mxu2  ;;  %v6990_v41 = vpop.f32.mrf.mxu3 }
 0x4dc   : > { %8639 = vst [vmem:[#allocation54_spill] sm:$0xff] %v6990_v41  ;;  %v6992_v33 = vpop.f32.mrf.mxu1  ;;  %v6995_v58 = vadd.f32 %v2947_v46, %v6866_v35  ;;  %v7007_v41 = vld [vmem:[#allocation2 + $0xa9] sm:$0xff]  ;;  %v506_v46 = vld [vmem:[%s8344_s5 + $0x3a0] sm:$0xff] }
 0x4dd   : > { %8641 = vst [vmem:[#allocation56_spill] sm:$0xff] %v7007_v41  ;;  %v7011_v35 = vsel %vm858_vm0, %v7007_v41, %v4681_v19  ;;  %3610 = vmatpush.msra.mxu3 %v506_v46  ;;  %v7035_v46 = vsel %vm858_vm0, %v4804_v24, %v4637_v48 }
 0x4de   : > { %8642 = vst [vmem:[#allocation57_spill] sm:$0xff] %v7011_v35 }
 0x4df   : > { %3077 = vmatmul.f32.gmra.mxu1 %v7003_v52  ;;  %3565 = vmatmul.f32.gmra.mxu0 %v6738_v40  ;;  %8644 = vst [vmem:[#allocation59_spill] sm:$0xff] %v7035_v46 }
 0x4e0   : > { %2997 = vmatmul.f32.gmra.mxu2 %v7011_v35  ;;  %3190 = vmatmul.f32.gmra.mxu3 %v6629_v1  ;;  %v479_v35 = vld [vmem:[%s8344_s5 + $0x2c8] sm:$0xff]  ;;  %v7032_v1 = vpop.permute.xlu1 %4709 }
 0x4e1   : > { %3379 = vmatpush.msrb.mxu1 %v479_v35  ;;  %v4691_v35 = vunpack.i.l.bf16 %v7000_v20 }
 0x4e3   : > { %v2950_v52 = vpop.f32.mrf.mxu2  ;;  %v7022_v50 = vpop.f32.mrf.mxu3 }
 0x4e4   : > { %8643 = vst [vmem:[#allocation58_spill] sm:$0xff] %v7022_v50  ;;  %v7024_v19 = vpop.f32.mrf.mxu1  ;;  %v7027_v41 = vadd.f32 %v2950_v52, %v6888_v51  ;;  %v8645_v50 = vld [vmem:[#allocation9_spill] sm:$0xff]  ;;  %v7043_v51 = vpop.permute.xlu0 %4704  ;;  %v4642_v52 = vunpack.i.h.bf16 %v6798_v59  ;;  %v4805_v59 = vld [vmem:[#allocation2 + $0x70] sm:$0xff] }
 0x4e5   : > { %v7041_v21 = vsel %vm858_vm0, %v8645_v50, %v4686_v0  ;;  %v462_v50 = vld [vmem:[%s8344_s5 + $0x240] sm:$0xff]  ;;  %v7059_v0 = vpop.permute.xlu2 %4714 }
 0x4e6   : > { %8646 = vst [vmem:[#allocation9_spill] sm:$0xff] %v7041_v21  ;;  %3267 = vmatpush.msrb.mxu2 %v462_v50  ;;  %v4647_v50 = vunpack.i.h.bf16 %v6820_v26 }
 0x4e7   : > { %3080 = vmatmul.f32.gmra.mxu1 %v7035_v46  ;;  %3568 = vmatmul.f32.gmra.mxu0 %v6760_v10 }
 0x4e8   : > { %3000 = vmatmul.f32.gmra.mxu2 %v7041_v21  ;;  %3193 = vmatmul.f32.gmra.mxu3 %v6656_v13  ;;  %v7061_v13 = vpop.f32.mrf.mxu0  ;;  %v7064_v21 = vsel %vm858_vm0, %v4805_v59, %v4642_v52  ;;  %v7066_v10 = vpop.permute.xlu1 %4724 }
 0x4e9   : > { %8648 = vst [vmem:[#allocation61_spill] sm:$0xff] %v7061_v13  ;;  %v4726_v59 = vunpack.i.l.bf16 %v7066_v10  ;;  %v4696_v13 = vunpack.i.l.bf16 %v6987_v25 }
 0x4ea   : > { %8649 = vst [vmem:[#allocation62_spill] sm:$0xff] %v7064_v21 }
 0x4eb   : > { %v2953_v48 = vpop.f32.mrf.mxu2  ;;  %v7049_v24 = vpop.f32.mrf.mxu3 }
 0x4ec   : > { %8647 = vst [vmem:[#allocation60_spill] sm:$0xff] %v7049_v24  ;;  %v7051_v46 = vpop.f32.mrf.mxu1  ;;  %v7054_v27 = vadd.f32 %v2953_v48, %v6915_v28  ;;  %v7070_v28 = vld [vmem:[#allocation2 + $0xb9] sm:$0xff]  ;;  %v7079_v52 = vpop.permute.xlu0 %4719 }
 0x4ed   : > { %8650 = vst [vmem:[#allocation63_spill] sm:$0xff] %v7070_v28  ;;  %v7074_v48 = vsel %vm858_vm0, %v7070_v28, %v4691_v35  ;;  %v4807_v28 = vld [vmem:[#allocation2 + $0x78] sm:$0xff]  ;;  %v7100_v40 = vpop.permute.xlu2 %4729 }
 0x4ee   : > { %8651 = vst [vmem:[#allocation64_spill] sm:$0xff] %v7074_v48  ;;  %v7094_v26 = vsel %vm858_vm0, %v4807_v28, %v4647_v50  ;;  %v4652_v28 = vunpack.i.h.bf16 %v6839_v30  ;;  %v4701_v50 = vunpack.i.l.bf16 %v7019_v9 }
 0x4ef   : > { %3083 = vmatmul.f32.gmra.mxu1 %v7064_v21  ;;  %3571 = vmatmul.f32.gmra.mxu0 %v6779_v16  ;;  %8653 = vst [vmem:[#allocation66_spill] sm:$0xff] %v7094_v26 }
 0x4f0   : > { %3003 = vmatmul.f32.gmra.mxu2 %v7074_v48  ;;  %3196 = vmatmul.f32.gmra.mxu3 %v6343_v18  ;;  %v478_v18 = vld [vmem:[%s8344_s5 + $0x2c0] sm:$0xff]  ;;  %v8654_v48 = vld [vmem:[#allocation10_spill] sm:$0xff] }
 0x4f1   : > { %v7098_v34 = vsel %vm858_vm0, %v8654_v48, %v4726_v59  ;;  %3380 = vmatpush.msrb.mxu1 %v478_v18  ;;  %v4732_v48 = vunpack.i.h.bf16 %v7100_v40 }
 0x4f3   : > { %v2956_v24 = vpop.f32.mrf.mxu2  ;;  %v7083_v21 = vpop.f32.mrf.mxu3 }
 0x4f4   : > { %8652 = vst [vmem:[#allocation65_spill] sm:$0xff] %v7083_v21  ;;  %v7085_v16 = vpop.f32.mrf.mxu1  ;;  %v7088_v35 = vadd.f32 %v2956_v24, %v6941_v12  ;;  %v7104_v12 = vld [vmem:[#allocation2 + $0xc1] sm:$0xff]  ;;  %v7110_v21 = vpop.f32.mrf.mxu0 }
 0x4f5   : > { %8655 = vst [vmem:[#allocation10_spill] sm:$0xff] %v7104_v12  ;;  %v7108_v24 = vsel %vm858_vm0, %v7104_v12, %v4696_v13  ;;  %v7124_v12 = vpop.permute.xlu0 %4734 }
 0x4f6   : > { %8656 = vst [vmem:[#allocation67_spill] sm:$0xff] %v7108_v24 }
 0x4f7   : > { %3086 = vmatmul.f32.gmra.mxu1 %v7094_v26  ;;  %3574 = vmatmul.f32.gmra.mxu0 %v7098_v34  ;;  %8657 = vst [vmem:[#allocation68_spill] sm:$0xff] %v7110_v21  ;;  %v4809_v21 = vld [vmem:[#allocation2 + $0x80] sm:$0xff] }
 0x4f8   : > { %3006 = vmatmul.f32.gmra.mxu2 %v7108_v24  ;;  %3199 = vmatmul.f32.gmra.mxu3 %v6383_v8  ;;  %v461_v8 = vld [vmem:[%s8344_s5 + $0x238] sm:$0xff]  ;;  %v7130_v30 = vsel %vm858_vm0, %v4809_v21, %v4652_v28  ;;  %v7134_v24 = vsel %vm858_vm0, %v6429_v53, %v4732_v48  ;;  %v4657_v53 = vunpack.i.h.bf16 %v6858_v36  ;;  %v4811_v36 = vld [vmem:[#allocation2 + $0x88] sm:$0xff] }
 0x4f9   : > { %8659 = vst [vmem:[#allocation70_spill] sm:$0xff] %v7130_v30  ;;  %3268 = vmatpush.msrb.mxu2 %v461_v8  ;;  %v505_v21 = vld [vmem:[%s8344_s5 + $0x398] sm:$0xff]  ;;  %v4706_v8 = vunpack.i.l.bf16 %v7043_v51 }
 0x4fa   : > { %8660 = vst [vmem:[#allocation71_spill] sm:$0xff] %v7134_v24  ;;  %3611 = vmatpush.msra.mxu3 %v505_v21  ;;  %v7169_v21 = vsel %vm858_vm0, %v4811_v36, %v4657_v53 }
 0x4fb   : > { %v2959_v59 = vpop.f32.mrf.mxu2  ;;  %v7117_v18 = vpop.f32.mrf.mxu3  ;;  %8665 = vst [vmem:[#allocation76_spill] sm:$0xff] %v7169_v21 }
 0x4fc   : > { %8658 = vst [vmem:[#allocation69_spill] sm:$0xff] %v7117_v18  ;;  %v7119_v26 = vpop.f32.mrf.mxu1  ;;  %v7122_v13 = vadd.f32 %v2959_v59, %v6965_v47  ;;  %v7136_v18 = vpop.permute.xlu1 %4739  ;;  %v7140_v47 = vld [vmem:[#allocation2 + $0xc9] sm:$0xff] }
 0x4fd   : > { %8661 = vst [vmem:[#allocation72_spill] sm:$0xff] %v7140_v47  ;;  %v7144_v59 = vsel %vm858_vm0, %v7140_v47, %v4701_v50  ;;  %v4741_v28 = vunpack.i.l.bf16 %v7136_v18  ;;  %v7153_v48 = vpop.f32.mrf.mxu0 }
 0x4fe   : > { %8662 = vst [vmem:[#allocation73_spill] sm:$0xff] %v7144_v59 }
 0x4ff   : > { %3089 = vmatmul.f32.gmra.mxu1 %v7130_v30  ;;  %3577 = vmatmul.f32.gmra.mxu0 %v7134_v24  ;;  %8663 = vst [vmem:[#allocation74_spill] sm:$0xff] %v7153_v48  ;;  %v7173_v48 = vsel %vm858_vm0, %v6460_v61, %v4741_v28  ;;  %v4662_v61 = vunpack.i.h.bf16 %v6880_v57  ;;  %v4711_v28 = vunpack.i.l.bf16 %v7032_v1 }
 0x500   : > { %3009 = vmatmul.f32.gmra.mxu2 %v7144_v59  ;;  %3202 = vmatmul.f32.gmra.mxu3 %v6422_v14  ;;  %v7163_v59 = vpop.permute.xlu2 %2530  ;;  %v477_v14 = vld [vmem:[%s8344_s5 + $0x2b8] sm:$0xff]  ;;  %8666 = vst [vmem:[#allocation77_spill] sm:$0xff] %v7173_v48 }
 0x501   : > { %3381 = vmatpush.msrb.mxu1 %v477_v14 }
 0x503   : > { %v2962_v30 = vpop.f32.mrf.mxu2  ;;  %v7156_v50 = vpop.f32.mrf.mxu3 }
 0x504   : > { %8664 = vst [vmem:[#allocation75_spill] sm:$0xff] %v7156_v50  ;;  %v7158_v47 = vpop.f32.mrf.mxu1  ;;  %v7161_v24 = vadd.f32 %v2962_v30, %v6992_v33  ;;  %v7175_v50 = vpop.permute.xlu0 %4744  ;;  %v7179_v33 = vld [vmem:[#allocation2 + $0xd1] sm:$0xff] }
 0x505   : > { %8667 = vst [vmem:[#allocation78_spill] sm:$0xff] %v7179_v33  ;;  %v7183_v30 = vsel %vm858_vm0, %v7179_v33, %v4706_v8  ;;  %v4746_v53 = vunpack.i.l.bf16 %v7175_v50  ;;  %v7197_v8 = vpop.f32.mrf.mxu0  ;;  %v4813_v33 = vld [vmem:[#allocation2 + $0x90] sm:$0xff] }
 0x506   : > { %8668 = vst [vmem:[#allocation79_spill] sm:$0xff] %v7183_v30  ;;  %v7203_v57 = vsel %vm858_vm0, %v4813_v33, %v4662_v61  ;;  %v4716_v61 = vunpack.i.l.bf16 %v7059_v0 }
 0x507   : > { %3092 = vmatmul.f32.gmra.mxu1 %v7169_v21  ;;  %3580 = vmatmul.f32.gmra.mxu0 %v7173_v48  ;;  %8670 = vst [vmem:[#allocation81_spill] sm:$0xff] %v7197_v8 }
 0x508   : > { %3012 = vmatmul.f32.gmra.mxu2 %v7183_v30  ;;  %3205 = vmatmul.f32.gmra.mxu3 %v6446_v29  ;;  %v460_v29 = vld [vmem:[%s8344_s5 + $0x230] sm:$0xff]  ;;  %8671 = vst [vmem:[#allocation82_spill] sm:$0xff] %v7203_v57  ;;  %v7207_v30 = vsel %vm858_vm0, %v6462_v4, %v4746_v53  ;;  %v4667_v4 = vunpack.i.h.bf16 %v6905_v32 }
 0x509   : > { %3269 = vmatpush.msrb.mxu2 %v460_v29 }
 0x50b   : > { %v2965_v14 = vpop.f32.mrf.mxu2  ;;  %v7190_v36 = vpop.f32.mrf.mxu3 }
 0x50c   : > { %8669 = vst [vmem:[#allocation80_spill] sm:$0xff] %v7190_v36  ;;  %v7192_v21 = vpop.f32.mrf.mxu1  ;;  %v7195_v48 = vadd.f32 %v2965_v14, %v7024_v19  ;;  %v7209_v36 = vpop.permute.xlu2 %4754  ;;  %v7213_v19 = vld [vmem:[#allocation2 + $0xd9] sm:$0xff] }
 0x50d   : > { %8672 = vst [vmem:[#allocation83_spill] sm:$0xff] %v7209_v36  ;;  %v7217_v14 = vsel %vm858_vm0, %v7213_v19, %v4711_v28  ;;  %v4757_v33 = vunpack.i.h.bf16 %v7209_v36  ;;  %v476_v28 = vld [vmem:[%s8344_s5 + $0x2b0] sm:$0xff]  ;;  %v7237_v36 = vpop.f32.mrf.mxu0 }
 0x50e   : > { %8673 = vst [vmem:[#allocation84_spill] sm:$0xff] %v7213_v19  ;;  %v4815_v19 = vld [vmem:[#allocation2 + $0x98] sm:$0xff]  ;;  %3382 = vmatpush.msrb.mxu1 %v476_v28 }
 0x50f   : > { %3095 = vmatmul.f32.gmra.mxu1 %v7203_v57  ;;  %3583 = vmatmul.f32.gmra.mxu0 %v7207_v30  ;;  %v2738_v32 = vsel %vm858_vm0, %v6439_v3, %v4757_v33  ;;  %8675 = vst [vmem:[#allocation86_spill] sm:$0xff] %v7237_v36  ;;  %v4672_v3 = vunpack.i.h.bf16 %v6931_v55  ;;  %v457_v55 = vld [vmem:[%s8344_s5 + $0x218] sm:$0xff] }
 0x510   : > { %3015 = vmatmul.f32.gmra.mxu2 %v7217_v14  ;;  %3208 = vmatmul.f32.gmra.mxu3 %v6475_v23  ;;  %v7233_v23 = vsel %vm858_vm0, %v4815_v19, %v4667_v4  ;;  %v459_v19 = vld [vmem:[%s8344_s5 + $0x228] sm:$0xff]  ;;  %v2939_v4 = vadd.f32 %v6909_v22, %v6806_v31  ;;  %v458_v31 = vld [vmem:[%s8344_s5 + $0x220] sm:$0xff] }
 0x511   : > { %3270 = vmatpush.msrb.mxu2 %v459_v19  ;;  %v4817_v22 = vld [vmem:[#allocation2 + $0xa0] sm:$0xff]  ;;  %v504_v19 = vld [vmem:[%s8344_s5 + $0x390] sm:$0xff] }
 0x512   : > { %3612 = vmatpush.msra.mxu3 %v504_v19 }
 0x513   : > { %v2968_v53 = vpop.f32.mrf.mxu2  ;;  %v7224_v29 = vpop.f32.mrf.mxu3  ;;  %3271 = vmatpush.msrb.mxu2 %v458_v31 }
 0x514   : > { %8674 = vst [vmem:[#allocation85_spill] sm:$0xff] %v7224_v29  ;;  %v3051_v8 = vpop.f32.mrf.mxu1  ;;  %v7227_v57 = vadd.f32 %v2968_v53, %v7051_v46  ;;  %v7240_v29 = vld [vmem:[#allocation2 + $0xe1] sm:$0xff]  ;;  %v4721_v53 = vunpack.i.l.bf16 %v7079_v52 }
 0x515   : > { %8676 = vst [vmem:[#allocation87_spill] sm:$0xff] %v7240_v29  ;;  %v7244_v46 = vsel %vm858_vm0, %v7240_v29, %v4716_v61  ;;  %v3052_v33 = vadd.f32 %v3051_v8, %v2939_v4  ;;  %v7270_v8 = vld [vmem:[#allocation2 + $0xe9] sm:$0xff]  ;;  %v2942_v4 = vadd.f32 %v6935_v11, %v6828_v38  ;;  %3272 = vmatpush.msrb.mxu2 %v457_v55 }
 0x516   : > { %v4819_v55 = vld [vmem:[#allocation2 + $0xa8] sm:$0xff] }
 0x517   : > { %3098 = vmatmul.f32.gmra.mxu1 %v7233_v23  ;;  %3586 = vmatmul.f32.gmra.mxu0 %v2738_v32 }
 0x518   : > { %3018 = vmatmul.f32.gmra.mxu2 %v7244_v46  ;;  %3211 = vmatmul.f32.gmra.mxu3 %v6498_v49  ;;  %v7264_v49 = vsel %vm858_vm0, %v4817_v22, %v4672_v3  ;;  %v456_v3 = vld [vmem:[%s8344_s5 + $0x210] sm:$0xff] }
 0x519   : > { %3273 = vmatpush.msrb.mxu2 %v456_v3 }
 0x51b   : > { %v2971_v28 = vpop.f32.mrf.mxu2  ;;  %v3164_v61 = vpop.f32.mrf.mxu3 }
 0x51c   : > { %v3054_v32 = vpop.f32.mrf.mxu1  ;;  %v7256_v36 = vadd.f32 %v2971_v28, %v7085_v16  ;;  %v7258_v29 = vadd.f32 %v3164_v61, %v3052_v33  ;;  %v7274_v16 = vsel %vm858_vm0, %v7270_v8, %v4721_v53  ;;  %v4677_v33 = vunpack.i.h.bf16 %v6955_v42  ;;  %v455_v28 = vld [vmem:[%s8344_s5 + $0x208] sm:$0xff]  ;;  %v454_v42 = vld [vmem:[%s8344_s5 + $0x200] sm:$0xff] }
 0x51d   : > { %v3055_v53 = vadd.f32 %v3054_v32, %v2942_v4  ;;  %v4727_v61 = vunpack.i.h.bf16 %v7066_v10  ;;  %3274 = vmatpush.msrb.mxu2 %v455_v28  ;;  %v475_v32 = vld [vmem:[%s8344_s5 + $0x2a8] sm:$0xff]  ;;  %v4682_v4 = vunpack.i.h.bf16 %v6957_v45 }
 0x51e   : > { %v7303_v10 = vsel %vm858_vm0, %v4819_v55, %v4677_v33  ;;  %3383 = vmatpush.msrb.mxu1 %v475_v32  ;;  %v4736_v33 = vunpack.i.l.bf16 %v7124_v12 }
 0x51f   : > { %3101 = vmatmul.f32.gmra.mxu1 %v7264_v49  ;;  %3275 = vmatpush.msrb.mxu2 %v454_v42 }
 0x520   : > { %3021 = vmatmul.f32.gmra.mxu2 %v7274_v16  ;;  %3214 = vmatmul.f32.gmra.mxu3 %v6528_v44 }
 0x523   : > { %v2974_v38 = vpop.f32.mrf.mxu2  ;;  %v3167_v11 = vpop.f32.mrf.mxu3 }
 0x524   : > { %v3057_v31 = vpop.f32.mrf.mxu1  ;;  %v7292_v44 = vadd.f32 %v2974_v38, %v7119_v26  ;;  %v7294_v22 = vadd.f32 %v3167_v11, %v3055_v53  ;;  %v7306_v26 = vld [vmem:[#allocation2 + $0xf1] sm:$0xff] }
 0x525   : > { %v7310_v19 = vsel %vm858_vm0, %v7306_v26, %v4727_v61  ;;  %v3058_v3 = vadd.f32 %v3057_v31, %v6968_v5  ;;  %v4821_v61 = vld [vmem:[#allocation2 + $0xb0] sm:$0xff]  ;;  %v4687_v5 = vunpack.i.h.bf16 %v6982_v56  ;;  %v4742_v31 = vunpack.i.h.bf16 %v7136_v18  ;;  %v7349_v56 = vld [vmem:[#allocation2 + $0x101] sm:$0xff] }
 0x526   : > { %v7323_v42 = vsel %vm858_vm0, %v4821_v61, %v4682_v4  ;;  %v4823_v61 = vld [vmem:[#allocation2 + $0xb8] sm:$0xff]  ;;  %v4692_v18 = vunpack.i.h.bf16 %v7000_v20 }
 0x527   : > { %3104 = vmatmul.f32.gmra.mxu1 %v7303_v10 }
 0x528   : > { %3024 = vmatmul.f32.gmra.mxu2 %v7310_v19  ;;  %3217 = vmatmul.f32.gmra.mxu3 %v6555_v7  ;;  %v7326_v7 = vld [vmem:[#allocation2 + $0xf9] sm:$0xff] }
 0x529   : > { %v7330_v45 = vsel %vm858_vm0, %v7326_v7, %v4736_v33  ;;  %v474_v33 = vld [vmem:[%s8344_s5 + $0x2a0] sm:$0xff] }
 0x52a   : > { %3384 = vmatpush.msrb.mxu1 %v474_v33 }
 0x52b   : > { %v2977_v53 = vpop.f32.mrf.mxu2  ;;  %v3170_v28 = vpop.f32.mrf.mxu3 }
 0x52c   : > { %v3060_v38 = vpop.f32.mrf.mxu1  ;;  %v7318_v11 = vadd.f32 %v2977_v53, %v7158_v47  ;;  %v7320_v32 = vadd.f32 %v3170_v28, %v3058_v3 }
 0x52d   : > { %v3061_v47 = vadd.f32 %v3060_v38, %v6995_v58  ;;  %v7353_v58 = vsel %vm858_vm0, %v7349_v56, %v4742_v31 }
 0x52f   : > { %3107 = vmatmul.f32.gmra.mxu1 %v7323_v42 }
 0x530   : > { %3027 = vmatmul.f32.gmra.mxu2 %v7330_v45  ;;  %3220 = vmatmul.f32.gmra.mxu3 %v6584_v60  ;;  %v7346_v60 = vsel %vm858_vm0, %v4823_v61, %v4687_v5 }
 0x533   : > { %v2980_v55 = vpop.f32.mrf.mxu2  ;;  %v3173_v4 = vpop.f32.mrf.mxu3 }
 0x534   : > { %v3063_v3 = vpop.f32.mrf.mxu1  ;;  %v7338_v53 = vadd.f32 %v2980_v55, %v7192_v21  ;;  %v7340_v28 = vadd.f32 %v3173_v4, %v3061_v47  ;;  %v4825_v4 = vld [vmem:[#allocation2 + $0xc0] sm:$0xff] }
 0x535   : > { %v3064_v21 = vadd.f32 %v3063_v3, %v7027_v41  ;;  %v7364_v33 = vsel %vm858_vm0, %v4825_v4, %v4692_v18  ;;  %v4697_v41 = vunpack.i.h.bf16 %v6987_v25 }
 0x537   : > { %3110 = vmatmul.f32.gmra.mxu1 %v7346_v60 }
 0x538   : > { %3030 = vmatmul.f32.gmra.mxu2 %v7353_v58  ;;  %3223 = vmatmul.f32.gmra.mxu3 %v6613_v43  ;;  %v503_v43 = vld [vmem:[%s8344_s5 + $0x388] sm:$0xff] }
 0x539   : > { %3613 = vmatpush.msra.mxu3 %v503_v43 }
 0x53b   : > { %v7359_v38 = vpop.f32.mrf.mxu2  ;;  %v3176_v5 = vpop.f32.mrf.mxu3 }
 0x53c   : > { %v3066_v47 = vpop.f32.mrf.mxu1  ;;  %v7361_v55 = vadd.f32 %v3176_v5, %v3064_v21  ;;  %v473_v21 = vld [vmem:[%s8344_s5 + $0x298] sm:$0xff]  ;;  %v4826_v5 = vld [vmem:[#allocation2 + $0xc8] sm:$0xff] }
 0x53d   : > { %v3067_v20 = vadd.f32 %v3066_v47, %v7054_v27  ;;  %3385 = vmatpush.msrb.mxu1 %v473_v21  ;;  %v472_v21 = vld [vmem:[%s8344_s5 + $0x290] sm:$0xff] }
 0x53f   : > { %3113 = vmatmul.f32.gmra.mxu1 %v7364_v33 }
 0x540   : > { %3276 = vmatmul.f32.vlgmr.msrb.gmra.mxu2 %v6635_v17  ;;  %3226 = vmatmul.f32.gmra.mxu3 %v6639_v15  ;;  %v7382_v17 = vsel %vm858_vm0, %v4826_v5, %v4697_v41  ;;  %v4702_v15 = vunpack.i.h.bf16 %v7019_v9  ;;  %v4828_v5 = vld [vmem:[#allocation2 + $0xd8] sm:$0xff] }
 0x541   : > { %3386 = vmatpush.msrb.mxu1 %v472_v21  ;;  %v471_v21 = vld [vmem:[%s8344_s5 + $0x288] sm:$0xff] }
 0x543   : > { %v7374_v31 = vpop.f32.mrf.mxu2  ;;  %v3179_v3 = vpop.f32.mrf.mxu3  ;;  %3387 = vmatpush.msrb.mxu1 %v471_v21 }
 0x544   : > { %v3069_v61 = vpop.f32.mrf.mxu1  ;;  %v7376_v18 = vadd.f32 %v3179_v3, %v3067_v20  ;;  %v4827_v20 = vld [vmem:[#allocation2 + $0xd0] sm:$0xff] }
 0x545   : > { %v3070_v27 = vadd.f32 %v3069_v61, %v7088_v35  ;;  %v7394_v41 = vsel %vm858_vm0, %v4827_v20, %v4702_v15 }
 0x547   : > { %3116 = vmatmul.f32.gmra.mxu1 %v7382_v17 }
 0x548   : > { %3279 = vmatmul.f32.gmra.mxu2 %v6662_v54  ;;  %3229 = vmatmul.f32.gmra.mxu3 %v6666_v39  ;;  %v4707_v54 = vunpack.i.h.bf16 %v7043_v51 }
 0x54a   : > { %v7409_v15 = vsel %vm858_vm0, %v4828_v5, %v4707_v54  ;;  %v4830_v5 = vld [vmem:[#allocation2 + $0xe8] sm:$0xff] }
 0x54b   : > { %v7389_v25 = vpop.f32.mrf.mxu2  ;;  %v3182_v47 = vpop.f32.mrf.mxu3 }
 0x54c   : > { %v3072_v4 = vpop.f32.mrf.mxu1  ;;  %v7391_v43 = vadd.f32 %v3182_v47, %v3070_v27 }
 0x54d   : > { %v3073_v39 = vadd.f32 %v3072_v4, %v7122_v13  ;;  %v4829_v4 = vld [vmem:[#allocation2 + $0xe0] sm:$0xff] }
 0x54f   : > { %3119 = vmatmul.f32.gmra.mxu1 %v7394_v41 }
 0x550   : > { %3282 = vmatmul.f32.gmra.mxu2 %v6684_v6  ;;  %3232 = vmatmul.f32.gmra.mxu3 %v6688_v63  ;;  %v4712_v6 = vunpack.i.h.bf16 %v7032_v1  ;;  %v4717_v1 = vunpack.i.h.bf16 %v7059_v0  ;;  %v8680_v0 = vld [vmem:[#allocation12_spill] sm:$0xff] }
 0x552   : > { %v7421_v20 = vsel %vm858_vm0, %v4829_v4, %v4712_v6  ;;  %v4722_v6 = vunpack.i.h.bf16 %v7079_v52  ;;  %v4731_v52 = vunpack.i.l.bf16 %v7100_v40  ;;  %v8685_v40 = vld [vmem:[#allocation19_spill] sm:$0xff] }
 0x553   : > { %v7401_v9 = vpop.f32.mrf.mxu2  ;;  %v3185_v35 = vpop.f32.mrf.mxu3 }
 0x554   : > { %v3075_v3 = vpop.f32.mrf.mxu1  ;;  %v7403_v61 = vadd.f32 %v3185_v35, %v3073_v39 }
 0x555   : > { %v3076_v63 = vadd.f32 %v3075_v3, %v7161_v24 }
 0x557   : > { %3122 = vmatmul.f32.gmra.mxu1 %v7409_v15 }
 0x558   : > { %3285 = vmatmul.f32.gmra.mxu2 %v6712_v2  ;;  %3235 = vmatmul.f32.gmra.mxu3 %v6716_v37  ;;  %v502_v2 = vld [vmem:[%s8344_s5 + $0x380] sm:$0xff]  ;;  %v8678_v37 = vld [vmem:[#allocation11_spill] sm:$0xff] }
 0x559   : > { %3614 = vmatpush.msra.mxu3 %v502_v2 }
 0x55b   : > { %v7416_v51 = vpop.f32.mrf.mxu2  ;;  %v3188_v13 = vpop.f32.mrf.mxu3 }
 0x55c   : > { %v3078_v27 = vpop.f32.mrf.mxu1  ;;  %v7418_v47 = vadd.f32 %v3188_v13, %v3076_v63 }
 0x55d   : > { %v3079_v24 = vadd.f32 %v3078_v27, %v7195_v48  ;;  %v8681_v48 = vld [vmem:[#allocation13_spill] sm:$0xff] }
 0x55e   : > { %8677 = vst [vmem:[#allocation88_spill] sm:$0xff] %v7418_v47  ;;  %v8709_v47 = vld [vmem:[#allocation53_spill] sm:$0xff] }
 0x55f   : > { %3125 = vmatmul.f32.gmra.mxu1 %v7421_v20 }
 0x560   : > { %3288 = vmatmul.f32.gmra.mxu2 %v6734_v62  ;;  %3238 = vmatmul.f32.gmra.mxu3 %v8678_v37  ;;  %v7439_v62 = vsel %vm858_vm0, %v4830_v5, %v4717_v1  ;;  %v4831_v37 = vld [vmem:[#allocation2 + $0xf0] sm:$0xff] }
 0x561   : > { %v7451_v1 = vsel %vm858_vm0, %v4831_v37, %v4722_v6  ;;  %v4832_v6 = vld [vmem:[#allocation2 + $0xf8] sm:$0xff] }
 0x563   : > { %v7431_v54 = vpop.f32.mrf.mxu2  ;;  %v3191_v39 = vpop.f32.mrf.mxu3 }
 0x564   : > { %v3081_v35 = vpop.f32.mrf.mxu1  ;;  %v7433_v3 = vadd.f32 %v3191_v39, %v3079_v24  ;;  %v8682_v24 = vld [vmem:[#allocation14_spill] sm:$0xff]  ;;  %v8683_v39 = vld [vmem:[#allocation15_spill] sm:$0xff] }
 0x565   : > { %v3082_v63 = vadd.f32 %v3081_v35, %v7227_v57 }
 0x566   : > { %8679 = vst [vmem:[#allocation11_spill] sm:$0xff] %v7433_v3  ;;  %v8701_v3 = vld [vmem:[#allocation21_spill] sm:$0xff] }
 0x567   : > { %3128 = vmatmul.f32.gmra.mxu1 %v7439_v62 }
 0x568   : > { %3291 = vmatmul.f32.gmra.mxu2 %v8680_v0  ;;  %3241 = vmatmul.f32.gmra.mxu3 %v8681_v48  ;;  %v470_v48 = vld [vmem:[%s8344_s5 + $0x280] sm:$0xff] }
 0x569   : > { %3388 = vmatpush.msrb.mxu1 %v470_v48  ;;  %v8688_v48 = vld [vmem:[#allocation71_spill] sm:$0xff] }
 0x56b   : > { %v7446_v13 = vpop.f32.mrf.mxu2  ;;  %v3194_v27 = vpop.f32.mrf.mxu3 }
 0x56c   : > { %v3084_v4 = vpop.f32.mrf.mxu1  ;;  %v7448_v2 = vadd.f32 %v3194_v27, %v3082_v63  ;;  %v7466_v63 = vsel %vm858_vm0, %v4832_v6, %v4731_v52 }
 0x56d   : > { %v3085_v57 = vadd.f32 %v3084_v4, %v7256_v36  ;;  %8684 = vst [vmem:[#allocation12_spill] sm:$0xff] %v7466_v63  ;;  %v4737_v36 = vunpack.i.h.bf16 %v7124_v12 }
 0x56f   : > { %3131 = vmatmul.f32.gmra.mxu1 %v7451_v1 }
 0x570   : > { %3294 = vmatmul.f32.gmra.mxu2 %v8682_v24  ;;  %3244 = vmatmul.f32.gmra.mxu3 %v8683_v39 }
 0x573   : > { %v7458_v35 = vpop.f32.mrf.mxu2  ;;  %v3197_v21 = vpop.f32.mrf.mxu3 }
 0x574   : > { %v3087_v5 = vpop.f32.mrf.mxu1  ;;  %v7460_v0 = vadd.f32 %v3197_v21, %v3085_v57  ;;  %v4833_v57 = vld [vmem:[#allocation2 + $0x100] sm:$0xff] }
 0x575   : > { %v3088_v27 = vadd.f32 %v3087_v5, %v7292_v44  ;;  %v7478_v52 = vsel %vm858_vm0, %v4833_v57, %v4737_v36  ;;  %v8687_v21 = vld [vmem:[#allocation25_spill] sm:$0xff]  ;;  %v8690_v36 = vld [vmem:[#allocation34_spill] sm:$0xff]  ;;  %v4747_v57 = vunpack.i.h.bf16 %v7175_v50 }
 0x576   : > { %8686 = vst [vmem:[#allocation13_spill] sm:$0xff] %v7478_v52 }
 0x577   : > { %3134 = vmatmul.f32.gmra.mxu1 %v7466_v63  ;;  %v8705_v63 = vld [vmem:[#allocation51_spill] sm:$0xff] }
 0x578   : > { %3297 = vmatmul.f32.gmra.mxu2 %v8685_v40  ;;  %3247 = vmatmul.f32.gmra.mxu3 %v7098_v34  ;;  %v4834_v40 = vld [vmem:[#allocation2 + $0x108] sm:$0xff] }
 0x57b   : > { %v7473_v4 = vpop.f32.mrf.mxu2  ;;  %v3200_v37 = vpop.f32.mrf.mxu3 }
 0x57c   : > { %v3090_v24 = vpop.f32.mrf.mxu1  ;;  %v7475_v39 = vadd.f32 %v3200_v37, %v3088_v27  ;;  %v7490_v27 = vsel %vm858_vm0, %v4834_v40, %v7163_v59  ;;  %v8691_v37 = vld [vmem:[#allocation77_spill] sm:$0xff]  ;;  %v8693_v40 = vld [vmem:[#allocation16_spill] sm:$0xff] }
 0x57d   : > { %v3091_v34 = vadd.f32 %v3090_v24, %v7318_v11  ;;  %8689 = vst [vmem:[#allocation14_spill] sm:$0xff] %v7490_v27 }
 0x57f   : > { %3137 = vmatmul.f32.gmra.mxu1 %v7478_v52  ;;  %v4836_v52 = vld [vmem:[#allocation2 + $0x49] sm:$0xff] }
 0x580   : > { %3300 = vmatmul.f32.gmra.mxu2 %v8687_v21  ;;  %3250 = vmatmul.f32.gmra.mxu3 %v8688_v48 }
 0x583   : > { %v7484_v12 = vpop.f32.mrf.mxu2  ;;  %v3203_v44 = vpop.f32.mrf.mxu3 }
 0x584   : > { %v3093_v5 = vpop.f32.mrf.mxu1  ;;  %v7486_v6 = vadd.f32 %v3203_v44, %v3091_v34  ;;  %v4835_v44 = vld [vmem:[#allocation2 + $0x110] sm:$0xff] }
 0x585   : > { %v3094_v11 = vadd.f32 %v3093_v5, %v7338_v53  ;;  %v7502_v59 = vsel %vm858_vm0, %v4835_v44, %v4747_v57  ;;  %v8696_v57 = vld [vmem:[#allocation20_spill] sm:$0xff] }
 0x586   : > { %8692 = vst [vmem:[#allocation15_spill] sm:$0xff] %v7502_v59  ;;  %v2987_v44 = vadd.f32 %v7374_v31, %v8696_v57  ;;  %v4837_v31 = vld [vmem:[#allocation2 + $0x51] sm:$0xff] }
 0x587   : > { %3140 = vmatmul.f32.gmra.mxu1 %v7490_v27 }
 0x588   : > { %3303 = vmatmul.f32.gmra.mxu2 %v8690_v36  ;;  %3253 = vmatmul.f32.gmra.mxu3 %v8691_v37  ;;  %v2984_v36 = vadd.f32 %v7359_v38, %v8693_v40  ;;  %v8694_v37 = vld [vmem:[#allocation43_spill] sm:$0xff] }
 0x58b   : > { %v7497_v24 = vpop.f32.mrf.mxu2  ;;  %v3206_v21 = vpop.f32.mrf.mxu3 }
 0x58c   : > { %v3096_v48 = vpop.f32.mrf.mxu1  ;;  %v7499_v34 = vadd.f32 %v3206_v21, %v3094_v11  ;;  %v8695_v21 = vld [vmem:[#allocation46_spill] sm:$0xff] }
 0x58d   : > { %v3097_v50 = vadd.f32 %v3096_v48, %v2984_v36 }
 0x58f   : > { %3143 = vmatmul.f32.gmra.mxu1 %v7502_v59  ;;  %v8697_v59 = vld [vmem:[#allocation47_spill] sm:$0xff] }
 0x590   : > { %3306 = vmatmul.f32.gmra.mxu2 %v8694_v37  ;;  %3256 = vmatmul.f32.gmra.mxu3 %v7207_v30  ;;  %v8698_v37 = vld [vmem:[#allocation18_spill] sm:$0xff] }
 0x593   : > { %v7509_v53 = vpop.f32.mrf.mxu2  ;;  %v3209_v5 = vpop.f32.mrf.mxu3 }
 0x594   : > { %v3099_v27 = vpop.f32.mrf.mxu1  ;;  %v7511_v11 = vadd.f32 %v3209_v5, %v3097_v50  ;;  %v8699_v50 = vld [vmem:[#allocation26_spill] sm:$0xff] }
 0x595   : > { %v3100_v38 = vadd.f32 %v3099_v27, %v2987_v44  ;;  %v2990_v5 = vadd.f32 %v7389_v25, %v8699_v50  ;;  %v4838_v25 = vld [vmem:[#allocation2 + $0x59] sm:$0xff] }
 0x597   : > { %3389 = vmatmul.f32.vlgmr.msrb.gmra.mxu1 %v8695_v21  ;;  %v8700_v21 = vld [vmem:[#allocation17_spill] sm:$0xff] }
 0x598   : > { %3309 = vmatmul.f32.gmra.mxu2 %v8697_v59  ;;  %4391 = vmatmul.msk.f32.vlgmr.msra.gmra.mxu3 %vm858_vm0, %v4836_v52 }
 0x59b   : > { %v7518_v40 = vpop.f32.mrf.mxu2  ;;  %v3212_v30 = vpop.f32.mrf.mxu3 }
 0x59c   : > { %v3102_v48 = vpop.f32.mrf.mxu1  ;;  %v7520_v36 = vadd.f32 %v3212_v30, %v3100_v38  ;;  %v8702_v38 = vld [vmem:[#allocation35_spill] sm:$0xff] }
 0x59d   : > { %v3103_v59 = vadd.f32 %v3102_v48, %v2990_v5  ;;  %v2993_v30 = vadd.f32 %v7401_v9, %v8702_v38  ;;  %v4839_v9 = vld [vmem:[#allocation2 + $0x61] sm:$0xff] }
 0x59f   : > { %3392 = vmatmul.f32.gmra.mxu1 %v8698_v37  ;;  %v8703_v37 = vld [vmem:[#allocation49_spill] sm:$0xff] }
 0x5a0   : > { %3312 = vmatmul.f32.gmra.mxu2 %v8700_v21  ;;  %4392 = vmatmul.msk.f32.gmra.mxu3 %vm858_vm0, %v4837_v31 }
 0x5a3   : > { %v7527_v57 = vpop.f32.mrf.mxu2  ;;  %v3215_v52 = vpop.f32.mrf.mxu3 }
 0x5a4   : > { %v3105_v27 = vpop.f32.mrf.mxu1  ;;  %v7529_v44 = vadd.f32 %v3215_v52, %v3103_v59  ;;  %v8706_v59 = vld [vmem:[#allocation44_spill] sm:$0xff] }
 0x5a5   : > { %v3106_v50 = vadd.f32 %v3105_v27, %v2993_v30  ;;  %v8707_v52 = vld [vmem:[#allocation8_spill] sm:$0xff] }
 0x5a7   : > { %3395 = vmatmul.f32.gmra.mxu1 %v8701_v3  ;;  %v2996_v3 = vadd.f32 %v7416_v51, %v8706_v59  ;;  %v4840_v51 = vld [vmem:[#allocation2 + $0x69] sm:$0xff] }
 0x5a8   : > { %3315 = vmatmul.f32.gmra.mxu2 %v8703_v37  ;;  %4393 = vmatmul.msk.f32.gmra.mxu3 %vm858_vm0, %v4838_v25 }
 0x5ab   : > { %v7536_v21 = vpop.f32.mrf.mxu2  ;;  %v3218_v48 = vpop.f32.mrf.mxu3 }
 0x5ac   : > { %v3108_v5 = vpop.f32.mrf.mxu1  ;;  %v7538_v31 = vadd.f32 %v3218_v48, %v3106_v50  ;;  %v8710_v50 = vld [vmem:[#allocation32_spill] sm:$0xff]  ;;  %v8711_v48 = vld [vmem:[#allocation7_spill] sm:$0xff] }
 0x5ad   : > { %v3109_v38 = vadd.f32 %v3108_v5, %v2996_v3 }
 0x5ae   : > { %8704 = vst [vmem:[#allocation19_spill] sm:$0xff] %v7538_v31  ;;  %v8713_v31 = vld [vmem:[#allocation55_spill] sm:$0xff] }
 0x5af   : > { %3398 = vmatmul.f32.gmra.mxu1 %v8705_v63  ;;  %v2999_v63 = vadd.f32 %v7431_v54, %v8710_v50  ;;  %v4841_v54 = vld [vmem:[#allocation2 + $0x71] sm:$0xff] }
 0x5b0   : > { %3318 = vmatmul.f32.gmra.mxu2 %v8707_v52  ;;  %4394 = vmatmul.msk.f32.gmra.mxu3 %vm858_vm0, %v4839_v9 }
 0x5b3   : > { %v7545_v37 = vpop.f32.mrf.mxu2  ;;  %v3221_v27 = vpop.f32.mrf.mxu3 }
 0x5b4   : > { %v3111_v30 = vpop.f32.mrf.mxu1  ;;  %v7547_v25 = vadd.f32 %v3221_v27, %v3109_v38  ;;  %v8714_v38 = vld [vmem:[#allocation22_spill] sm:$0xff]  ;;  %v8715_v27 = vld [vmem:[#allocation57_spill] sm:$0xff] }
 0x5b5   : > { %v3112_v59 = vadd.f32 %v3111_v30, %v2999_v63 }
 0x5b6   : > { %8708 = vst [vmem:[#allocation25_spill] sm:$0xff] %v7547_v25 }
 0x5b7   : > { %3401 = vmatmul.f32.gmra.mxu1 %v8709_v47  ;;  %v3002_v47 = vadd.f32 %v7446_v13, %v8714_v38  ;;  %v8718_v13 = vld [vmem:[#allocation9_spill] sm:$0xff]  ;;  %v4842_v38 = vld [vmem:[#allocation2 + $0x79] sm:$0xff] }
 0x5b8   : > { %3321 = vmatmul.f32.gmra.mxu2 %v8711_v48  ;;  %4395 = vmatmul.msk.f32.gmra.mxu3 %vm858_vm0, %v4840_v51 }
 0x5bb   : > { %v7554_v52 = vpop.f32.mrf.mxu2  ;;  %v3224_v5 = vpop.f32.mrf.mxu3 }
 0x5bc   : > { %v3114_v3 = vpop.f32.mrf.mxu1  ;;  %v7556_v9 = vadd.f32 %v3224_v5, %v3112_v59  ;;  %v8716_v59 = vld [vmem:[#allocation59_spill] sm:$0xff] }
 0x5bd   : > { %v3115_v50 = vadd.f32 %v3114_v3, %v3002_v47 }
 0x5be   : > { %8712 = vst [vmem:[#allocation71_spill] sm:$0xff] %v7556_v9 }
 0x5bf   : > { %3404 = vmatmul.f32.gmra.mxu1 %v8713_v31  ;;  %v8717_v31 = vld [vmem:[#allocation50_spill] sm:$0xff] }
 0x5c0   : > { %3324 = vmatmul.f32.gmra.mxu2 %v8715_v27  ;;  %4396 = vmatmul.msk.f32.gmra.mxu3 %vm858_vm0, %v4841_v54  ;;  %v3005_v5 = vadd.f32 %v7458_v35, %v8717_v31  ;;  %v8721_v35 = vld [vmem:[#allocation64_spill] sm:$0xff] }
 0x5c3   : > { %v3277_v48 = vpop.f32.mrf.mxu2  ;;  %v3227_v51 = vpop.f32.mrf.mxu3 }
 0x5c4   : > { %v3117_v30 = vpop.f32.mrf.mxu1  ;;  %v7564_v63 = vadd.f32 %v3277_v48, %v7258_v29  ;;  %v7566_v25 = vadd.f32 %v3227_v51, %v3115_v50  ;;  %v8719_v50 = vld [vmem:[#allocation62_spill] sm:$0xff]  ;;  %v8720_v48 = vld [vmem:[#allocation52_spill] sm:$0xff] }
 0x5c5   : > { %v3118_v27 = vadd.f32 %v3117_v30, %v3005_v5  ;;  %v3008_v51 = vadd.f32 %v7473_v4, %v8720_v48  ;;  %v8724_v4 = vld [vmem:[#allocation67_spill] sm:$0xff] }
 0x5c7   : > { %3407 = vmatmul.f32.gmra.mxu1 %v8716_v59  ;;  %v4843_v59 = vld [vmem:[#allocation2 + $0x81] sm:$0xff] }
 0x5c8   : > { %3327 = vmatmul.f32.gmra.mxu2 %v8718_v13  ;;  %4397 = vmatmul.msk.f32.gmra.mxu3 %vm858_vm0, %v4842_v38 }
 0x5cb   : > { %v3280_v3 = vpop.f32.mrf.mxu2  ;;  %v3230_v47 = vpop.f32.mrf.mxu3 }
 0x5cc   : > { %v3120_v54 = vpop.f32.mrf.mxu1  ;;  %v7574_v9 = vadd.f32 %v3280_v3, %v7294_v22  ;;  %v7576_v29 = vadd.f32 %v3230_v47, %v3118_v27  ;;  %v8722_v27 = vld [vmem:[#allocation66_spill] sm:$0xff] }
 0x5cd   : > { %v3121_v31 = vadd.f32 %v3120_v54, %v3008_v51  ;;  %v8723_v3 = vld [vmem:[#allocation54_spill] sm:$0xff] }
 0x5ce   : > { %v3011_v47 = vadd.f32 %v7484_v12, %v8723_v3  ;;  %v8727_v12 = vld [vmem:[#allocation73_spill] sm:$0xff] }
 0x5cf   : > { %3410 = vmatmul.f32.gmra.mxu1 %v8719_v50  ;;  %v4844_v50 = vld [vmem:[#allocation2 + $0x89] sm:$0xff] }
 0x5d0   : > { %3330 = vmatmul.f32.gmra.mxu2 %v8721_v35  ;;  %4398 = vmatmul.msk.f32.gmra.mxu3 %vm858_vm0, %v4843_v59 }
 0x5d3   : > { %v3283_v30 = vpop.f32.mrf.mxu2  ;;  %v3233_v5 = vpop.f32.mrf.mxu3 }
 0x5d4   : > { %v3123_v13 = vpop.f32.mrf.mxu1  ;;  %v7584_v38 = vadd.f32 %v3283_v30, %v7320_v32  ;;  %v7586_v22 = vadd.f32 %v3233_v5, %v3121_v31  ;;  %v8725_v31 = vld [vmem:[#allocation70_spill] sm:$0xff] }
 0x5d5   : > { %v3124_v48 = vadd.f32 %v3123_v13, %v3011_v47  ;;  %v8726_v30 = vld [vmem:[#allocation58_spill] sm:$0xff] }
 0x5d6   : > { %v3014_v5 = vadd.f32 %v7497_v24, %v8726_v30  ;;  %v8731_v24 = vld [vmem:[#allocation79_spill] sm:$0xff] }
 0x5d7   : > { %3413 = vmatmul.f32.gmra.mxu1 %v8722_v27  ;;  %v8728_v27 = vld [vmem:[#allocation48_spill] sm:$0xff] }
 0x5d8   : > { %3333 = vmatmul.f32.gmra.mxu2 %v8724_v4  ;;  %4399 = vmatmul.msk.f32.gmra.mxu3 %vm858_vm0, %v4844_v50 }
 0x5db   : > { %v3286_v54 = vpop.f32.mrf.mxu2  ;;  %v3236_v51 = vpop.f32.mrf.mxu3 }
 0x5dc   : > { %v3126_v35 = vpop.f32.mrf.mxu1  ;;  %v7594_v59 = vadd.f32 %v3286_v54, %v7340_v28  ;;  %v7596_v32 = vadd.f32 %v3236_v51, %v3124_v48  ;;  %v8729_v48 = vld [vmem:[#allocation76_spill] sm:$0xff] }
 0x5dd   : > { %v3127_v3 = vadd.f32 %v3126_v35, %v3014_v5  ;;  %v8730_v54 = vld [vmem:[#allocation60_spill] sm:$0xff] }
 0x5de   : > { %v3017_v51 = vadd.f32 %v7509_v53, %v8730_v54  ;;  %v4846_v53 = vld [vmem:[#allocation2 + $0xa1] sm:$0xff] }
 0x5df   : > { %3416 = vmatmul.f32.gmra.mxu1 %v8725_v31  ;;  %v4845_v31 = vld [vmem:[#allocation2 + $0x99] sm:$0xff] }
 0x5e0   : > { %3336 = vmatmul.f32.gmra.mxu2 %v8727_v12  ;;  %4400 = vmatmul.msk.f32.gmra.mxu3 %vm858_vm0, %v8728_v27 }
 0x5e3   : > { %v3289_v13 = vpop.f32.mrf.mxu2  ;;  %v3239_v47 = vpop.f32.mrf.mxu3 }
 0x5e4   : > { %v3129_v4 = vpop.f32.mrf.mxu1  ;;  %v7605_v50 = vadd.f32 %v3289_v13, %v7361_v55  ;;  %v7607_v28 = vadd.f32 %v3239_v47, %v3127_v3  ;;  %v8732_v3 = vld [vmem:[#allocation82_spill] sm:$0xff]  ;;  %v8733_v13 = vld [vmem:[#allocation65_spill] sm:$0xff] }
 0x5e5   : > { %v3130_v30 = vadd.f32 %v3129_v4, %v3017_v51  ;;  %v3020_v47 = vadd.f32 %v7518_v40, %v8733_v13  ;;  %v8734_v40 = vld [vmem:[#allocation69_spill] sm:$0xff] }
 0x5e7   : > { %3419 = vmatmul.f32.gmra.mxu1 %v8729_v48 }
 0x5e8   : > { %3339 = vmatmul.f32.gmra.mxu2 %v8731_v24  ;;  %4401 = vmatmul.msk.f32.gmra.mxu3 %vm858_vm0, %v4845_v31  ;;  %v7630_v31 = vld [vmem:[#allocation2 + $0x131] sm:$0xff] }
 0x5eb   : > { %v3292_v35 = vpop.f32.mrf.mxu2  ;;  %v3242_v5 = vpop.f32.mrf.mxu3 }
 0x5ec   : > { %v3132_v12 = vpop.f32.mrf.mxu1  ;;  %v7615_v27 = vadd.f32 %v3292_v35, %v7376_v18  ;;  %v7617_v55 = vadd.f32 %v3242_v5, %v3130_v30  ;;  %v2179_v30 = vld [vmem:[#allocation2 + $0x140] sm:$0xff] }
 0x5ed   : > { %v3133_v48 = vadd.f32 %v3132_v12, %v3020_v47  ;;  %v8735_v35 = vld [vmem:[#allocation56_spill] sm:$0xff]  ;;  %v4773_v5 = vpack.i.bf16 %v2179_v30, %v7630_v31 }
 0x5ef   : > { %3422 = vmatmul.f32.gmra.mxu1 %v8732_v3  ;;  %4774 = vrot.lane.b32.xlu0 %v4773_v5, %s4924_s26 }
 0x5f0   : > { %3342 = vmatmul.f32.gmra.mxu2 %v7217_v14  ;;  %4402 = vmatmul.msk.f32.gmra.mxu3 %vm858_vm0, %v4846_v53  ;;  %v3023_v14 = vadd.f32 %v7527_v57, %v8734_v40  ;;  %v8736_v57 = vld [vmem:[#allocation75_spill] sm:$0xff]  ;;  %v8737_v40 = vld [vmem:[#allocation80_spill] sm:$0xff] }
 0x5f1   : > { %v4847_v53 = vld [vmem:[#allocation2 + $0xb1] sm:$0xff] }
 0x5f3   : > { %v3295_v4 = vpop.f32.mrf.mxu2  ;;  %v3245_v54 = vpop.f32.mrf.mxu3 }
 0x5f4   : > { %v3135_v51 = vpop.f32.mrf.mxu1  ;;  %v7625_v24 = vadd.f32 %v3295_v4, %v7391_v43  ;;  %v7627_v18 = vadd.f32 %v3245_v54, %v3133_v48 }
 0x5f5   : > { %v3136_v12 = vadd.f32 %v3135_v51, %v3023_v14 }
 0x5f7   : > { %3425 = vmatmul.f32.gmra.mxu1 %v7233_v23 }
 0x5f8   : > { %3345 = vmatmul.f32.gmra.mxu2 %v7244_v46  ;;  %4403 = vmatmul.msk.f32.gmra.mxu3 %vm858_vm0, %v8735_v35  ;;  %v3026_v46 = vadd.f32 %v7536_v21, %v8736_v57  ;;  %v3029_v21 = vadd.f32 %v7545_v37, %v8737_v40  ;;  %v8739_v37 = vld [vmem:[#allocation85_spill] sm:$0xff]  ;;  %v8742_v40 = vld [vmem:[#allocation72_spill] sm:$0xff] }
 0x5fb   : > { %v3298_v43 = vpop.f32.mrf.mxu2  ;;  %v3248_v3 = vpop.f32.mrf.mxu3 }
 0x5fc   : > { %v3138_v13 = vpop.f32.mrf.mxu1  ;;  %v7640_v23 = vadd.f32 %v3298_v43, %v7403_v61  ;;  %v7642_v47 = vadd.f32 %v3248_v3, %v3136_v12  ;;  %v7654_v61 = vld [vmem:[#allocation2 + $0x129] sm:$0xff] }
 0x5fd   : > { %v3139_v48 = vadd.f32 %v3138_v13, %v3026_v46  ;;  %v8740_v13 = vld [vmem:[#allocation10_spill] sm:$0xff] }
 0x5ff   : > { %3428 = vmatmul.f32.gmra.mxu1 %v7264_v49  ;;  %v2178_v49 = vld [vmem:[#allocation2 + $0x138] sm:$0xff] }
 0x600   : > { %3348 = vmatmul.f32.gmra.mxu2 %v7274_v16  ;;  %4404 = vmatmul.msk.f32.gmra.mxu3 %vm858_vm0, %v4847_v53  ;;  %v8738_v16 = vld [vmem:[#allocation63_spill] sm:$0xff]  ;;  %v4768_v14 = vpack.i.bf16 %v2178_v49, %v7654_v61 }
 0x602   : > { %4769 = vrot.lane.b32.xlu2 %v4768_v14, %s4924_s26  ;;  %s4879_s26 = scalar_lea.hbm %s8350_s11, 2 }
 0x603   : > { %v7649_v4 = vpop.f32.mrf.mxu2  ;;  %v3251_v54 = vpop.f32.mrf.mxu3  ;;  %p4881_p1 = scmp.lt.s32.totalorder %s4879_s26, %s4875_s25 }
 0x604   : > { %v3141_v51 = vpop.f32.mrf.mxu1  ;;  %v7651_v30 = vadd.f32 %v3251_v54, %v3139_v48 }
 0x605   : > { %v3142_v35 = vadd.f32 %v3141_v51, %v3029_v21  ;;  %p4882_p2 = por %p4881_p1, %p4880_p0 }
 0x607   : > { %3431 = vmatmul.f32.gmra.mxu1 %v7303_v10  ;;  %v7665_v10 = vpop.f32.mrf.mxu0  ;;  %p4883_p3 = pnand %p4882_p2, %p4878_p13 }
 0x608   : > { %3351 = vmatmul.f32.gmra.mxu2 %v7310_v19  ;;  %4405 = vmatmul.msk.f32.gmra.mxu3 %vm858_vm0, %v8738_v16  ;;  %v3032_v19 = vadd.f32 %v7554_v52, %v8739_v37  ;;  %v4750_v52 = vpop.permute.xlu1 %4749  ;;  %v7701_v37 = vld [vmem:[#allocation2 + $0x109] sm:$0xff] }
 0x609   : > { %v4751_v16 = vunpack.i.l.bf16 %v4750_v52 }
 0x60b   : > { %v7663_v5 = vpop.f32.mrf.mxu2  ;;  %v3254_v12 = vpop.f32.mrf.mxu3 }
 0x60c   : > { %v3144_v43 = vpop.f32.mrf.mxu1  ;;  %v7667_v3 = vadd.f32 %v3254_v12, %v3142_v35 }
 0x60d   : > { %v3145_v57 = vadd.f32 %v3144_v43, %v3032_v19  ;;  %v2730_v19 = vsel %vm858_vm0, %v7701_v37, %v4751_v16 }
 0x60f   : > { %3434 = vmatmul.f32.gmra.mxu1 %v7323_v42  ;;  %v7680_v49 = vpop.f32.mrf.mxu0 }
 0x610   : > { %3354 = vmatmul.f32.gmra.mxu2 %v7330_v45  ;;  %4406 = vmatmul.msk.f32.gmra.mxu3 %vm858_vm0, %v8740_v13  ;;  %v534_v45 = vld [vmem:[%s8346_s7 + $0x78] sm:$0xff] }
 0x611   : > { %3944 = vmatpush.msra.mxu2 %v534_v45 }
 0x613   : > { %v3307_v46 = vpop.f32.mrf.mxu2  ;;  %v3257_v53 = vpop.f32.mrf.mxu3 }
 0x614   : > { %v3390_v48 = vpop.f32.mrf.mxu1  ;;  %v7676_v54 = vadd.f32 %v3307_v46, %v7448_v2  ;;  %v7678_v51 = vadd.f32 %v3257_v53, %v3145_v57  ;;  %v8743_v2 = vld [vmem:[#allocation61_spill] sm:$0xff]  ;;  %v7713_v57 = vld [vmem:[%s8345_s6 + $0x1] ss:$0 sm:$0xff]  ;;  %v4752_v53 = vunpack.i.h.bf16 %v4750_v52 }
 0x615   : > { %v3391_v42 = vadd.f32 %v3390_v48, %v7564_v63  ;;  %v8745_v46 = vld [vmem:[#allocation68_spill] sm:$0xff] }
 0x616   : > { %8741 = vst [vmem:[#allocation34_spill] sm:$0xff] %v7678_v51  ;;  %v7776_v51 = vld [vmem:[#allocation2 + $0x121] sm:$0xff] }
 0x617   : > { %3437 = vmatmul.f32.gmra.mxu1 %v7346_v60  ;;  %v3504_v21 = vadd.f32 %v8743_v2, %v3391_v42  ;;  %v7705_v13 = vpop.f32.mrf.mxu0 }
 0x618   : > { %3357 = vmatmul.f32.gmra.mxu2 %v7353_v58  ;;  %4407 = vmatmul.msk.f32.gmra.mxu3 %vm858_vm0, %v8742_v40  ;;  %v7698_v58 = vld [vmem:[%s8345_s6] ss:$0 sm:$0xff] }
 0x61b   : > { %v3310_v14 = vpop.f32.mrf.mxu2  ;;  %v3616_v35 = vpop.f32.mrf.mxu3 }
 0x61c   : > { %v3393_v12 = vpop.f32.mrf.mxu1  ;;  %v7692_v63 = vadd.f32 %v3310_v14, %v7460_v0  ;;  %v3617_v60 = vadd.f32 %v3616_v35, %v3504_v21  ;;  %v8744_v0 = vld [vmem:[#allocation78_spill] sm:$0xff] }
 0x61d   : > { %v3394_v43 = vadd.f32 %v3393_v12, %v7574_v9  ;;  %v7723_v35 = vld [vmem:[#allocation2 + $0x111] sm:$0xff] }
 0x61e   : > { %v3713_v9 = vmul.f32 %v7698_v58, %v3617_v60  ;;  %v2731_v52 = vsel %vm858_vm0, %v7723_v35, %v4752_v53  ;;  %v533_v12 = vld [vmem:[%s8346_s7 + $0x70] sm:$0xff]  ;;  %v8746_v60 = vld [vmem:[#allocation84_spill] sm:$0xff] }
 0x61f   : > { %3440 = vmatmul.f32.gmra.mxu1 %v7364_v33  ;;  %v3507_v33 = vadd.f32 %v8745_v46, %v3394_v43  ;;  %3945 = vmatpush.msra.mxu2 %v533_v12  ;;  %v7735_v43 = vpop.f32.mrf.mxu0 }
 0x620   : > { %3360 = vmatmul.f32.gmra.mxu2 %v2730_v19  ;;  %4408 = vmatmul.msk.f32.gmra.mxu3 %vm858_vm0, %v8744_v0  ;;  %v3746_v16 = vadd.f32 %v7713_v57, %v3713_v9  ;;  %v8747_v0 = vld [vmem:[#allocation74_spill] sm:$0xff] }
 0x622   : > { %vm3778_vm14 = vcmp.gt.f32.partialorder %v3746_v16, 0.0 }
 0x623   : > { %v3313_v48 = vpop.f32.mrf.mxu2  ;;  %v3619_v42 = vpop.f32.mrf.mxu3 }
 0x624   : > { %v3396_v45 = vpop.f32.mrf.mxu1  ;;  %v7717_v40 = vadd.f32 %v3313_v48, %v7475_v39  ;;  %v3620_v2 = vadd.f32 %v3619_v42, %v3507_v33  ;;  %v7730_v39 = vpop.permute.xlu0 %4759 }
 0x625   : > { %v3397_v21 = vadd.f32 %v3396_v45, %v7584_v38  ;;  %v4761_v46 = vunpack.i.l.bf16 %v7730_v39 }
 0x626   : > { %v3714_v14 = vmul.f32 %v7698_v58, %v3620_v2 }
 0x627   : > { %3443 = vmatmul.f32.gmra.mxu1 %v7382_v17  ;;  %v3810_v17 = vmul.f32 0.01, %v3746_v16  ;;  %v3510_v9 = vadd.f32 %v8747_v0, %v3397_v21  ;;  %v7751_v0 = vld [vmem:[#allocation2 + $0x119] sm:$0xff] }
 0x628   : > { %3363 = vmatmul.f32.gmra.mxu2 %v2731_v52  ;;  %v3747_v38 = vadd.f32 %v7713_v57, %v3714_v14  ;;  %4409 = vmatmul.msk.f32.gmra.mxu3 %vm858_vm0, %v8746_v60  ;;  %v8748_v14 = vld [vmem:[#allocation23_spill] sm:$0xff] }
 0x629   : > { %v7746_v12 = vsel %vm3778_vm14, %v3746_v16, %v3810_v17  ;;  %v8749_v16 = vld [vmem:[#allocation87_spill] sm:$0xff]  ;;  %v8750_v17 = vld [vmem:[#allocation81_spill] sm:$0xff] }
 0x62a   : > { %vm3779_vm13 = vcmp.gt.f32.partialorder %v3747_v38, 0.0  ;;  %v3811_v19 = vmul.f32 0.01, %v3747_v38 }
 0x62b   : > { %v3316_v33 = vpop.f32.mrf.mxu2  ;;  %v3622_v53 = vpop.f32.mrf.mxu3 }
 0x62c   : > { %v3399_v48 = vpop.f32.mrf.mxu1  ;;  %v7739_v42 = vsel %vm3779_vm13, %v3747_v38, %v3811_v19  ;;  %v7742_v45 = vadd.f32 %v3316_v33, %v7486_v6  ;;  %v3623_v2 = vadd.f32 %v3622_v53, %v3510_v9  ;;  %v2732_v38 = vsel %vm858_vm0, %v7751_v0, %v4761_v46  ;;  %v7756_v19 = vpop.permute.xlu1 %4764 }
 0x62d   : > { %v3875_v52 = vmul.f32 %v8748_v14, %v7739_v42  ;;  %v3400_v60 = vadd.f32 %v3399_v48, %v7594_v59 }
 0x62e   : > { %v3715_v21 = vmul.f32 %v7698_v58, %v3623_v2  ;;  %v7763_v2 = vpop.f32.mrf.mxu0 }
 0x62f   : > { %3446 = vmatmul.f32.gmra.mxu1 %v7394_v41  ;;  %v3906_v6 = vadd.f32 %v3875_v52, %v7746_v12  ;;  %v3513_v33 = vadd.f32 %v8750_v17, %v3400_v60  ;;  %v4767_v41 = vunpack.i.h.bf16 %v7756_v19 }
 0x630   : > { %3366 = vmatmul.f32.gmra.mxu2 %v2732_v38  ;;  %v3748_v9 = vadd.f32 %v7713_v57, %v3715_v21  ;;  %4410 = vmatmul.msk.f32.gmra.mxu3 %vm858_vm0, %v8749_v16 }
 0x632   : > { %vm3780_vm15 = vcmp.gt.f32.partialorder %v3748_v9, 0.0  ;;  %v3812_v59 = vmul.f32 0.01, %v3748_v9 }
 0x633   : > { %v3319_v53 = vpop.f32.mrf.mxu2  ;;  %v3625_v48 = vpop.f32.mrf.mxu3 }
 0x634   : > { %v3402_v46 = vpop.f32.mrf.mxu1  ;;  %v7765_v14 = vsel %vm3780_vm15, %v3748_v9, %v3812_v59  ;;  %v7768_v52 = vadd.f32 %v3319_v53, %v7499_v34  ;;  %v3626_v21 = vadd.f32 %v3625_v48, %v3513_v33  ;;  %v2733_v9 = vsel %vm858_vm0, %v7776_v51, %v4767_v41  ;;  %v532_v34 = vld [vmem:[%s8346_s7 + $0x68] sm:$0xff] }
 0x635   : > { %v3907_v38 = vadd.f32 %v3906_v6, %v7765_v14  ;;  %v3403_v60 = vadd.f32 %v3402_v46, %v7605_v50  ;;  %3946 = vmatpush.msra.mxu2 %v532_v34  ;;  %v8751_v59 = vld [vmem:[#allocation86_spill] sm:$0xff] }
 0x636   : > { %v3716_v17 = vmul.f32 %v7698_v58, %v3626_v21  ;;  %v7796_v34 = vpop.f32.mrf.mxu0 }
 0x637   : > { %3449 = vmatmul.f32.gmra.mxu1 %v7409_v15  ;;  %v3516_v15 = vadd.f32 %v8751_v59, %v3403_v60 }
 0x638   : > { %3369 = vmatmul.f32.gmra.mxu2 %v2733_v9  ;;  %v3749_v6 = vadd.f32 %v7713_v57, %v3716_v17  ;;  %4411 = vmatmul.msk.f32.gmra.mxu3 %vm858_vm0, %v7270_v8  ;;  %v8752_v9 = vld [vmem:[#allocation24_spill] sm:$0xff] }
 0x63a   : > { %vm3781_vm1 = vcmp.gt.f32.partialorder %v3749_v6, 0.0  ;;  %v3813_v50 = vmul.f32 0.01, %v3749_v6 }
 0x63b   : > { %v3322_v33 = vpop.f32.mrf.mxu2  ;;  %v3628_v53 = vpop.f32.mrf.mxu3 }
 0x63c   : > { %v3405_v48 = vpop.f32.mrf.mxu1  ;;  %v7787_v46 = vsel %vm3781_vm1, %v3749_v6, %v3813_v50  ;;  %v7790_v41 = vadd.f32 %v3322_v33, %v7511_v11  ;;  %v3629_v21 = vadd.f32 %v3628_v53, %v3516_v15 }
 0x63d   : > { %v3877_v17 = vmul.f32 %v8752_v9, %v7787_v46  ;;  %v4009_v8 = vmax.f32 %v7739_v42, %v7787_v46  ;;  %v3406_v16 = vadd.f32 %v3405_v48, %v7615_v27  ;;  %v4427_v42 = vld [vmem:[%s8348_s9 + $0x90] sm:$0xff] }
 0x63e   : > { %v3717_v60 = vmul.f32 %v7698_v58, %v3629_v21 }
 0x63f   : > { %3452 = vmatmul.f32.gmra.mxu1 %v7421_v20  ;;  %v3908_v6 = vadd.f32 %v3907_v38, %v3877_v17  ;;  %v3519_v59 = vadd.f32 %v7665_v10, %v3406_v16  ;;  %v7817_v10 = vpop.f32.mrf.mxu0 }
 0x640   : > { %v3750_v50 = vadd.f32 %v7713_v57, %v3717_v60  ;;  %4412 = vmatmul.msk.f32.gmra.mxu3 %vm858_vm0, %v7306_v26  ;;  %v531_v26 = vld [vmem:[%s8346_s7 + $0x60] sm:$0xff] }
 0x641   : > { %3947 = vmatpush.msra.mxu2 %v531_v26 }
 0x642   : > { %vm3782_vm2 = vcmp.gt.f32.partialorder %v3750_v50, 0.0  ;;  %v3814_v11 = vmul.f32 0.01, %v3750_v50 }
 0x643   : > { %v3325_v15 = vpop.f32.mrf.mxu2  ;;  %v3631_v33 = vpop.f32.mrf.mxu3 }
 0x644   : > { %v3408_v53 = vpop.f32.mrf.mxu1  ;;  %v7805_v9 = vsel %vm3782_vm2, %v3750_v50, %v3814_v11  ;;  %v7808_v27 = vadd.f32 %v3325_v15, %v7520_v36  ;;  %v3632_v48 = vadd.f32 %v3631_v33, %v3519_v59  ;;  %v8753_v59 = vld [vmem:[#allocation27_spill] sm:$0xff] }
 0x645   : > { %v3909_v20 = vadd.f32 %v3908_v6, %v7805_v9  ;;  %v3409_v38 = vadd.f32 %v3408_v53, %v7625_v24 }
 0x646   : > { %v3718_v21 = vmul.f32 %v7698_v58, %v3632_v48 }
 0x647   : > { %3455 = vmatmul.f32.gmra.mxu1 %v7439_v62  ;;  %v3522_v24 = vadd.f32 %v7680_v49, %v3409_v38  ;;  %v7836_v48 = vpop.f32.mrf.mxu0 }
 0x648   : > { %v3751_v16 = vadd.f32 %v7713_v57, %v3718_v21  ;;  %4413 = vmatmul.msk.f32.gmra.mxu3 %vm858_vm0, %v7326_v7  ;;  %v8754_v21 = vld [vmem:[#allocation88_spill] sm:$0xff] }
 0x649   : > { %v3302_v26 = vadd.f32 %v7649_v4, %v8754_v21  ;;  %v530_v4 = vld [vmem:[%s8346_s7 + $0x58] sm:$0xff] }
 0x64a   : > { %vm3783_vm3 = vcmp.gt.f32.partialorder %v3751_v16, 0.0  ;;  %v3815_v36 = vmul.f32 0.01, %v3751_v16  ;;  %3948 = vmatpush.msra.mxu2 %v530_v4 }
 0x64b   : > { %v3328_v17 = vpop.f32.mrf.mxu2  ;;  %v3634_v60 = vpop.f32.mrf.mxu3 }
 0x64c   : > { %v3411_v6 = vpop.f32.mrf.mxu1  ;;  %v7823_v62 = vsel %vm3783_vm3, %v3751_v16, %v3815_v36  ;;  %v7826_v50 = vadd.f32 %v3328_v17, %v7529_v44  ;;  %v3635_v11 = vadd.f32 %v3634_v60, %v3522_v24 }
 0x64d   : > { %v3879_v15 = vmul.f32 %v8753_v59, %v7823_v62  ;;  %v3412_v33 = vadd.f32 %v3411_v6, %v7640_v23 }
 0x64e   : > { %v3719_v7 = vmul.f32 %v7698_v58, %v3635_v11  ;;  %v8756_v11 = vld [vmem:[#allocation12_spill] sm:$0xff] }
 0x64f   : > { %3458 = vmatmul.f32.gmra.mxu1 %v7451_v1  ;;  %v3910_v53 = vadd.f32 %v3909_v20, %v3879_v15  ;;  %v3525_v38 = vadd.f32 %v7705_v13, %v3412_v33  ;;  %v8755_v1 = vld [vmem:[#allocation19_spill] sm:$0xff] }
 0x650   : > { %v3752_v49 = vadd.f32 %v7713_v57, %v3719_v7  ;;  %4414 = vmatmul.msk.f32.gmra.mxu3 %vm858_vm0, %v7349_v56  ;;  %v4766_v7 = vunpack.i.l.bf16 %v7756_v19 }
 0x652   : > { %vm3784_vm4 = vcmp.gt.f32.partialorder %v3752_v49, 0.0  ;;  %v3816_v44 = vmul.f32 0.01, %v3752_v49 }
 0x653   : > { %v3331_v23 = vpop.f32.mrf.mxu2  ;;  %v3637_v16 = vpop.f32.mrf.mxu3 }
 0x654   : > { %v3414_v36 = vpop.f32.mrf.mxu1  ;;  %v7841_v24 = vsel %vm3784_vm4, %v3752_v49, %v3816_v44  ;;  %v7844_v20 = vadd.f32 %v3331_v23, %v8755_v1  ;;  %v3638_v17 = vadd.f32 %v3637_v16, %v3525_v38  ;;  %v8758_v23 = vld [vmem:[#allocation25_spill] sm:$0xff] }
 0x655   : > { %v3415_v60 = vadd.f32 %v3414_v36, %v3302_v26  ;;  %v3911_v56 = vadd.f32 %v3910_v53, %v7841_v24  ;;  %v4010_v6 = vmax.f32 %v7805_v9, %v7841_v24  ;;  %v8757_v53 = vld [vmem:[#allocation11_spill] sm:$0xff] }
 0x656   : > { %v3720_v13 = vmul.f32 %v7698_v58, %v3638_v17  ;;  %v3305_v49 = vadd.f32 %v7663_v5, %v8757_v53  ;;  %v8759_v17 = vld [vmem:[#allocation28_spill] sm:$0xff] }
 0x657   : > { %3461 = vmatmul.f32.gmra.mxu1 %v8756_v11  ;;  %v3528_v33 = vadd.f32 %v7735_v43, %v3415_v60  ;;  %v8760_v60 = vld [vmem:[#allocation13_spill] sm:$0xff]  ;;  %v4852_v11 = vld [vmem:[#allocation2 + $0x12f] sm:$0xff] }
 0x658   : > { %v3753_v59 = vadd.f32 %v7713_v57, %v3720_v13  ;;  %4415 = vmatmul.msk.f32.gmra.mxu3 %vm858_vm0, %v7701_v37  ;;  %v7866_v37 = vpop.f32.mrf.mxu0  ;;  %v2739_v4 = vsel %vm858_vm0, %v4852_v11, %v4766_v7 }
 0x659   : > { %3589 = vmatmul.f32.gmra.mxu0 %v2739_v4 }
 0x65a   : > { %vm3785_vm5 = vcmp.gt.f32.partialorder %v3753_v59, 0.0  ;;  %v3817_v15 = vmul.f32 0.01, %v3753_v59 }
 0x65b   : > { %v3334_v44 = vpop.f32.mrf.mxu2  ;;  %v3640_v38 = vpop.f32.mrf.mxu3 }
 0x65c   : > { %v3417_v21 = vpop.f32.mrf.mxu1  ;;  %v7861_v26 = vsel %vm3785_vm5, %v3753_v59, %v3817_v15  ;;  %v7864_v16 = vadd.f32 %v3334_v44, %v8758_v23  ;;  %v3641_v36 = vadd.f32 %v3640_v38, %v3528_v33  ;;  %v7884_v7 = vpop.permute.xlu2 %4769 }
 0x65d   : > { %v3418_v1 = vadd.f32 %v3417_v21, %v3305_v49  ;;  %v3881_v43 = vmul.f32 %v8759_v17, %v7861_v26  ;;  %v4011_v19 = vmax.f32 %v7823_v62, %v7861_v26  ;;  %v8761_v21 = vld [vmem:[#allocation71_spill] sm:$0xff]  ;;  %v4772_v17 = vunpack.i.h.bf16 %v7884_v7 }
 0x65e   : > { %v3721_v5 = vmul.f32 %v7698_v58, %v3641_v36 }
 0x65f   : > { %3464 = vmatmul.f32.gmra.mxu1 %v8760_v60  ;;  %v3912_v13 = vadd.f32 %v3911_v56, %v3881_v43  ;;  %v3531_v33 = vadd.f32 %v7763_v2, %v3418_v1  ;;  %v8762_v1 = vld [vmem:[#allocation14_spill] sm:$0xff] }
 0x660   : > { %v3754_v59 = vadd.f32 %v7713_v57, %v3721_v5  ;;  %4416 = vmatmul.msk.f32.gmra.mxu3 %vm858_vm0, %v7723_v35  ;;  %v7890_v2 = vpop.f32.mrf.mxu0  ;;  %v2176_v5 = vld [vmem:[#allocation2 + $0x137] sm:$0xff] }
 0x661   : > { %v529_v60 = vld [vmem:[%s8346_s7 + $0x50] sm:$0xff] }
 0x662   : > { %vm3786_vm6 = vcmp.gt.f32.partialorder %v3754_v59, 0.0  ;;  %v3818_v15 = vmul.f32 0.01, %v3754_v59  ;;  %3949 = vmatpush.msra.mxu2 %v529_v60 }
 0x663   : > { %v3337_v53 = vpop.f32.mrf.mxu2  ;;  %v3643_v49 = vpop.f32.mrf.mxu3 }
 0x664   : > { %v3420_v44 = vpop.f32.mrf.mxu1  ;;  %v7879_v38 = vsel %vm3786_vm6, %v3754_v59, %v3818_v15  ;;  %v7882_v56 = vadd.f32 %v3337_v53, %v8761_v21  ;;  %v3644_v23 = vadd.f32 %v3643_v49, %v3531_v33  ;;  %v7903_v49 = vpop.permute.xlu0 %4774  ;;  %v8763_v21 = vld [vmem:[#allocation29_spill] sm:$0xff] }
 0x665   : > { %v3421_v36 = vadd.f32 %v3420_v44, %v7676_v54  ;;  %v3913_v35 = vadd.f32 %v3912_v13, %v7879_v38  ;;  %v2740_v54 = vsel %vm858_vm0, %v2176_v5, %v4772_v17 }
 0x666   : > { %v3722_v43 = vmul.f32 %v7698_v58, %v3644_v23  ;;  %3592 = vmatmul.f32.gmra.mxu0 %v2740_v54  ;;  %v4777_v23 = vunpack.i.h.bf16 %v7903_v49 }
 0x667   : > { %3467 = vmatmul.f32.gmra.mxu1 %v8762_v1  ;;  %v3534_v4 = vadd.f32 %v7796_v34, %v3421_v36  ;;  %v2177_v34 = vld [vmem:[#allocation2 + $0x13f] sm:$0xff] }
 0x668   : > { %v3755_v11 = vadd.f32 %v7713_v57, %v3722_v43  ;;  %4417 = vmatmul.msk.f32.gmra.mxu3 %vm858_vm0, %v7751_v0  ;;  %v8764_v43 = vld [vmem:[#allocation15_spill] sm:$0xff]  ;;  %v2741_v5 = vsel %vm858_vm0, %v2177_v34, %v4777_v23  ;;  %v7915_v60 = vpop.f32.mrf.mxu0 }
 0x669   : > { %v4853_v23 = vld [vmem:[#allocation2 + $0x118] sm:$0xff] }
 0x66a   : > { %vm3787_vm7 = vcmp.gt.f32.partialorder %v3755_v11, 0.0  ;;  %v3819_v13 = vmul.f32 0.01, %v3755_v11 }
 0x66b   : > { %v3646_v59 = vpop.f32.mrf.mxu3 }
 0x66c   : > { %v3423_v15 = vpop.f32.mrf.mxu1  ;;  %v7901_v33 = vsel %vm3787_vm7, %v3755_v11, %v3819_v13  ;;  %v3647_v53 = vadd.f32 %v3646_v59, %v3534_v4 }
 0x66d   : > { %v3424_v44 = vadd.f32 %v3423_v15, %v7692_v63  ;;  %v3883_v0 = vmul.f32 %v8763_v21, %v7901_v33  ;;  %v8765_v63 = vld [vmem:[#allocation83_spill] sm:$0xff]  ;;  %v528_v21 = vld [vmem:[%s8346_s7 + $0x48] sm:$0xff] }
 0x66e   : > { %v3723_v17 = vmul.f32 %v7698_v58, %v3647_v53  ;;  %3595 = vmatmul.f32.gmra.mxu0 %v2741_v5  ;;  %v4756_v11 = vunpack.i.l.bf16 %v8765_v63  ;;  %3950 = vmatpush.msra.mxu2 %v528_v21 }
 0x66f   : > { %3470 = vmatmul.f32.gmra.mxu1 %v8764_v43  ;;  %v3914_v1 = vadd.f32 %v3913_v35, %v3883_v0  ;;  %v3537_v13 = vadd.f32 %v7817_v10, %v3424_v44 }
 0x670   : > { %v3756_v36 = vadd.f32 %v7713_v57, %v3723_v17  ;;  %4418 = vmatmul.msk.f32.gmra.mxu3 %vm858_vm0, %v7776_v51  ;;  %v2734_v17 = vsel %vm858_vm0, %v4853_v23, %v4756_v11  ;;  %v7935_v34 = vpop.f32.mrf.mxu0 }
 0x672   : > { %vm3788_vm8 = vcmp.gt.f32.partialorder %v3756_v36, 0.0  ;;  %v3820_v54 = vmul.f32 0.01, %v3756_v36 }
 0x673   : > { %v3649_v4 = vpop.f32.mrf.mxu3 }
 0x674   : > { %v3426_v59 = vpop.f32.mrf.mxu1  ;;  %v7919_v35 = vsel %vm3788_vm8, %v3756_v36, %v3820_v54  ;;  %v3650_v15 = vadd.f32 %v3649_v4, %v3537_v13  ;;  %v8766_v13 = vld [vmem:[#allocation30_spill] sm:$0xff] }
 0x675   : > { %v3427_v53 = vadd.f32 %v3426_v59, %v7717_v40  ;;  %v3915_v51 = vadd.f32 %v3914_v1, %v7919_v35  ;;  %v4012_v0 = vmax.f32 %v7879_v38, %v7919_v35  ;;  %v4762_v40 = vunpack.i.h.bf16 %v7730_v39  ;;  %v4854_v39 = vld [vmem:[#allocation2 + $0x120] sm:$0xff]  ;;  %v4047_v35 = vld [vmem:[%s8348_s9 + $0x30] sm:$0xff] }
 0x676   : > { %v3724_v10 = vmul.f32 %v7698_v58, %v3650_v15 }
 0x677   : > { %3473 = vmatmul.f32.gmra.mxu1 %v2734_v17  ;;  %v3540_v1 = vadd.f32 %v7836_v48, %v3427_v53  ;;  %v2735_v59 = vsel %vm858_vm0, %v4854_v39, %v4762_v40  ;;  %v4771_v53 = vunpack.i.l.bf16 %v7884_v7  ;;  %v4855_v40 = vld [vmem:[#allocation2 + $0x128] sm:$0xff] }
 0x678   : > { %v3757_v44 = vadd.f32 %v7713_v57, %v3724_v10  ;;  %4419 = vmatmul.msk.f32.gmra.mxu3 %vm858_vm0, %v7654_v61 }
 0x67a   : > { %vm3789_vm9 = vcmp.gt.f32.partialorder %v3757_v44, 0.0  ;;  %v3821_v43 = vmul.f32 0.01, %v3757_v44 }
 0x67b   : > { %v3652_v36 = vpop.f32.mrf.mxu3 }
 0x67c   : > { %v3429_v5 = vpop.f32.mrf.mxu1  ;;  %v7937_v63 = vsel %vm3789_vm9, %v3757_v44, %v3821_v43  ;;  %v3653_v11 = vadd.f32 %v3652_v36, %v3540_v1  ;;  %v2736_v43 = vsel %vm858_vm0, %v4855_v40, %v4771_v53 }
 0x67d   : > { %v3430_v54 = vadd.f32 %v3429_v5, %v7742_v45  ;;  %v3885_v4 = vmul.f32 %v8766_v13, %v7937_v63  ;;  %v4013_v61 = vmax.f32 %v7901_v33, %v7937_v63  ;;  %v2180_v5 = vld [vmem:[#allocation2 + $0x139] sm:$0xff]  ;;  %v4430_v63 = vld [vmem:[%s8348_s9 + $0xa8] sm:$0xff] }
 0x67e   : > { %v3725_v48 = vmul.f32 %v7698_v58, %v3653_v11  ;;  %v4776_v11 = vunpack.i.l.bf16 %v7903_v49  ;;  %v8767_v49 = vld [vmem:[#allocation31_spill] sm:$0xff] }
 0x67f   : > { %3476 = vmatmul.f32.gmra.mxu1 %v2735_v59  ;;  %v3916_v15 = vadd.f32 %v3915_v51, %v3885_v4  ;;  %v3543_v23 = vadd.f32 %v7866_v37, %v3430_v54  ;;  %v3554_v51 = vpop.f32.mrf.mxu0  ;;  %v4432_v33 = vld [vmem:[%s8348_s9 + $0xb8] sm:$0xff] }
 0x680   : > { %v3758_v21 = vadd.f32 %v7713_v57, %v3725_v48  ;;  %4420 = vmatmul.msk.f32.gmra.mxu3 %vm858_vm0, %v7630_v31  ;;  %v527_v31 = vld [vmem:[%s8346_s7 + $0x40] sm:$0xff]  ;;  %v4856_v48 = vld [vmem:[#allocation2 + $0x130] sm:$0xff] }
 0x681   : > { %3951 = vmatpush.msra.mxu2 %v527_v31 }
 0x682   : > { %vm3790_vm10 = vcmp.gt.f32.partialorder %v3758_v21, 0.0  ;;  %v3822_v45 = vmul.f32 0.01, %v3758_v21 }
 0x683   : > { %v3655_v17 = vpop.f32.mrf.mxu3 }
 0x684   : > { %v3432_v10 = vpop.f32.mrf.mxu1  ;;  %v7951_v44 = vsel %vm3790_vm10, %v3758_v21, %v3822_v45  ;;  %v3656_v1 = vadd.f32 %v3655_v17, %v3543_v23  ;;  %v2181_v23 = vld [vmem:[#allocation2 + $0x141] sm:$0xff] }
 0x685   : > { %v3433_v7 = vadd.f32 %v3432_v10, %v7768_v52  ;;  %v3917_v36 = vadd.f32 %v3916_v15, %v7951_v44  ;;  %v2737_v15 = vsel %vm858_vm0, %v4856_v48, %v4776_v11 }
 0x686   : > { %v3726_v37 = vmul.f32 %v7698_v58, %v3656_v1 }
 0x687   : > { %3479 = vmatmul.f32.gmra.mxu1 %v2736_v43  ;;  %v3546_v52 = vadd.f32 %v7890_v2, %v3433_v7  ;;  %v3557_v10 = vpop.f32.mrf.mxu0 }
 0x688   : > { %v3759_v54 = vadd.f32 %v7713_v57, %v3726_v37  ;;  %4421 = vmatmul.msk.f32.gmra.mxu3 %vm858_vm0, %v2180_v5 }
 0x68a   : > { %vm3791_vm11 = vcmp.gt.f32.partialorder %v3759_v54, 0.0  ;;  %v3823_v13 = vmul.f32 0.01, %v3759_v54 }
 0x68b   : > { %v3658_v4 = vpop.f32.mrf.mxu3 }
 0x68c   : > { %v3435_v39 = vpop.f32.mrf.mxu1  ;;  %v7964_v59 = vsel %vm3791_vm11, %v3759_v54, %v3823_v13  ;;  %v3659_v53 = vadd.f32 %v3658_v4, %v3546_v52 }
 0x68d   : > { %v3436_v21 = vadd.f32 %v3435_v39, %v7790_v41  ;;  %v3887_v45 = vmul.f32 %v8767_v49, %v7964_v59  ;;  %v8768_v49 = vld [vmem:[#allocation33_spill] sm:$0xff] }
 0x68e   : > { %v3727_v17 = vmul.f32 %v7698_v58, %v3659_v53 }
 0x68f   : > { %3482 = vmatmul.f32.gmra.mxu1 %v2737_v15  ;;  %v3918_v40 = vadd.f32 %v3917_v36, %v3887_v45  ;;  %v3549_v1 = vadd.f32 %v7915_v60, %v3436_v21  ;;  %v526_v36 = vld [vmem:[%s8346_s7 + $0x38] sm:$0xff]  ;;  %v3560_v52 = vpop.f32.mrf.mxu0 }
 0x690   : > { %v3760_v2 = vadd.f32 %v7713_v57, %v3727_v17  ;;  %4422 = vmatmul.msk.f32.gmra.mxu3 %vm858_vm0, %v2181_v23  ;;  %3952 = vmatpush.msra.mxu2 %v526_v36 }
 0x692   : > { %vm3792_vm12 = vcmp.gt.f32.partialorder %v3760_v2, 0.0  ;;  %v3824_v43 = vmul.f32 0.01, %v3760_v2 }
 0x693   : > { %v3661_v7 = vpop.f32.mrf.mxu3 }
 0x694   : > { %v3438_v5 = vpop.f32.mrf.mxu1  ;;  %v7974_v41 = vsel %vm3792_vm12, %v3760_v2, %v3824_v43  ;;  %v3662_v31 = vadd.f32 %v3661_v7, %v3549_v1 }
 0x695   : > { %v3439_v37 = vadd.f32 %v3438_v5, %v7808_v27  ;;  %v3919_v11 = vadd.f32 %v3918_v40, %v7974_v41  ;;  %v4014_v54 = vmax.f32 %v7951_v44, %v7974_v41 }
 0x696   : > { %v3728_v13 = vmul.f32 %v7698_v58, %v3662_v31 }
 0x697   : > { %v3552_v39 = vadd.f32 %v7935_v34, %v3439_v37  ;;  %v3563_v1 = vpop.f32.mrf.mxu0  ;;  %v3340_v37 = vpop.f32.mrf.mxu2 }
 0x698   : > { %v3761_v60 = vadd.f32 %v7713_v57, %v3728_v13 }
 0x69a   : > { %vm3793_vm0 = vcmp.gt.f32.partialorder %v3761_v60, 0.0  ;;  %v3825_v4 = vmul.f32 0.01, %v3761_v60 }
 0x69b   : > { %v3664_v27 = vpop.f32.mrf.mxu3 }
 0x69c   : > { %v3441_v48 = vpop.f32.mrf.mxu1  ;;  %v7986_v15 = vsel %vm3793_vm0, %v3761_v60, %v3825_v4  ;;  %v3665_v53 = vadd.f32 %v3664_v27, %v3552_v39 }
 0x69d   : > { %v3442_v21 = vadd.f32 %v3441_v48, %v7826_v50  ;;  %v3889_v45 = vmul.f32 %v8768_v49, %v7986_v15  ;;  %v4015_v23 = vmax.f32 %v7964_v59, %v7986_v15  ;;  %v4050_v15 = vld [vmem:[%s8348_s9 + $0x48] sm:$0xff] }
 0x69e   : > { %v3729_v17 = vmul.f32 %v7698_v58, %v3665_v53 }
 0x69f   : > { %v3920_v40 = vadd.f32 %v3919_v11, %v3889_v45  ;;  %v3555_v43 = vadd.f32 %v3554_v51, %v3442_v21  ;;  %v525_v11 = vld [vmem:[%s8346_s7 + $0x30] sm:$0xff]  ;;  %v8769_v45 = vld [vmem:[#allocation36_spill] sm:$0xff] }
 0x6a0   : > { %v3762_v2 = vadd.f32 %v7713_v57, %v3729_v17  ;;  %3953 = vmatpush.msra.mxu2 %v525_v11 }
 0x6a2   : > { %vm3794_vm13 = vcmp.gt.f32.partialorder %v3762_v2, 0.0  ;;  %v3826_v34 = vmul.f32 0.01, %v3762_v2 }
 0x6a3   : > { %v3667_v7 = vpop.f32.mrf.mxu3 }
 0x6a4   : > { %v3444_v5 = vpop.f32.mrf.mxu1  ;;  %v7995_v31 = vsel %vm3794_vm13, %v3762_v2, %v3826_v34  ;;  %v3668_v50 = vadd.f32 %v3667_v7, %v3555_v43  ;;  %v3343_v2 = vpop.f32.mrf.mxu2  ;;  %vm3965_vm13 = vcmask 64512  }
 0x6a5   : > { %v3445_v36 = vadd.f32 %v3444_v5, %v7844_v20  ;;  %v3921_v13 = vadd.f32 %v3920_v40, %v7995_v31  ;;  %v3566_v20 = vpop.f32.mrf.mxu0 }
 0x6a6   : > { %v3730_v60 = vmul.f32 %v7698_v58, %v3668_v50 }
 0x6a7   : > { %v3558_v39 = vadd.f32 %v3557_v10, %v3445_v36 }
 0x6a8   : > { %v3763_v51 = vadd.f32 %v7713_v57, %v3730_v60 }
 0x6aa   : > { %vm3795_vm14 = vcmp.gt.f32.partialorder %v3763_v51, 0.0  ;;  %v3827_v4 = vmul.f32 0.01, %v3763_v51 }
 0x6ab   : > { %v3670_v27 = vpop.f32.mrf.mxu3 }
 0x6ac   : > { %v3447_v48 = vpop.f32.mrf.mxu1  ;;  %v8004_v53 = vsel %vm3795_vm14, %v3763_v51, %v3827_v4  ;;  %v3671_v21 = vadd.f32 %v3670_v27, %v3558_v39  ;;  %v524_v51 = vld [vmem:[%s8346_s7 + $0x28] sm:$0xff] }
 0x6ad   : > { %v3448_v49 = vadd.f32 %v3447_v48, %v7864_v16  ;;  %v3891_v17 = vmul.f32 %v8769_v45, %v8004_v53  ;;  %3954 = vmatpush.msra.mxu2 %v524_v51  ;;  %v3346_v48 = vpop.f32.mrf.mxu2 }
 0x6ae   : > { %v3731_v40 = vmul.f32 %v7698_v58, %v3671_v21 }
 0x6af   : > { %v3922_v34 = vadd.f32 %v3921_v13, %v3891_v17  ;;  %v3561_v10 = vadd.f32 %v3560_v52, %v3448_v49  ;;  %v3569_v52 = vpop.f32.mrf.mxu0  ;;  %v3341_v49 = vadd.f32 %v3340_v37, %v7566_v25 }
 0x6b0   : > { %v3764_v43 = vadd.f32 %v7713_v57, %v3731_v40 }
 0x6b2   : > { %vm3796_vm15 = vcmp.gt.f32.partialorder %v3764_v43, 0.0  ;;  %v3828_v7 = vmul.f32 0.01, %v3764_v43 }
 0x6b3   : > { %v3673_v5 = vpop.f32.mrf.mxu3 }
 0x6b4   : > { %v3450_v50 = vpop.f32.mrf.mxu1  ;;  %v8011_v36 = vsel %vm3796_vm15, %v3764_v43, %v3828_v7  ;;  %v3674_v11 = vadd.f32 %v3673_v5, %v3561_v10 }
 0x6b5   : > { %v3451_v60 = vadd.f32 %v3450_v50, %v7882_v56  ;;  %v3923_v16 = vadd.f32 %v3922_v34, %v8011_v36  ;;  %v4016_v13 = vmax.f32 %v7995_v31, %v8011_v36  ;;  %v8770_v34 = vld [vmem:[#allocation37_spill] sm:$0xff]  ;;  %v3349_v37 = vpop.f32.mrf.mxu2  ;;  %v4435_v31 = vld [vmem:[%s8348_s9 + $0xd0] sm:$0xff] }
 0x6b6   : > { %v3732_v4 = vmul.f32 %v7698_v58, %v3674_v11  ;;  %v4433_v36 = vld [vmem:[%s8348_s9 + $0xc0] sm:$0xff] }
 0x6b7   : > { %v3564_v39 = vadd.f32 %v3563_v1, %v3451_v60  ;;  %v3572_v11 = vpop.f32.mrf.mxu0 }
 0x6b8   : > { %v3765_v27 = vadd.f32 %v7713_v57, %v3732_v4  ;;  %v3344_v4 = vadd.f32 %v3343_v2, %v7576_v29 }
 0x6ba   : > { %vm3797_vm1 = vcmp.gt.f32.partialorder %v3765_v27, 0.0  ;;  %v3829_v21 = vmul.f32 0.01, %v3765_v27 }
 0x6bb   : > { %v3676_v56 = vpop.f32.mrf.mxu3 }
 0x6bc   : > { %v3453_v45 = vpop.f32.mrf.mxu1  ;;  %v8023_v17 = vsel %vm3797_vm1, %v3765_v27, %v3829_v21  ;;  %v3677_v40 = vadd.f32 %v3676_v56, %v3564_v39 }
 0x6bd   : > { %v3893_v43 = vmul.f32 %v8770_v34, %v8023_v17  ;;  %v4017_v7 = vmax.f32 %v8004_v53, %v8023_v17  ;;  %v3454_v10 = vadd.f32 %v3453_v45, %v3341_v49 }
 0x6be   : > { %v3733_v1 = vmul.f32 %v7698_v58, %v3677_v40 }
 0x6bf   : > { %v3924_v5 = vadd.f32 %v3923_v16, %v3893_v43  ;;  %v3567_v25 = vadd.f32 %v3566_v20, %v3454_v10  ;;  %v523_v16 = vld [vmem:[%s8346_s7 + $0x20] sm:$0xff]  ;;  %v3575_v29 = vpop.f32.mrf.mxu0  ;;  %v3347_v43 = vadd.f32 %v3346_v48, %v7586_v22  ;;  %v3350_v22 = vadd.f32 %v3349_v37, %v7596_v32 }
 0x6c0   : > { %v3766_v50 = vadd.f32 %v7713_v57, %v3733_v1  ;;  %3955 = vmatpush.msra.mxu2 %v523_v16 }
 0x6c2   : > { %vm3798_vm2 = vcmp.gt.f32.partialorder %v3766_v50, 0.0  ;;  %v3830_v60 = vmul.f32 0.01, %v3766_v50 }
 0x6c3   : > { %v3679_v51 = vpop.f32.mrf.mxu3 }
 0x6c4   : > { %v3456_v39 = vpop.f32.mrf.mxu1  ;;  %v8032_v27 = vsel %vm3798_vm2, %v3766_v50, %v3830_v60  ;;  %v3680_v21 = vadd.f32 %v3679_v51, %v3567_v25  ;;  %v3352_v50 = vpop.f32.mrf.mxu2  ;;  %v8771_v60 = vld [vmem:[#allocation38_spill] sm:$0xff] }
 0x6c5   : > { %v3925_v56 = vadd.f32 %v3924_v5, %v8032_v27  ;;  %v3457_v49 = vadd.f32 %v3456_v39, %v3344_v4 }
 0x6c6   : > { %v3734_v45 = vmul.f32 %v7698_v58, %v3680_v21 }
 0x6c7   : > { %v3570_v34 = vadd.f32 %v3569_v52, %v3457_v49 }
 0x6c8   : > { %v3767_v20 = vadd.f32 %v7713_v57, %v3734_v45 }
 0x6ca   : > { %vm3799_vm3 = vcmp.gt.f32.partialorder %v3767_v20, 0.0  ;;  %v3831_v40 = vmul.f32 0.01, %v3767_v20 }
 0x6cb   : > { %v3682_v2 = vpop.f32.mrf.mxu3 }
 0x6cc   : > { %v3459_v10 = vpop.f32.mrf.mxu1  ;;  %v8041_v1 = vsel %vm3799_vm3, %v3767_v20, %v3831_v40  ;;  %v3683_v5 = vadd.f32 %v3682_v2, %v3570_v34  ;;  %v3578_v40 = vpop.f32.mrf.mxu0  ;;  %v522_v2 = vld [vmem:[%s8346_s7 + $0x18] sm:$0xff]  ;;  %vm4212_vm3 = vcmask 7168  }
 0x6cd   : > { %v3895_v25 = vmul.f32 %v8771_v60, %v8041_v1  ;;  %v3460_v51 = vadd.f32 %v3459_v10, %v3347_v43  ;;  %3956 = vmatpush.msra.mxu2 %v522_v2  ;;  %v3355_v10 = vpop.f32.mrf.mxu2 }
 0x6ce   : > { %v3735_v4 = vmul.f32 %v7698_v58, %v3683_v5 }
 0x6cf   : > { %v3926_v39 = vadd.f32 %v3925_v56, %v3895_v25  ;;  %v3573_v16 = vadd.f32 %v3572_v11, %v3460_v51  ;;  %v3353_v25 = vadd.f32 %v3352_v50, %v7607_v28 }
 0x6d0   : > { %v3768_v21 = vadd.f32 %v7713_v57, %v3735_v4 }
 0x6d2   : > { %vm3800_vm4 = vcmp.gt.f32.partialorder %v3768_v21, 0.0  ;;  %v3832_v52 = vmul.f32 0.01, %v3768_v21 }
 0x6d3   : > { %v3685_v49 = vpop.f32.mrf.mxu3 }
 0x6d4   : > { %v3462_v48 = vpop.f32.mrf.mxu1  ;;  %v8048_v45 = vsel %vm3800_vm4, %v3768_v21, %v3832_v52  ;;  %v3686_v20 = vadd.f32 %v3685_v49, %v3573_v16  ;;  %v8772_v21 = vld [vmem:[#allocation39_spill] sm:$0xff]  ;;  %vm4215_vm4 = vcmask 8192  }
 0x6d5   : > { %v3927_v34 = vadd.f32 %v3926_v39, %v8048_v45  ;;  %v4018_v56 = vmax.f32 %v8032_v27, %v8048_v45  ;;  %v3463_v43 = vadd.f32 %v3462_v48, %v3350_v22  ;;  %v3581_v48 = vpop.f32.mrf.mxu0  ;;  %v3358_v2 = vpop.f32.mrf.mxu2  ;;  %v4053_v45 = vld [vmem:[%s8348_s9 + $0x60] sm:$0xff] }
 0x6d6   : > { %v3736_v11 = vmul.f32 %v7698_v58, %v3686_v20 }
 0x6d7   : > { %v3576_v5 = vadd.f32 %v3575_v29, %v3463_v43 }
 0x6d8   : > { %v3769_v32 = vadd.f32 %v7713_v57, %v3736_v11  ;;  %v3356_v11 = vadd.f32 %v3355_v10, %v7617_v55 }
 0x6da   : > { %vm3801_vm5 = vcmp.gt.f32.partialorder %v3769_v32, 0.0  ;;  %v3833_v37 = vmul.f32 0.01, %v3769_v32 }
 0x6db   : > { %v3688_v60 = vpop.f32.mrf.mxu3 }
 0x6dc   : > { %v3465_v51 = vpop.f32.mrf.mxu1  ;;  %v8059_v4 = vsel %vm3801_vm5, %v3769_v32, %v3833_v37  ;;  %v3689_v39 = vadd.f32 %v3688_v60, %v3576_v5 }
 0x6dd   : > { %v3897_v52 = vmul.f32 %v8772_v21, %v8059_v4  ;;  %v3466_v49 = vadd.f32 %v3465_v51, %v3353_v25  ;;  %v3361_v10 = vpop.f32.mrf.mxu2 }
 0x6de   : > { %v3737_v22 = vmul.f32 %v7698_v58, %v3689_v39 }
 0x6df   : > { %v3928_v20 = vadd.f32 %v3927_v34, %v3897_v52  ;;  %v3579_v50 = vadd.f32 %v3578_v40, %v3466_v49  ;;  %v521_v34 = vld [vmem:[%s8346_s7 + $0x10] sm:$0xff]  ;;  %v3584_v40 = vpop.f32.mrf.mxu0  ;;  %v3359_v49 = vadd.f32 %v3358_v2, %v7627_v18  ;;  %v3362_v18 = vadd.f32 %v3361_v10, %v7642_v47 }
 0x6e0   : > { %v3770_v29 = vadd.f32 %v7713_v57, %v3737_v22  ;;  %3957 = vmatpush.msra.mxu2 %v521_v34 }
 0x6e2   : > { %vm3802_vm6 = vcmp.gt.f32.partialorder %v3770_v29, 0.0  ;;  %v3834_v28 = vmul.f32 0.01, %v3770_v29 }
 0x6e3   : > { %v3691_v43 = vpop.f32.mrf.mxu3 }
 0x6e4   : > { %v3468_v32 = vpop.f32.mrf.mxu1  ;;  %v8068_v37 = vsel %vm3802_vm6, %v3770_v29, %v3834_v28  ;;  %v3692_v5 = vadd.f32 %v3691_v43, %v3579_v50  ;;  %v8773_v28 = vld [vmem:[#allocation40_spill] sm:$0xff] }
 0x6e5   : > { %v3929_v60 = vadd.f32 %v3928_v20, %v8068_v37  ;;  %v3469_v25 = vadd.f32 %v3468_v32, %v3356_v11 }
 0x6e6   : > { %v3738_v51 = vmul.f32 %v7698_v58, %v3692_v5 }
 0x6e7   : > { %v3582_v55 = vadd.f32 %v3581_v48, %v3469_v25  ;;  %v3587_v25 = vpop.f32.mrf.mxu0 }
 0x6e8   : > { %v3771_v39 = vadd.f32 %v7713_v57, %v3738_v51 }
 0x6ea   : > { %vm3803_vm7 = vcmp.gt.f32.partialorder %v3771_v39, 0.0  ;;  %v3835_v21 = vmul.f32 0.01, %v3771_v39 }
 0x6eb   : > { %v3694_v52 = vpop.f32.mrf.mxu3 }
 0x6ec   : > { %v3471_v22 = vpop.f32.mrf.mxu1  ;;  %v8077_v20 = vsel %vm3803_vm7, %v3771_v39, %v3835_v21  ;;  %v3695_v29 = vadd.f32 %v3694_v52, %v3582_v55  ;;  %v3364_v55 = vpop.f32.mrf.mxu2 }
 0x6ed   : > { %v3899_v50 = vmul.f32 %v8773_v28, %v8077_v20  ;;  %v3472_v43 = vadd.f32 %v3471_v22, %v3359_v49 }
 0x6ee   : > { %v3739_v11 = vmul.f32 %v7698_v58, %v3695_v29 }
 0x6ef   : > { %v3930_v32 = vadd.f32 %v3929_v60, %v3899_v50  ;;  %v3585_v48 = vadd.f32 %v3584_v40, %v3472_v43  ;;  %v520_v60 = vld [vmem:[%s8346_s7 + $0x8] sm:$0xff]  ;;  %v3590_v28 = vpop.f32.mrf.mxu0  ;;  %v3365_v43 = vadd.f32 %v3364_v55, %v7651_v30 }
 0x6f0   : > { %v3772_v5 = vadd.f32 %v7713_v57, %v3739_v11  ;;  %3958 = vmatpush.msra.mxu2 %v520_v60 }
 0x6f2   : > { %vm3804_vm8 = vcmp.gt.f32.partialorder %v3772_v5, 0.0  ;;  %v3836_v51 = vmul.f32 0.01, %v3772_v5 }
 0x6f3   : > { %v3697_v34 = vpop.f32.mrf.mxu3 }
 0x6f4   : > { %v3474_v2 = vpop.f32.mrf.mxu1  ;;  %v8084_v39 = vsel %vm3804_vm8, %v3772_v5, %v3836_v51  ;;  %v3698_v21 = vadd.f32 %v3697_v34, %v3585_v48  ;;  %v8774_v51 = vld [vmem:[#allocation41_spill] sm:$0xff] }
 0x6f5   : > { %v3931_v52 = vadd.f32 %v3930_v32, %v8084_v39  ;;  %v4020_v49 = vmax.f32 %v8068_v37, %v8084_v39  ;;  %v3475_v22 = vadd.f32 %v3474_v2, %v3362_v18 }
 0x6f6   : > { %v3740_v40 = vmul.f32 %v7698_v58, %v3698_v21  ;;  %v3367_v21 = vpop.f32.mrf.mxu2 }
 0x6f7   : > { %v3588_v29 = vadd.f32 %v3587_v25, %v3475_v22 }
 0x6f8   : > { %v3773_v47 = vadd.f32 %v7713_v57, %v3740_v40  ;;  %v3368_v40 = vadd.f32 %v3367_v21, %v7667_v3 }
 0x6fa   : > { %vm3805_vm9 = vcmp.gt.f32.partialorder %v3773_v47, 0.0  ;;  %v3837_v10 = vmul.f32 0.01, %v3773_v47 }
 0x6fb   : > { %v3700_v50 = vpop.f32.mrf.mxu3 }
 0x6fc   : > { %v3477_v11 = vpop.f32.mrf.mxu1  ;;  %v8095_v32 = vsel %vm3805_vm9, %v3773_v47, %v3837_v10  ;;  %v3701_v5 = vadd.f32 %v3700_v50, %v3588_v29  ;;  %v3593_v50 = vpop.f32.mrf.mxu0 }
 0x6fd   : > { %v3901_v48 = vmul.f32 %v8774_v51, %v8095_v32  ;;  %v4021_v34 = vmax.f32 %v8077_v20, %v8095_v32  ;;  %v3478_v18 = vadd.f32 %v3477_v11, %v3365_v43  ;;  %v519_v43 = vld [vmem:[%s8346_s7] sm:$0xff]  ;;  %v4426_v32 = vld [vmem:[%s8348_s9 + $0x88] sm:$0xff] }
 0x6fe   : > { %v3741_v2 = vmul.f32 %v7698_v58, %v3701_v5  ;;  %3959 = vmatpush.msra.mxu2 %v519_v43  ;;  %v3370_v5 = vpop.f32.mrf.mxu2  ;;  %v4858_v43 = vld [vmem:[%s8345_s6 + $0x1] ss:$0 sm:$0xff] }
 0x6ff   : > { %v3932_v60 = vadd.f32 %v3931_v52, %v3901_v48  ;;  %v3591_v22 = vadd.f32 %v3590_v28, %v3478_v18  ;;  %v4429_v20 = vld [vmem:[%s8348_s9 + $0xa0] sm:$0xff] }
 0x700   : > { %v3774_v25 = vadd.f32 %v7713_v57, %v3741_v2  ;;  %v8775_v2 = vld [vmem:[#allocation34_spill] sm:$0xff] }
 0x701   : > { %v3371_v21 = vadd.f32 %v3370_v5, %v8775_v2 }
 0x702   : > { %vm3806_vm10 = vcmp.gt.f32.partialorder %v3774_v25, 0.0  ;;  %v3838_v30 = vmul.f32 0.01, %v3774_v25 }
 0x703   : > { %v3703_v55 = vpop.f32.mrf.mxu3 }
 0x704   : > { %v3480_v47 = vpop.f32.mrf.mxu1  ;;  %v8104_v10 = vsel %vm3806_vm10, %v3774_v25, %v3838_v30  ;;  %v3704_v29 = vadd.f32 %v3703_v55, %v3591_v22  ;;  %v8776_v30 = vld [vmem:[#allocation42_spill] sm:$0xff] }
 0x705   : > { %v3933_v51 = vadd.f32 %v3932_v60, %v8104_v10  ;;  %v3481_v52 = vadd.f32 %v3480_v47, %v3368_v40  ;;  %v3596_v47 = vpop.f32.mrf.mxu0 }
 0x706   : > { %v3742_v11 = vmul.f32 %v7698_v58, %v3704_v29  ;;  %v4857_v58 = vld [vmem:[%s8345_s6] ss:$0 sm:$0xff] }
 0x707   : > { %v3594_v48 = vadd.f32 %v3593_v50, %v3481_v52  ;;  %v535_v50 = vld [vmem:[%s8347_s8] sm:$0xff] }
 0x708   : > { %v3775_v28 = vadd.f32 %v7713_v57, %v3742_v11  ;;  %3984 = vmatpush.msrb.mxu2 %v535_v50 }
 0x70a   : > { %vm3807_vm11 = vcmp.gt.f32.partialorder %v3775_v28, 0.0  ;;  %v3839_v3 = vmul.f32 0.01, %v3775_v28 }
 0x70b   : > { %v3706_v18 = vpop.f32.mrf.mxu3 }
 0x70c   : > { %v3483_v25 = vpop.f32.mrf.mxu1  ;;  %v8113_v22 = vsel %vm3807_vm11, %v3775_v28, %v3839_v3  ;;  %v3707_v60 = vadd.f32 %v3706_v18, %v3594_v48 }
 0x70d   : > { %v3903_v55 = vmul.f32 %v8776_v30, %v8113_v22  ;;  %v3484_v40 = vadd.f32 %v3483_v25, %v3371_v21  ;;  %v8777_v30 = vld [vmem:[#allocation45_spill] sm:$0xff] }
 0x70e   : > { %v3743_v57 = vmul.f32 %v4857_v58, %v3707_v60 }
 0x70f   : > { %v3934_v29 = vadd.f32 %v3933_v51, %v3903_v55  ;;  %v3597_v11 = vadd.f32 %v3596_v47, %v3484_v40 }
 0x710   : > { %v3776_v52 = vadd.f32 %v4858_v43, %v3743_v57 }
 0x712   : > { %vm3808_vm12 = vcmp.gt.f32.partialorder %v3776_v52, 0.0  ;;  %v3840_v28 = vmul.f32 0.01, %v3776_v52 }
 0x713   : > { %v3709_v5 = vpop.f32.mrf.mxu3 }
 0x714   : > { %v8126_v48 = vsel %vm3808_vm12, %v3776_v52, %v3840_v28  ;;  %v3710_v3 = vadd.f32 %v3709_v5, %v3597_v11 }
 0x715   : > { %v3935_v18 = vadd.f32 %v3934_v29, %v8126_v48  ;;  %v4022_v51 = vmax.f32 %v8104_v10, %v8126_v48 }
 0x716   : > { %v3744_v2 = vmul.f32 %v4857_v58, %v3710_v3 }
 0x718   : > { %v3777_v21 = vadd.f32 %v4858_v43, %v3744_v2 }
 0x71a   : > { %vm3809_vm0 = vcmp.gt.f32.partialorder %v3777_v21, 0.0  ;;  %v3841_v25 = vmul.f32 0.01, %v3777_v21 }
 0x71c   : > { %v3873_v60 = vsel %vm3809_vm0, %v3777_v21, %v3841_v25 }
 0x71d   : > { %v3905_v55 = vmul.f32 %v8777_v30, %v3873_v60  ;;  %v4023_v40 = vmax.f32 %v8113_v22, %v3873_v60 }
 0x71f   : > { %v3936_v57 = vadd.f32 %v3935_v18, %v3905_v55 }
 0x721   : > { %v3937_v47 = vrot.slane %v3936_v57, 4 }
 0x723   : > { %v3938_v50 = vadd.f32 %v3937_v47, %v3936_v57 }
 0x725   : > { %v3939_v52 = vrot.slane %v3938_v50, 2 }
 0x727   : > { %v3940_v28 = vadd.f32 %v3939_v52, %v3938_v50 }
 0x729   : > { %v3941_v11 = vrot.slane %v3940_v28, 1 }
 0x72b   : > { %v3942_v5 = vadd.f32 %v3941_v11, %v3940_v28  ;;  %v4043_v28 = vld [vmem:[%s8348_s9 + $0x10] sm:$0xff]  ;;  %v4042_v11 = vld [vmem:[%s8348_s9 + $0x8] sm:$0xff] }
 0x72d   : > { %v3943_v29 = vmul.f32 0.004166667, %v3942_v5  ;;  %v4041_v5 = vld [vmem:[%s8348_s9] sm:$0xff] }
 0x72f   : > { %3960 = vmatmul.f32.vlgmr.msra.gmra.mxu2 %v3943_v29 }
 0x7b2   : > { %v3961_v16 = vpop.f32.mrf.mxu2 }
 0x7b3   : > { %v3964_v58 = vmax.f32 %v3961_v16, 0.0 }
 0x7b5   : > { %4423 = vmatmul.msk.f32.vlgmr.msrb.gmra.mxu2 %vm3965_vm13, %v3964_v58 }
 0x838   : > { %v3986_v43 = vpop.f32.mrf.mxu2 }
 0x839   : > { %v4424_v3 = vmul.f32 -1.442695, %v3986_v43  ;;  %v8778_v43 = vmax.f32 %v7746_v12, %v7765_v14  ;;  %v4044_v12 = vld [vmem:[%s8348_s9 + $0x18] sm:$0xff] }
 0x83b   : > { %4786 = vpow2.f32 %v4424_v3 }
 0x841   : > { %v4787_v2 = vpop.eup %4786 }
 0x842   : > { %v3992_v21 = vadd.f32 1.0, %v4787_v2 }
 0x844   : > { %4788 = vrcp.f32 %v3992_v21  ;;  %v4004_v60 = vand.u32 2147483648, %v3992_v21  ;;  %v4002_v55 = vand.u32 2147483647, %v3992_v21  ;;  %vm3998_vm15 = vweird.f32 %v3992_v21 }
 0x846   : > { %v4005_v47 = vor.u32 1.1754944e-38, %v4004_v60  ;;  %vm4003_vm2 = vcmp.eq.f32.partialorder %v4002_v55, 8.507059e+37 }
 0x84a   : > { %v4789_v22 = vpop.eup %4788 }
 0x84b   : > { %v3994_v18 = vmul.f32 %v4789_v22, %v3992_v21  ;;  %vm3999_vm14 = vweird.f32 %v4789_v22 }
 0x84c   : > { %vm4000_vm1 = vmor %vm3998_vm15, %vm3999_vm14 }
 0x84d   : > { %v3995_v25 = vsub.f32 1.0, %v3994_v18  ;;  %v4046_v18 = vld [vmem:[%s8348_s9 + $0x28] sm:$0xff] }
 0x84f   : > { %v3996_v30 = vmul.f32 %v4789_v22, %v3995_v25 }
 0x851   : > { %v3997_v57 = vadd.f32 %v4789_v22, %v3996_v30 }
 0x853   : > { %v4001_v50 = vsel %vm4000_vm1, %v4789_v22, %v3997_v57 }
 0x854   : > { %v4006_v16 = vsel %vm4003_vm2, %v4005_v47, %v4001_v50  ;;  %v4049_v47 = vld [vmem:[%s8348_s9 + $0x40] sm:$0xff] }
 0x855   : > { %v8133_v52 = vperm.slane %v4006_v16, 0 }
 0x857   : > { %v4027_v29 = vmul.f32 %v8133_v52, %v4010_v6  ;;  %v4026_v58 = vmul.f32 %v8133_v52, %v4009_v8  ;;  %v4025_v3 = vmul.f32 %v8133_v52, %v8778_v43  ;;  %v4028_v9 = vmul.f32 %v8133_v52, %v4011_v19  ;;  %v4425_v8 = vld [vmem:[%s8348_s9 + $0x80] sm:$0xff]  ;;  %v4438_v43 = vld [vmem:[%s8348_s9 + $0xe8] sm:$0xff] }
 0x858   : > { %v8170_v14 = vmul.f32 %v8133_v52, %v4021_v34  ;;  %v8173_v46 = vmul.f32 %v8133_v52, %v4023_v40  ;;  %v8182_v26 = vmul.f32 %v8133_v52, %v4022_v51  ;;  %v4029_v19 = vmul.f32 %v8133_v52, %v4012_v0  ;;  %v4428_v34 = vld [vmem:[%s8348_s9 + $0x98] sm:$0xff]  ;;  %v4045_v0 = vld [vmem:[%s8348_s9 + $0x20] sm:$0xff] }
 0x859   : > { %v4059_v2 = vmul.f32 %v4043_v28, %v4027_v29  ;;  %v4058_v21 = vmul.f32 %v4042_v11, %v4026_v58  ;;  %v4057_v22 = vmul.f32 %v4041_v5, %v4025_v3  ;;  %v4145_v62 = vmul.f32 %v4427_v42, %v4027_v29 }
 0x85a   : > { %v4060_v24 = vmul.f32 %v4044_v12, %v4028_v9  ;;  %v4143_v6 = vmul.f32 %v4425_v8, %v4025_v3  ;;  %v4147_v10 = vmul.f32 %v4429_v20, %v4029_v19  ;;  %v4144_v48 = vmul.f32 %v4426_v32, %v4026_v58  ;;  %v4052_v58 = vld [vmem:[%s8348_s9 + $0x58] sm:$0xff] }
 0x85b   : > { %4077 = vadd.xlane.f32.xlu0 %v4059_v2  ;;  %4075 = vadd.xlane.f32.xlu2 %v4058_v21  ;;  %v4146_v51 = vmul.f32 %v4428_v34, %v4028_v9  ;;  %v4031_v38 = vmul.f32 %v8133_v52, %v4014_v54  ;;  %v4030_v40 = vmul.f32 %v8133_v52, %v4013_v61  ;;  %v4431_v61 = vld [vmem:[%s8348_s9 + $0xb0] sm:$0xff]  ;;  %v4056_v21 = vld [vmem:[%s8348_s9 + $0x78] sm:$0xff] }
 0x85c   : > { %4073 = vadd.xlane.f32.xlu1 %v4057_v22  ;;  %v4061_v41 = vmul.f32 %v4045_v0, %v4029_v19  ;;  %v4032_v25 = vmul.f32 %v8133_v52, %v4015_v23  ;;  %v4034_v59 = vmul.f32 %v8133_v52, %v4017_v7  ;;  %v4048_v23 = vld [vmem:[%s8348_s9 + $0x38] sm:$0xff]  ;;  %v4033_v57 = vmul.f32 %v8133_v52, %v4016_v13  ;;  %v4434_v13 = vld [vmem:[%s8348_s9 + $0xc8] sm:$0xff]  ;;  %v4055_v9 = vld [vmem:[%s8348_s9 + $0x70] sm:$0xff] }
 0x85d   : > { %v4063_v44 = vmul.f32 %v4047_v35, %v4031_v38  ;;  %v4062_v54 = vmul.f32 %v4046_v18, %v4030_v40  ;;  %v4148_v30 = vmul.f32 %v4430_v63, %v4030_v40  ;;  %v4149_v55 = vmul.f32 %v4431_v61, %v4031_v38  ;;  %v4054_v22 = vld [vmem:[%s8348_s9 + $0x68] sm:$0xff] }
 0x85e   : > { %v4150_v60 = vmul.f32 %v4432_v33, %v4032_v25  ;;  %v4066_v53 = vmul.f32 %v4050_v15, %v4034_v59  ;;  %v4064_v17 = vmul.f32 %v4048_v23, %v4032_v25  ;;  %v4065_v7 = vmul.f32 %v4049_v47, %v4033_v57 }
 0x85f   : > { %v4035_v50 = vmul.f32 %v8133_v52, %v4018_v56  ;;  %v4151_v28 = vmul.f32 %v4433_v36, %v4033_v57  ;;  %v4152_v11 = vmul.f32 %v4434_v13, %v4034_v59  ;;  %v4037_v27 = vmul.f32 %v8133_v52, %v4020_v49  ;;  %v4051_v56 = vld [vmem:[%s8348_s9 + $0x50] sm:$0xff] }
 0x860   : > { %v8779_v5 = vmax.f32 %v8041_v1, %v8059_v4  ;;  %v4436_v1 = vld [vmem:[%s8348_s9 + $0xd8] sm:$0xff]  ;;  %v4437_v4 = vld [vmem:[%s8348_s9 + $0xe0] sm:$0xff]  ;;  %v4072_v42 = vmul.f32 %v4056_v21, %v8173_v46  ;;  %v4070_v12 = vmul.f32 %v4054_v22, %v8170_v14  ;;  %v4071_v8 = vmul.f32 %v4055_v9, %v8182_v26 }
 0x861   : > { %v4153_v16 = vmul.f32 %v4435_v31, %v4035_v50  ;;  %v4069_v37 = vmul.f32 %v4053_v45, %v4037_v27  ;;  %v4067_v39 = vmul.f32 %v4051_v56, %v4035_v50  ;;  %v4155_v2 = vmul.f32 %v4437_v4, %v4037_v27 }
 0x862   : > { %v4036_v29 = vmul.f32 %v8133_v52, %v8779_v5  ;;  %v4156_v52 = vmul.f32 %v4438_v43, %v8170_v14 }
 0x863   : > { %4163 = vadd.xlane.f32.xlu0 %v4145_v62  ;;  %4079 = vadd.xlane.f32.xlu2 %v4060_v24  ;;  %v4439_v62 = vld [vmem:[%s8348_s9 + $0xf0] sm:$0xff]  ;;  %v4440_v24 = vld [vmem:[%s8348_s9 + $0xf8] sm:$0xff] }
 0x864   : > { %4159 = vadd.xlane.f32.xlu1 %v4143_v6  ;;  %v4068_v49 = vmul.f32 %v4052_v58, %v4036_v29  ;;  %v4154_v3 = vmul.f32 %v4436_v1, %v4036_v29  ;;  %v4157_v6 = vmul.f32 %v4439_v62, %v8182_v26  ;;  %v4158_v19 = vmul.f32 %v4440_v24, %v8173_v46 }
 0x86b   : > { %4167 = vadd.xlane.f32.xlu0 %v4147_v10  ;;  %4161 = vadd.xlane.f32.xlu2 %v4144_v48 }
 0x86c   : > { %4165 = vadd.xlane.f32.xlu1 %v4146_v51 }
 0x873   : > { %4085 = vadd.xlane.f32.xlu0 %v4063_v44  ;;  %4081 = vadd.xlane.f32.xlu2 %v4061_v41 }
 0x874   : > { %4083 = vadd.xlane.f32.xlu1 %v4062_v54 }
 0x87b   : > { %4173 = vadd.xlane.f32.xlu0 %v4150_v60  ;;  %4169 = vadd.xlane.f32.xlu2 %v4148_v30 }
 0x87c   : > { %4171 = vadd.xlane.f32.xlu1 %v4149_v55 }
 0x883   : > { %4091 = vadd.xlane.f32.xlu0 %v4066_v53  ;;  %4087 = vadd.xlane.f32.xlu2 %v4064_v17 }
 0x884   : > { %4089 = vadd.xlane.f32.xlu1 %v4065_v7 }
 0x88b   : > { %4179 = vadd.xlane.f32.xlu0 %v4153_v16  ;;  %4175 = vadd.xlane.f32.xlu2 %v4151_v28 }
 0x88c   : > { %4177 = vadd.xlane.f32.xlu1 %v4152_v11 }
 0x893   : > { %4097 = vadd.xlane.f32.xlu0 %v4069_v37  ;;  %4093 = vadd.xlane.f32.xlu2 %v4067_v39 }
 0x894   : > { %4095 = vadd.xlane.f32.xlu1 %v4068_v49 }
 0x89b   : > { %4185 = vadd.xlane.f32.xlu0 %v4156_v52  ;;  %4181 = vadd.xlane.f32.xlu2 %v4154_v3 }
 0x89c   : > { %4183 = vadd.xlane.f32.xlu1 %v4155_v2 }
 0x8a3   : > { %4103 = vadd.xlane.f32.xlu0 %v4072_v42  ;;  %4099 = vadd.xlane.f32.xlu2 %v4070_v12 }
 0x8a4   : > { %4101 = vadd.xlane.f32.xlu1 %v4071_v8 }
 0x8ab   : > { %4187 = vadd.xlane.f32.xlu2 %v4157_v6 }
 0x8ac   : > { %4189 = vadd.xlane.f32.xlu1 %v4158_v19 }
 0x8ce   : > { %v4078_v14 = vpop.xlane.xlu0 %4077  ;;  %v4076_v20 = vpop.xlane.xlu2 %4075 }
 0x8cf   : > { %v4074_v32 = vpop.xlane.xlu1 %4073 }
 0x8d0   : > { %v4105_v26 = vadd.f32 %v4076_v20, %v4074_v32 }
 0x8d2   : > { %v4106_v46 = vadd.f32 %v4105_v26, %v4078_v14 }
 0x8d6   : > { %v4164_v34 = vpop.xlane.xlu0 %4163  ;;  %v4080_v10 = vpop.xlane.xlu2 %4079 }
 0x8d7   : > { %v4160_v48 = vpop.xlane.xlu1 %4159  ;;  %v4107_v61 = vadd.f32 %v4106_v46, %v4080_v10 }
 0x8de   : > { %v4168_v51 = vpop.xlane.xlu0 %4167  ;;  %v4162_v38 = vpop.xlane.xlu2 %4161 }
 0x8df   : > { %v4166_v35 = vpop.xlane.xlu1 %4165  ;;  %v4191_v25 = vadd.f32 %v4162_v38, %v4160_v48 }
 0x8e1   : > { %v4192_v60 = vadd.f32 %v4191_v25, %v4164_v34 }
 0x8e3   : > { %v4193_v59 = vadd.f32 %v4192_v60, %v4166_v35 }
 0x8e5   : > { %v4194_v47 = vadd.f32 %v4193_v59, %v4168_v51 }
 0x8e6   : > { %v4086_v0 = vpop.xlane.xlu0 %4085  ;;  %v4082_v40 = vpop.xlane.xlu2 %4081 }
 0x8e7   : > { %v4084_v18 = vpop.xlane.xlu1 %4083  ;;  %v4108_v55 = vadd.f32 %v4107_v61, %v4082_v40  ;;  %v536_v40 = vld [vmem:[%s8349_s10] sm:$0x1] }
 0x8e9   : > { %v4109_v15 = vadd.f32 %v4108_v55, %v4084_v18 }
 0x8eb   : > { %v4110_v7 = vadd.f32 %v4109_v15, %v4086_v0 }
 0x8ee   : > { %v4174_v44 = vpop.xlane.xlu0 %4173  ;;  %v4170_v41 = vpop.xlane.xlu2 %4169 }
 0x8ef   : > { %v4172_v54 = vpop.xlane.xlu1 %4171  ;;  %v4195_v17 = vadd.f32 %v4194_v47, %v4170_v41 }
 0x8f1   : > { %v4196_v31 = vadd.f32 %v4195_v17, %v4172_v54 }
 0x8f3   : > { %v4197_v11 = vadd.f32 %v4196_v31, %v4174_v44 }
 0x8f6   : > { %v4092_v33 = vpop.xlane.xlu0 %4091  ;;  %v4088_v63 = vpop.xlane.xlu2 %4087 }
 0x8f7   : > { %v4090_v30 = vpop.xlane.xlu1 %4089  ;;  %v4111_v50 = vadd.f32 %v4110_v7, %v4088_v63 }
 0x8f9   : > { %v4112_v16 = vadd.f32 %v4111_v50, %v4090_v30 }
 0x8fb   : > { %v4113_v45 = vadd.f32 %v4112_v16, %v4092_v33 }
 0x8fe   : > { %v4180_v23 = vpop.xlane.xlu0 %4179  ;;  %v4176_v57 = vpop.xlane.xlu2 %4175 }
 0x8ff   : > { %v4178_v53 = vpop.xlane.xlu1 %4177  ;;  %v4198_v27 = vadd.f32 %v4197_v11, %v4176_v57 }
 0x901   : > { %v4199_v29 = vadd.f32 %v4198_v27, %v4178_v53 }
 0x903   : > { %v4200_v49 = vadd.f32 %v4199_v29, %v4180_v23 }
 0x906   : > { %v4098_v36 = vpop.xlane.xlu0 %4097  ;;  %v4094_v13 = vpop.xlane.xlu2 %4093 }
 0x907   : > { %v4096_v28 = vpop.xlane.xlu1 %4095  ;;  %v4114_v56 = vadd.f32 %v4113_v45, %v4094_v13 }
 0x909   : > { %v4115_v39 = vadd.f32 %v4114_v56, %v4096_v28 }
 0x90b   : > { %v4116_v1 = vadd.f32 %v4115_v39, %v4098_v36 }
 0x90e   : > { %v4182_v5 = vpop.xlane.xlu2 %4181  ;;  %v4186_v37 = vpop.xlane.xlu0 %4185 }
 0x90f   : > { %v4184_v58 = vpop.xlane.xlu1 %4183  ;;  %v4201_v43 = vadd.f32 %v4200_v49, %v4182_v5 }
 0x911   : > { %v4202_v2 = vadd.f32 %v4201_v43, %v4184_v58 }
 0x913   : > { %v4203_v12 = vadd.f32 %v4202_v2, %v4186_v37 }
 0x916   : > { %v4100_v4 = vpop.xlane.xlu2 %4099  ;;  %v4104_v22 = vpop.xlane.xlu0 %4103 }
 0x917   : > { %v4117_v52 = vadd.f32 %v4116_v1, %v4100_v4  ;;  %v4102_v3 = vpop.xlane.xlu1 %4101 }
 0x919   : > { %v4118_v21 = vadd.f32 %v4117_v52, %v4102_v3 }
 0x91b   : > { %v4119_v9 = vadd.f32 %v4118_v21, %v4104_v22 }
 0x91d   : > { %v4120_v42 = vrot.slane %v4119_v9, 4 }
 0x91e   : > { %v4188_v8 = vpop.xlane.xlu2 %4187 }
 0x91f   : > { %v4121_v62 = vadd.f32 %v4120_v42, %v4119_v9  ;;  %v4204_v24 = vadd.f32 %v4203_v12, %v4188_v8  ;;  %v4190_v6 = vpop.xlane.xlu1 %4189 }
 0x921   : > { %v4122_v19 = vrot.slane %v4121_v62, 2  ;;  %v4205_v14 = vadd.f32 %v4204_v24, %v4190_v6 }
 0x923   : > { %v4206_v20 = vrot.slane %v4205_v14, 4  ;;  %v4123_v32 = vadd.f32 %v4122_v19, %v4121_v62 }
 0x925   : > { %v4207_v34 = vadd.f32 %v4206_v20, %v4205_v14  ;;  %v4124_v48 = vrot.slane %v4123_v32, 1 }
 0x927   : > { %v4208_v10 = vrot.slane %v4207_v34, 2  ;;  %v4125_v35 = vadd.f32 %v4124_v48, %v4123_v32 }
 0x929   : > { %v4209_v51 = vadd.f32 %v4208_v10, %v4207_v34 }
 0x92b   : > { %v4210_v38 = vrot.slane %v4209_v51, 1 }
 0x92d   : > { %v4211_v0 = vadd.f32 %v4210_v38, %v4209_v51 }
 0x92f   : > { %v4213_v18 = vsel %vm4212_vm3, %v4125_v35, %v4211_v0 }
 0x930   : > { %v4214_v44 = vadd.f32 %v4213_v18, %v536_v40 }
 0x932   : > { %4216 = vst.msk [vmem:[%s379_s16] sm:$0x1] %vm4215_vm4, %v4214_v44 }
 0x933   : > { %4886 = shalt.err (!%p4883_p3)
}
 0x934   : > { %4467 = dma.vmem_to_hbm [thread:$0]  (%p5023_p5), %s4229_s22, 16, %s4231_s24, %s4218_s14  }
 0x935 PF: > { %p4473_p4 = scmp.ge.s32.totalorder %s4921_s20, 2  ;;  %s4242_s29 = sand.u32 1, %s4909_s17  }
 0x936   : > { %s4243_s16 = scalar_lea.sflag [#allocation4], %s4242_s29 }
 0x937   : > { %p4470_p7 = pnand %p4473_p4, %p5027_p6 }
 0x939   : > { %p4471_p8 = pneg %p4470_p7 }
 0x93b   : > { %4904 = dma.done.wait (%p4471_p8), %s4243_s16, 16  }
 0x93c   : > { %4906 = vsyncadd (%p4471_p8), %s4243_s16, 4294967280  ;;  %s8780_s21 = sld [smem:[#allocation6_spill]]  ;;  %p21_p9 = scmp.ge.s32.totalorder %s5010_s23, 4  }
 0x93d   : > { %s8781_s17 = smov %s4913_s18  ;;  %s8782_s18 = smov %s4917_s19 }
 0x93e   : > { %s8784_s20 = smov %s5010_s23  ;;  %23 = sbr.rel (!%p21_p9) target bundleno = 3 (0x3), region = 100 }
 0x942   : > { %s8783_s19 = smov %s8780_s21 }
 0x943   :  { %4248 = vsyncpa [#allocation4], 1 }
 0x944   :  { %4250 = vsyncpa [#allocation4 + $0x1], 1 }

</bundles_post_ra>
